<compile_context>
chip_gen: v7x
topology: tpu7x:2x2x1
jax: 0.10.0
libtpu: 0.0.40
codegen_flags: <defaults>
</compile_context>

<pallas_src>
import jax
import jax.numpy as jnp
from jax.experimental import pallas as pl
from jax.experimental.pallas import tpu as pltpu


_EPS = 1e-5        # nn.InstanceNorm2d default eps
_NEG_SLOPE = 0.2   # nn.LeakyReLU(negative_slope=0.2)
_KS = 3            # sample='none-3' -> PartialConv(kernel=3, stride=1, pad=1)


def pcb_activ_kernel(xp_ref, mp_ref, w_ref, gamma_ref, beta_ref,
                     out_ref, nmask_ref):
    """One grid step processes TB images.

    xp_ref / mp_ref : (TB, H+2, W+2, Cin)  zero-padded image / mask (NHWC)
    w_ref           : (3, 3, Cin, Cout)    input_conv weight (HWIO, bias=False)
    gamma_ref/beta_ref : (1, Cout)         InstanceNorm2d affine params
    out_ref         : (TB, H*W, Cout)      activated output
    nmask_ref       : (TB, H*W, Cout)      updated mask
    """
    tb, hp, wp, cin = xp_ref.shape
    h, w = hp - 2, wp - 2
    cout = out_ref.shape[-1]
    hw = h * w
    rows = tb * hw

    acc = jnp.zeros((rows, cout), jnp.float32)    # input_conv(x * mask)
    msum = jnp.zeros((rows, 1), jnp.float32)      # mask_conv(mask) (same over Cout)

    # 3x3 conv, stride 1: unrolled sum over the 9 taps.
    for dy in range(_KS):
        for dx in range(_KS):
            xpat = xp_ref[:, dy:dy + h, dx:dx + w, :]        # (TB, H, W, Cin)
            mpat = mp_ref[:, dy:dy + h, dx:dx + w, :]
            xm = (xpat * mpat).reshape(rows, cin)            # native dtype
            acc = acc + jnp.dot(xm, w_ref[dy, dx],
                                preferred_element_type=jnp.float32)
            msum = msum + jnp.sum(
                mpat.reshape(rows, cin).astype(jnp.float32),
                axis=-1, keepdims=True)

    # PartialConv renormalization (conv bias is None -> output_bias == 0).
    holes = msum == 0.0
    mask_sum = jnp.where(holes, 1.0, msum)
    out_pc = jnp.where(holes, 0.0, acc / mask_sum)           # (rows, Cout)
    new_mask = jnp.where(holes, 0.0, 1.0)                    # (rows, 1)

    # InstanceNorm2d(affine=True): per-image, per-channel stats over H*W
    # (biased variance, like PyTorch).
    y = out_pc.reshape(tb, hw, cout)
    mean = jnp.mean(y, axis=1, keepdims=True)                # (TB, 1, Cout)
    var = jnp.mean((y - mean) ** 2, axis=1, keepdims=True)
    inv = jax.lax.rsqrt(var + _EPS)
    gamma = gamma_ref[...].reshape(1, 1, cout)
    beta = beta_ref[...].reshape(1, 1, cout)
    y = (y - mean) * inv * gamma + beta

    # LeakyReLU(0.2)
    y = jnp.where(y > 0, y, _NEG_SLOPE * y)

    out_ref[...] = y.astype(out_ref.dtype)
    nmask_ref[...] = jnp.broadcast_to(new_mask, (rows, cout)) \
                        .reshape(tb, hw, cout).astype(nmask_ref.dtype)


def pcb_activ(x, mask, w, gamma, beta):
    """PCBActiv forward (default config) for NCHW inputs.

    x, mask : (N, Cin, H, W);  w : (Cout, Cin, 3, 3);  gamma, beta : (Cout,)
    Returns (out, new_mask), both (N, Cout, H, W).
    """
    n, cin, h, wd = x.shape
    cout = w.shape[0]
    hw = h * wd
    itemsize = jnp.dtype(x.dtype).itemsize

    # NCHW -> NHWC (channels on lanes) + zero-pad spatial once, so the kernel's
    # 9 conv taps are plain static slices of the block.
    pad = ((0, 0), (1, 1), (1, 1), (0, 0))
    xp = jnp.pad(jnp.transpose(x, (0, 2, 3, 1)), pad)
    mp = jnp.pad(jnp.transpose(mask, (0, 2, 3, 1)), pad)
    w_hwio = jnp.transpose(w, (2, 3, 1, 0))                  # (3, 3, Cin, Cout)
    gamma2 = gamma.reshape(1, cout)
    beta2 = beta.reshape(1, cout)

    # Batch-block sizing: amortize ~0.35us/grid-step with blocks of a few MiB,
    # but keep >= 2 grid steps so both v7x TensorCores get work.
    img_bytes = (h + 2) * (wd + 2) * cin * itemsize
    tb = max(1, min(n, (2 << 20) // max(img_bytes, 1)))
    if n >= 2:
        tb = min(tb, n // 2)
    while n % tb:
        tb -= 1
    grid = (n // tb,)

    in_block = tb * img_bytes
    out_block = tb * hw * cout * itemsize
    param_bytes = w_hwio.size * jnp.dtype(w_hwio.dtype).itemsize + 2 * cout * 4
    # 2 inputs + 2 outputs, each double-buffered, plus params and headroom.
    needed = 2 * (2 * in_block) + 2 * (2 * out_block) + param_bytes
    vmem_limit = int(min(64 << 20, max(2 * needed, 16 << 20)))

    out, new_mask = pl.pallas_call(
        pcb_activ_kernel,
        out_shape=(jax.ShapeDtypeStruct((n, hw, cout), x.dtype),
                   jax.ShapeDtypeStruct((n, hw, cout), x.dtype)),
        grid_spec=pltpu.PrefetchScalarGridSpec(
            num_scalar_prefetch=0,
            grid=grid,
            in_specs=[
                pl.BlockSpec((tb, h + 2, wd + 2, cin), lambda i: (i, 0, 0, 0)),
                pl.BlockSpec((tb, h + 2, wd + 2, cin), lambda i: (i, 0, 0, 0)),
                pl.BlockSpec((_KS, _KS, cin, cout), lambda i: (0, 0, 0, 0)),
                pl.BlockSpec((1, cout), lambda i: (0, 0)),
                pl.BlockSpec((1, cout), lambda i: (0, 0)),
            ],
            out_specs=[
                pl.BlockSpec((tb, hw, cout), lambda i: (i, 0, 0)),
                pl.BlockSpec((tb, hw, cout), lambda i: (i, 0, 0)),
            ],
        ),
        compiler_params=pltpu.CompilerParams(
            dimension_semantics=("parallel",),
            vmem_limit_bytes=vmem_limit,
        ),
    )(xp, mp, w_hwio, gamma2, beta2)

    out = jnp.transpose(out.reshape(n, h, wd, cout), (0, 3, 1, 2))
    new_mask = jnp.transpose(new_mask.reshape(n, h, wd, cout), (0, 3, 1, 2))
    return out, new_mask


def pcb_activ_ref(x, mask, w, gamma, beta):
    """Pure-JAX reference matching the PyTorch PCBActiv forward (default path)."""
    dn = jax.lax.conv_dimension_numbers(x.shape, w.shape, ("NCHW", "OIHW", "NCHW"))
    conv = jax.lax.conv_general_dilated(
        x * mask, w, window_strides=(1, 1), padding=((1, 1), (1, 1)),
        dimension_numbers=dn, precision=jax.lax.Precision.HIGHEST)
    mconv = jax.lax.conv_general_dilated(
        mask, jnp.ones_like(w), window_strides=(1, 1), padding=((1, 1), (1, 1)),
        dimension_numbers=dn, precision=jax.lax.Precision.HIGHEST)
    holes = mconv == 0
    mask_sum = jnp.where(holes, 1.0, mconv)
    out = jnp.where(holes, 0.0, conv / mask_sum)
    new_mask = jnp.where(holes, 0.0, 1.0)
    mean = jnp.mean(out, axis=(2, 3), keepdims=True)
    var = jnp.mean((out - mean) ** 2, axis=(2, 3), keepdims=True)
    y = (out - mean) * jax.lax.rsqrt(var + _EPS)
    y = y * gamma.reshape(1, -1, 1, 1) + beta.reshape(1, -1, 1, 1)
    y = jnp.where(y > 0, y, _NEG_SLOPE * y)
    return y, new_mask


if __name__ == "__main__":
    key = jax.random.PRNGKey(0)
    k_x, k_w, k_g, k_b = jax.random.split(key, 4)

    N, Cin, Cout, H, W = 2, 4, 4, 16, 16

    x = jax.random.normal(k_x, (N, Cin, H, W), dtype=jnp.float32)
    # Binary mask with a rectangular hole so the "no_update_holes" path
    # (whole 3x3 receptive field masked out) is exercised.
    mask = jnp.ones((N, Cin, H, W), dtype=jnp.float32)
    mask = mask.at[:, :, 3:10, 5:12].set(0.0)

    # PartialConv input_conv weight (conv_bias=False -> no bias).
    w = jax.random.normal(k_w, (Cout, Cin, 3, 3), dtype=jnp.float32) * 0.2
    # InstanceNorm2d(affine=True) parameters.
    gamma = 1.0 + 0.1 * jax.random.normal(k_g, (Cout,), dtype=jnp.float32)
    beta = 0.1 * jax.random.normal(k_b, (Cout,), dtype=jnp.float32)

    out, new_mask = pcb_activ(x, mask, w, gamma, beta)
    out = jax.block_until_ready(out)
    new_mask = jax.block_until_ready(new_mask)

    ref_out, ref_mask = pcb_activ_ref(x, mask, w, gamma, beta)
    assert out.shape == (N, Cout, H, W) and new_mask.shape == (N, Cout, H, W)
    assert jnp.allclose(out, ref_out, atol=1e-4, rtol=1e-4), (
        float(jnp.max(jnp.abs(out - ref_out))))
    assert jnp.allclose(new_mask, ref_mask, atol=1e-6, rtol=0), (
        float(jnp.max(jnp.abs(new_mask - ref_mask))))

    print("KERNEL_OK")
</pallas_src>

<mosaic_0001>
module attributes {stable_mosaic.version = 11 : i64} {
  func.func @pcb_activ_kernel(%arg0: i32, %arg1: memref<1x18x18x4xf32, #tpu.memory_space<vmem>>, %arg2: memref<1x18x18x4xf32, #tpu.memory_space<vmem>>, %arg3: memref<3x3x4x4xf32, #tpu.memory_space<vmem>>, %arg4: memref<1x4xf32, #tpu.memory_space<vmem>>, %arg5: memref<1x4xf32, #tpu.memory_space<vmem>>, %arg6: memref<1x256x4xf32, #tpu.memory_space<vmem>>, %arg7: memref<1x256x4xf32, #tpu.memory_space<vmem>>) attributes {dimension_semantics = [#tpu.dimension_semantics<parallel>], iteration_bounds = array<i64: 2>, scalar_prefetch = 0 : i64, scratch_operands = 0 : i64, tpu.core_type = #tpu.core_type<tc>, window_params = [{transform_indices = @transform_0, window_bounds = array<i64: 1, 18, 18, 4>}, {transform_indices = @transform_1, window_bounds = array<i64: 1, 18, 18, 4>}, {pipeline_mode = #tpu.pipeline_mode<synchronous>, transform_indices = @transform_2, window_bounds = array<i64: 3, 3, 4, 4>}, {pipeline_mode = #tpu.pipeline_mode<synchronous>, transform_indices = @transform_3, window_bounds = array<i64: 1, 4>}, {pipeline_mode = #tpu.pipeline_mode<synchronous>, transform_indices = @transform_4, window_bounds = array<i64: 1, 4>}, {transform_indices = @transform_5, window_bounds = array<i64: 1, 256, 4>}, {transform_indices = @transform_6, window_bounds = array<i64: 1, 256, 4>}]} {
    %cst = arith.constant 0.000000e+00 : f32
    %0 = vector.broadcast %cst : f32 to vector<256x4xf32>
    %cst_0 = arith.constant 0.000000e+00 : f32
    %1 = vector.broadcast %cst_0 : f32 to vector<256x1xf32>
    %c0 = arith.constant 0 : index
    %c0_1 = arith.constant 0 : index
    %c0_2 = arith.constant 0 : index
    %c0_3 = arith.constant 0 : index
    %2 = vector.load %arg1[%c0, %c0_1, %c0_2, %c0_3] : memref<1x18x18x4xf32, #tpu.memory_space<vmem>>, vector<1x16x16x4xf32>
    %c0_4 = arith.constant 0 : index
    %c0_5 = arith.constant 0 : index
    %c0_6 = arith.constant 0 : index
    %c0_7 = arith.constant 0 : index
    %3 = vector.load %arg2[%c0_4, %c0_5, %c0_6, %c0_7] : memref<1x18x18x4xf32, #tpu.memory_space<vmem>>, vector<1x16x16x4xf32>
    %4 = arith.mulf %2, %3 : vector<1x16x16x4xf32>
    %5 = vector.shape_cast %4 : vector<1x16x16x4xf32> to vector<256x4xf32>
    %c0_8 = arith.constant 0 : index
    %c0_9 = arith.constant 0 : index
    %c0_10 = arith.constant 0 : index
    %c0_11 = arith.constant 0 : index
    %6 = vector.load %arg3[%c0_8, %c0_9, %c0_10, %c0_11] : memref<3x3x4x4xf32, #tpu.memory_space<vmem>>, vector<1x1x4x4xf32>
    %7 = vector.shape_cast %6 : vector<1x1x4x4xf32> to vector<4x4xf32>
    %cst_12 = arith.constant dense<0.000000e+00> : vector<256x4xf32>
    %8 = tpu.matmul %5, %7, %cst_12 {dimension_numbers = #tpu.dot_dimension_numbers<[1], [0], [0], [1], [0, 0, 1, 1], [], []>} : vector<256x4xf32>, vector<4x4xf32>, vector<256x4xf32> -> vector<256x4xf32>
    %9 = arith.addf %0, %8 : vector<256x4xf32>
    %10 = vector.shape_cast %3 : vector<1x16x16x4xf32> to vector<256x4xf32>
    %cst_13 = arith.constant dense<0.000000e+00> : vector<256xf32>
    %11 = vector.multi_reduction <add>, %10, %cst_13 [1] : vector<256x4xf32> to vector<256xf32>
    %12 = vector.shape_cast %11 : vector<256xf32> to vector<256x1xf32>
    %13 = arith.addf %1, %12 : vector<256x1xf32>
    %c0_14 = arith.constant 0 : index
    %c0_15 = arith.constant 0 : index
    %c1 = arith.constant 1 : index
    %c0_16 = arith.constant 0 : index
    %14 = vector.load %arg1[%c0_14, %c0_15, %c1, %c0_16] : memref<1x18x18x4xf32, #tpu.memory_space<vmem>>, vector<1x16x16x4xf32>
    %c0_17 = arith.constant 0 : index
    %c0_18 = arith.constant 0 : index
    %c1_19 = arith.constant 1 : index
    %c0_20 = arith.constant 0 : index
    %15 = vector.load %arg2[%c0_17, %c0_18, %c1_19, %c0_20] : memref<1x18x18x4xf32, #tpu.memory_space<vmem>>, vector<1x16x16x4xf32>
    %16 = arith.mulf %14, %15 : vector<1x16x16x4xf32>
    %17 = vector.shape_cast %16 : vector<1x16x16x4xf32> to vector<256x4xf32>
    %c0_21 = arith.constant 0 : index
    %c1_22 = arith.constant 1 : index
    %c0_23 = arith.constant 0 : index
    %c0_24 = arith.constant 0 : index
    %18 = vector.load %arg3[%c0_21, %c1_22, %c0_23, %c0_24] : memref<3x3x4x4xf32, #tpu.memory_space<vmem>>, vector<1x1x4x4xf32>
    %19 = vector.shape_cast %18 : vector<1x1x4x4xf32> to vector<4x4xf32>
    %cst_25 = arith.constant dense<0.000000e+00> : vector<256x4xf32>
    %20 = tpu.matmul %17, %19, %cst_25 {dimension_numbers = #tpu.dot_dimension_numbers<[1], [0], [0], [1], [0, 0, 1, 1], [], []>} : vector<256x4xf32>, vector<4x4xf32>, vector<256x4xf32> -> vector<256x4xf32>
    %21 = arith.addf %9, %20 : vector<256x4xf32>
    %22 = vector.shape_cast %15 : vector<1x16x16x4xf32> to vector<256x4xf32>
    %cst_26 = arith.constant dense<0.000000e+00> : vector<256xf32>
    %23 = vector.multi_reduction <add>, %22, %cst_26 [1] : vector<256x4xf32> to vector<256xf32>
    %24 = vector.shape_cast %23 : vector<256xf32> to vector<256x1xf32>
    %25 = arith.addf %13, %24 : vector<256x1xf32>
    %c0_27 = arith.constant 0 : index
    %c0_28 = arith.constant 0 : index
    %c2 = arith.constant 2 : index
    %c0_29 = arith.constant 0 : index
    %26 = vector.load %arg1[%c0_27, %c0_28, %c2, %c0_29] : memref<1x18x18x4xf32, #tpu.memory_space<vmem>>, vector<1x16x16x4xf32>
    %c0_30 = arith.constant 0 : index
    %c0_31 = arith.constant 0 : index
    %c2_32 = arith.constant 2 : index
    %c0_33 = arith.constant 0 : index
    %27 = vector.load %arg2[%c0_30, %c0_31, %c2_32, %c0_33] : memref<1x18x18x4xf32, #tpu.memory_space<vmem>>, vector<1x16x16x4xf32>
    %28 = arith.mulf %26, %27 : vector<1x16x16x4xf32>
    %29 = vector.shape_cast %28 : vector<1x16x16x4xf32> to vector<256x4xf32>
    %c0_34 = arith.constant 0 : index
    %c2_35 = arith.constant 2 : index
    %c0_36 = arith.constant 0 : index
    %c0_37 = arith.constant 0 : index
    %30 = vector.load %arg3[%c0_34, %c2_35, %c0_36, %c0_37] : memref<3x3x4x4xf32, #tpu.memory_space<vmem>>, vector<1x1x4x4xf32>
    %31 = vector.shape_cast %30 : vector<1x1x4x4xf32> to vector<4x4xf32>
    %cst_38 = arith.constant dense<0.000000e+00> : vector<256x4xf32>
    %32 = tpu.matmul %29, %31, %cst_38 {dimension_numbers = #tpu.dot_dimension_numbers<[1], [0], [0], [1], [0, 0, 1, 1], [], []>} : vector<256x4xf32>, vector<4x4xf32>, vector<256x4xf32> -> vector<256x4xf32>
    %33 = arith.addf %21, %32 : vector<256x4xf32>
    %34 = vector.shape_cast %27 : vector<1x16x16x4xf32> to vector<256x4xf32>
    %cst_39 = arith.constant dense<0.000000e+00> : vector<256xf32>
    %35 = vector.multi_reduction <add>, %34, %cst_39 [1] : vector<256x4xf32> to vector<256xf32>
    %36 = vector.shape_cast %35 : vector<256xf32> to vector<256x1xf32>
    %37 = arith.addf %25, %36 : vector<256x1xf32>
    %c0_40 = arith.constant 0 : index
    %c1_41 = arith.constant 1 : index
    %c0_42 = arith.constant 0 : index
    %c0_43 = arith.constant 0 : index
    %38 = vector.load %arg1[%c0_40, %c1_41, %c0_42, %c0_43] : memref<1x18x18x4xf32, #tpu.memory_space<vmem>>, vector<1x16x16x4xf32>
    %c0_44 = arith.constant 0 : index
    %c1_45 = arith.constant 1 : index
    %c0_46 = arith.constant 0 : index
    %c0_47 = arith.constant 0 : index
    %39 = vector.load %arg2[%c0_44, %c1_45, %c0_46, %c0_47] : memref<1x18x18x4xf32, #tpu.memory_space<vmem>>, vector<1x16x16x4xf32>
    %40 = arith.mulf %38, %39 : vector<1x16x16x4xf32>
    %41 = vector.shape_cast %40 : vector<1x16x16x4xf32> to vector<256x4xf32>
    %c1_48 = arith.constant 1 : index
    %c0_49 = arith.constant 0 : index
    %c0_50 = arith.constant 0 : index
    %c0_51 = arith.constant 0 : index
    %42 = vector.load %arg3[%c1_48, %c0_49, %c0_50, %c0_51] : memref<3x3x4x4xf32, #tpu.memory_space<vmem>>, vector<1x1x4x4xf32>
    %43 = vector.shape_cast %42 : vector<1x1x4x4xf32> to vector<4x4xf32>
    %cst_52 = arith.constant dense<0.000000e+00> : vector<256x4xf32>
    %44 = tpu.matmul %41, %43, %cst_52 {dimension_numbers = #tpu.dot_dimension_numbers<[1], [0], [0], [1], [0, 0, 1, 1], [], []>} : vector<256x4xf32>, vector<4x4xf32>, vector<256x4xf32> -> vector<256x4xf32>
    %45 = arith.addf %33, %44 : vector<256x4xf32>
    %46 = vector.shape_cast %39 : vector<1x16x16x4xf32> to vector<256x4xf32>
    %cst_53 = arith.constant dense<0.000000e+00> : vector<256xf32>
    %47 = vector.multi_reduction <add>, %46, %cst_53 [1] : vector<256x4xf32> to vector<256xf32>
    %48 = vector.shape_cast %47 : vector<256xf32> to vector<256x1xf32>
    %49 = arith.addf %37, %48 : vector<256x1xf32>
    %c0_54 = arith.constant 0 : index
    %c1_55 = arith.constant 1 : index
    %c1_56 = arith.constant 1 : index
    %c0_57 = arith.constant 0 : index
    %50 = vector.load %arg1[%c0_54, %c1_55, %c1_56, %c0_57] : memref<1x18x18x4xf32, #tpu.memory_space<vmem>>, vector<1x16x16x4xf32>
    %c0_58 = arith.constant 0 : index
    %c1_59 = arith.constant 1 : index
    %c1_60 = arith.constant 1 : index
    %c0_61 = arith.constant 0 : index
    %51 = vector.load %arg2[%c0_58, %c1_59, %c1_60, %c0_61] : memref<1x18x18x4xf32, #tpu.memory_space<vmem>>, vector<1x16x16x4xf32>
    %52 = arith.mulf %50, %51 : vector<1x16x16x4xf32>
    %53 = vector.shape_cast %52 : vector<1x16x16x4xf32> to vector<256x4xf32>
    %c1_62 = arith.constant 1 : index
    %c1_63 = arith.constant 1 : index
    %c0_64 = arith.constant 0 : index
    %c0_65 = arith.constant 0 : index
    %54 = vector.load %arg3[%c1_62, %c1_63, %c0_64, %c0_65] : memref<3x3x4x4xf32, #tpu.memory_space<vmem>>, vector<1x1x4x4xf32>
    %55 = vector.shape_cast %54 : vector<1x1x4x4xf32> to vector<4x4xf32>
    %cst_66 = arith.constant dense<0.000000e+00> : vector<256x4xf32>
    %56 = tpu.matmul %53, %55, %cst_66 {dimension_numbers = #tpu.dot_dimension_numbers<[1], [0], [0], [1], [0, 0, 1, 1], [], []>} : vector<256x4xf32>, vector<4x4xf32>, vector<256x4xf32> -> vector<256x4xf32>
    %57 = arith.addf %45, %56 : vector<256x4xf32>
    %58 = vector.shape_cast %51 : vector<1x16x16x4xf32> to vector<256x4xf32>
    %cst_67 = arith.constant dense<0.000000e+00> : vector<256xf32>
    %59 = vector.multi_reduction <add>, %58, %cst_67 [1] : vector<256x4xf32> to vector<256xf32>
    %60 = vector.shape_cast %59 : vector<256xf32> to vector<256x1xf32>
    %61 = arith.addf %49, %60 : vector<256x1xf32>
    %c0_68 = arith.constant 0 : index
    %c1_69 = arith.constant 1 : index
    %c2_70 = arith.constant 2 : index
    %c0_71 = arith.constant 0 : index
    %62 = vector.load %arg1[%c0_68, %c1_69, %c2_70, %c0_71] : memref<1x18x18x4xf32, #tpu.memory_space<vmem>>, vector<1x16x16x4xf32>
    %c0_72 = arith.constant 0 : index
    %c1_73 = arith.constant 1 : index
    %c2_74 = arith.constant 2 : index
    %c0_75 = arith.constant 0 : index
    %63 = vector.load %arg2[%c0_72, %c1_73, %c2_74, %c0_75] : memref<1x18x18x4xf32, #tpu.memory_space<vmem>>, vector<1x16x16x4xf32>
    %64 = arith.mulf %62, %63 : vector<1x16x16x4xf32>
    %65 = vector.shape_cast %64 : vector<1x16x16x4xf32> to vector<256x4xf32>
    %c1_76 = arith.constant 1 : index
    %c2_77 = arith.constant 2 : index
    %c0_78 = arith.constant 0 : index
    %c0_79 = arith.constant 0 : index
    %66 = vector.load %arg3[%c1_76, %c2_77, %c0_78, %c0_79] : memref<3x3x4x4xf32, #tpu.memory_space<vmem>>, vector<1x1x4x4xf32>
    %67 = vector.shape_cast %66 : vector<1x1x4x4xf32> to vector<4x4xf32>
    %cst_80 = arith.constant dense<0.000000e+00> : vector<256x4xf32>
    %68 = tpu.matmul %65, %67, %cst_80 {dimension_numbers = #tpu.dot_dimension_numbers<[1], [0], [0], [1], [0, 0, 1, 1], [], []>} : vector<256x4xf32>, vector<4x4xf32>, vector<256x4xf32> -> vector<256x4xf32>
    %69 = arith.addf %57, %68 : vector<256x4xf32>
    %70 = vector.shape_cast %63 : vector<1x16x16x4xf32> to vector<256x4xf32>
    %cst_81 = arith.constant dense<0.000000e+00> : vector<256xf32>
    %71 = vector.multi_reduction <add>, %70, %cst_81 [1] : vector<256x4xf32> to vector<256xf32>
    %72 = vector.shape_cast %71 : vector<256xf32> to vector<256x1xf32>
    %73 = arith.addf %61, %72 : vector<256x1xf32>
    %c0_82 = arith.constant 0 : index
    %c2_83 = arith.constant 2 : index
    %c0_84 = arith.constant 0 : index
    %c0_85 = arith.constant 0 : index
    %74 = vector.load %arg1[%c0_82, %c2_83, %c0_84, %c0_85] : memref<1x18x18x4xf32, #tpu.memory_space<vmem>>, vector<1x16x16x4xf32>
    %c0_86 = arith.constant 0 : index
    %c2_87 = arith.constant 2 : index
    %c0_88 = arith.constant 0 : index
    %c0_89 = arith.constant 0 : index
    %75 = vector.load %arg2[%c0_86, %c2_87, %c0_88, %c0_89] : memref<1x18x18x4xf32, #tpu.memory_space<vmem>>, vector<1x16x16x4xf32>
    %76 = arith.mulf %74, %75 : vector<1x16x16x4xf32>
    %77 = vector.shape_cast %76 : vector<1x16x16x4xf32> to vector<256x4xf32>
    %c2_90 = arith.constant 2 : index
    %c0_91 = arith.constant 0 : index
    %c0_92 = arith.constant 0 : index
    %c0_93 = arith.constant 0 : index
    %78 = vector.load %arg3[%c2_90, %c0_91, %c0_92, %c0_93] : memref<3x3x4x4xf32, #tpu.memory_space<vmem>>, vector<1x1x4x4xf32>
    %79 = vector.shape_cast %78 : vector<1x1x4x4xf32> to vector<4x4xf32>
    %cst_94 = arith.constant dense<0.000000e+00> : vector<256x4xf32>
    %80 = tpu.matmul %77, %79, %cst_94 {dimension_numbers = #tpu.dot_dimension_numbers<[1], [0], [0], [1], [0, 0, 1, 1], [], []>} : vector<256x4xf32>, vector<4x4xf32>, vector<256x4xf32> -> vector<256x4xf32>
    %81 = arith.addf %69, %80 : vector<256x4xf32>
    %82 = vector.shape_cast %75 : vector<1x16x16x4xf32> to vector<256x4xf32>
    %cst_95 = arith.constant dense<0.000000e+00> : vector<256xf32>
    %83 = vector.multi_reduction <add>, %82, %cst_95 [1] : vector<256x4xf32> to vector<256xf32>
    %84 = vector.shape_cast %83 : vector<256xf32> to vector<256x1xf32>
    %85 = arith.addf %73, %84 : vector<256x1xf32>
    %c0_96 = arith.constant 0 : index
    %c2_97 = arith.constant 2 : index
    %c1_98 = arith.constant 1 : index
    %c0_99 = arith.constant 0 : index
    %86 = vector.load %arg1[%c0_96, %c2_97, %c1_98, %c0_99] : memref<1x18x18x4xf32, #tpu.memory_space<vmem>>, vector<1x16x16x4xf32>
    %c0_100 = arith.constant 0 : index
    %c2_101 = arith.constant 2 : index
    %c1_102 = arith.constant 1 : index
    %c0_103 = arith.constant 0 : index
    %87 = vector.load %arg2[%c0_100, %c2_101, %c1_102, %c0_103] : memref<1x18x18x4xf32, #tpu.memory_space<vmem>>, vector<1x16x16x4xf32>
    %88 = arith.mulf %86, %87 : vector<1x16x16x4xf32>
    %89 = vector.shape_cast %88 : vector<1x16x16x4xf32> to vector<256x4xf32>
    %c2_104 = arith.constant 2 : index
    %c1_105 = arith.constant 1 : index
    %c0_106 = arith.constant 0 : index
    %c0_107 = arith.constant 0 : index
    %90 = vector.load %arg3[%c2_104, %c1_105, %c0_106, %c0_107] : memref<3x3x4x4xf32, #tpu.memory_space<vmem>>, vector<1x1x4x4xf32>
    %91 = vector.shape_cast %90 : vector<1x1x4x4xf32> to vector<4x4xf32>
    %cst_108 = arith.constant dense<0.000000e+00> : vector<256x4xf32>
    %92 = tpu.matmul %89, %91, %cst_108 {dimension_numbers = #tpu.dot_dimension_numbers<[1], [0], [0], [1], [0, 0, 1, 1], [], []>} : vector<256x4xf32>, vector<4x4xf32>, vector<256x4xf32> -> vector<256x4xf32>
    %93 = arith.addf %81, %92 : vector<256x4xf32>
    %94 = vector.shape_cast %87 : vector<1x16x16x4xf32> to vector<256x4xf32>
    %cst_109 = arith.constant dense<0.000000e+00> : vector<256xf32>
    %95 = vector.multi_reduction <add>, %94, %cst_109 [1] : vector<256x4xf32> to vector<256xf32>
    %96 = vector.shape_cast %95 : vector<256xf32> to vector<256x1xf32>
    %97 = arith.addf %85, %96 : vector<256x1xf32>
    %c0_110 = arith.constant 0 : index
    %c2_111 = arith.constant 2 : index
    %c2_112 = arith.constant 2 : index
    %c0_113 = arith.constant 0 : index
    %98 = vector.load %arg1[%c0_110, %c2_111, %c2_112, %c0_113] : memref<1x18x18x4xf32, #tpu.memory_space<vmem>>, vector<1x16x16x4xf32>
    %c0_114 = arith.constant 0 : index
    %c2_115 = arith.constant 2 : index
    %c2_116 = arith.constant 2 : index
    %c0_117 = arith.constant 0 : index
    %99 = vector.load %arg2[%c0_114, %c2_115, %c2_116, %c0_117] : memref<1x18x18x4xf32, #tpu.memory_space<vmem>>, vector<1x16x16x4xf32>
    %100 = arith.mulf %98, %99 : vector<1x16x16x4xf32>
    %101 = vector.shape_cast %100 : vector<1x16x16x4xf32> to vector<256x4xf32>
    %c2_118 = arith.constant 2 : index
    %c2_119 = arith.constant 2 : index
    %c0_120 = arith.constant 0 : index
    %c0_121 = arith.constant 0 : index
    %102 = vector.load %arg3[%c2_118, %c2_119, %c0_120, %c0_121] : memref<3x3x4x4xf32, #tpu.memory_space<vmem>>, vector<1x1x4x4xf32>
    %103 = vector.shape_cast %102 : vector<1x1x4x4xf32> to vector<4x4xf32>
    %cst_122 = arith.constant dense<0.000000e+00> : vector<256x4xf32>
    %104 = tpu.matmul %101, %103, %cst_122 {dimension_numbers = #tpu.dot_dimension_numbers<[1], [0], [0], [1], [0, 0, 1, 1], [], []>} : vector<256x4xf32>, vector<4x4xf32>, vector<256x4xf32> -> vector<256x4xf32>
    %105 = arith.addf %93, %104 : vector<256x4xf32>
    %106 = vector.shape_cast %99 : vector<1x16x16x4xf32> to vector<256x4xf32>
    %cst_123 = arith.constant dense<0.000000e+00> : vector<256xf32>
    %107 = vector.multi_reduction <add>, %106, %cst_123 [1] : vector<256x4xf32> to vector<256xf32>
    %108 = vector.shape_cast %107 : vector<256xf32> to vector<256x1xf32>
    %109 = arith.addf %97, %108 : vector<256x1xf32>
    %cst_124 = arith.constant 0.000000e+00 : f32
    %110 = vector.broadcast %cst_124 : f32 to vector<256x1xf32>
    %111 = arith.cmpf oeq, %109, %110 : vector<256x1xf32>
    %cst_125 = arith.constant 1.000000e+00 : f32
    %112 = vector.broadcast %cst_125 : f32 to vector<256x1xf32>
    %113 = arith.select %111, %112, %109 : vector<256x1xi1>, vector<256x1xf32>
    %114 = vector.broadcast %113 : vector<256x1xf32> to vector<256x4xf32>
    %115 = arith.divf %105, %114 : vector<256x4xf32>
    %cst_126 = arith.constant 0.000000e+00 : f32
    %116 = vector.shape_cast %111 : vector<256x1xi1> to vector<256x1xi1>
    %117 = vector.broadcast %116 : vector<256x1xi1> to vector<256x4xi1>
    %118 = vector.broadcast %cst_126 : f32 to vector<256x4xf32>
    %119 = arith.select %117, %118, %115 : vector<256x4xi1>, vector<256x4xf32>
    %cst_127 = arith.constant 0.000000e+00 : f32
    %cst_128 = arith.constant 1.000000e+00 : f32
    %120 = vector.broadcast %cst_127 : f32 to vector<256x1xf32>
    %121 = vector.broadcast %cst_128 : f32 to vector<256x1xf32>
    %122 = arith.select %111, %120, %121 : vector<256x1xi1>, vector<256x1xf32>
    %123 = vector.shape_cast %119 : vector<256x4xf32> to vector<1x256x4xf32>
    %cst_129 = arith.constant dense<0.000000e+00> : vector<1x4xf32>
    %124 = vector.multi_reduction <add>, %123, %cst_129 [1] : vector<1x256x4xf32> to vector<1x4xf32>
    %125 = vector.shape_cast %124 : vector<1x4xf32> to vector<1x1x4xf32>
    %cst_130 = arith.constant 2.560000e+02 : f32
    %126 = vector.broadcast %cst_130 : f32 to vector<1x1x4xf32>
    %127 = arith.divf %125, %126 : vector<1x1x4xf32>
    %128 = vector.broadcast %127 : vector<1x1x4xf32> to vector<1x256x4xf32>
    %129 = arith.subf %123, %128 : vector<1x256x4xf32>
    %130 = arith.mulf %129, %129 : vector<1x256x4xf32>
    %cst_131 = arith.constant dense<0.000000e+00> : vector<1x4xf32>
    %131 = vector.multi_reduction <add>, %130, %cst_131 [1] : vector<1x256x4xf32> to vector<1x4xf32>
    %132 = vector.shape_cast %131 : vector<1x4xf32> to vector<1x1x4xf32>
    %cst_132 = arith.constant 2.560000e+02 : f32
    %133 = vector.broadcast %cst_132 : f32 to vector<1x1x4xf32>
    %134 = arith.divf %132, %133 : vector<1x1x4xf32>
    %cst_133 = arith.constant 9.99999974E-6 : f32
    %135 = vector.broadcast %cst_133 : f32 to vector<1x1x4xf32>
    %136 = arith.addf %134, %135 : vector<1x1x4xf32>
    %137 = math.rsqrt %136 : vector<1x1x4xf32>
    %c0_134 = arith.constant 0 : index
    %c0_135 = arith.constant 0 : index
    %138 = vector.load %arg4[%c0_134, %c0_135] : memref<1x4xf32, #tpu.memory_space<vmem>>, vector<1x4xf32>
    %139 = vector.shape_cast %138 : vector<1x4xf32> to vector<1x1x4xf32>
    %c0_136 = arith.constant 0 : index
    %c0_137 = arith.constant 0 : index
    %140 = vector.load %arg5[%c0_136, %c0_137] : memref<1x4xf32, #tpu.memory_space<vmem>>, vector<1x4xf32>
    %141 = vector.shape_cast %140 : vector<1x4xf32> to vector<1x1x4xf32>
    %142 = vector.broadcast %127 : vector<1x1x4xf32> to vector<1x256x4xf32>
    %143 = arith.subf %123, %142 : vector<1x256x4xf32>
    %144 = vector.broadcast %137 : vector<1x1x4xf32> to vector<1x256x4xf32>
    %145 = arith.mulf %143, %144 : vector<1x256x4xf32>
    %146 = vector.broadcast %139 : vector<1x1x4xf32> to vector<1x256x4xf32>
    %147 = arith.mulf %145, %146 : vector<1x256x4xf32>
    %148 = vector.broadcast %141 : vector<1x1x4xf32> to vector<1x256x4xf32>
    %149 = arith.addf %147, %148 : vector<1x256x4xf32>
    %cst_138 = arith.constant 0.000000e+00 : f32
    %150 = vector.broadcast %cst_138 : f32 to vector<1x256x4xf32>
    %151 = arith.cmpf ogt, %149, %150 : vector<1x256x4xf32>
    %cst_139 = arith.constant 2.000000e-01 : f32
    %152 = vector.broadcast %cst_139 : f32 to vector<1x256x4xf32>
    %153 = arith.mulf %152, %149 : vector<1x256x4xf32>
    %154 = arith.select %151, %149, %153 : vector<1x256x4xi1>, vector<1x256x4xf32>
    %c0_140 = arith.constant 0 : index
    %c0_141 = arith.constant 0 : index
    %c0_142 = arith.constant 0 : index
    %155 = vector.load %arg6[%c0_140, %c0_141, %c0_142] : memref<1x256x4xf32, #tpu.memory_space<vmem>>, vector<1x256x4xf32>
    tpu.vector_store %arg6[%c0_140, %c0_141, %c0_142], %154 {strides = array<i32>} : memref<1x256x4xf32, #tpu.memory_space<vmem>>, vector<1x256x4xf32>,
    %156 = vector.shape_cast %122 : vector<256x1xf32> to vector<256x1xf32>
    %157 = vector.broadcast %156 : vector<256x1xf32> to vector<256x4xf32>
    %158 = vector.shape_cast %157 : vector<256x4xf32> to vector<1x256x4xf32>
    %c0_143 = arith.constant 0 : index
    %c0_144 = arith.constant 0 : index
    %c0_145 = arith.constant 0 : index
    %159 = vector.load %arg7[%c0_143, %c0_144, %c0_145] : memref<1x256x4xf32, #tpu.memory_space<vmem>>, vector<1x256x4xf32>
    tpu.vector_store %arg7[%c0_143, %c0_144, %c0_145], %158 {strides = array<i32>} : memref<1x256x4xf32, #tpu.memory_space<vmem>>, vector<1x256x4xf32>,
    return
  }
  func.func @transform_0(%arg0: i32) -> (i32, i32, i32, i32) {
    %c0_i32 = arith.constant 0 : i32
    %c0_i32_0 = arith.constant 0 : i32
    %c0_i32_1 = arith.constant 0 : i32
    %c0_i32_2 = arith.constant 0 : i32
    return %arg0, %c0_i32, %c0_i32_0, %c0_i32_1 : i32, i32, i32, i32
  }
  func.func @transform_1(%arg0: i32) -> (i32, i32, i32, i32) {
    %c0_i32 = arith.constant 0 : i32
    %c0_i32_0 = arith.constant 0 : i32
    %c0_i32_1 = arith.constant 0 : i32
    %c0_i32_2 = arith.constant 0 : i32
    return %arg0, %c0_i32, %c0_i32_0, %c0_i32_1 : i32, i32, i32, i32
  }
  func.func @transform_2(%arg0: i32) -> (i32, i32, i32, i32) {
    %c0_i32 = arith.constant 0 : i32
    %c0_i32_0 = arith.constant 0 : i32
    %c0_i32_1 = arith.constant 0 : i32
    %c0_i32_2 = arith.constant 0 : i32
    %c0_i32_3 = arith.constant 0 : i32
    return %c0_i32, %c0_i32_0, %c0_i32_1, %c0_i32_2 : i32, i32, i32, i32
  }
  func.func @transform_3(%arg0: i32) -> (i32, i32) {
    %c0_i32 = arith.constant 0 : i32
    %c0_i32_0 = arith.constant 0 : i32
    %c0_i32_1 = arith.constant 0 : i32
    return %c0_i32, %c0_i32_0 : i32, i32
  }
  func.func @transform_4(%arg0: i32) -> (i32, i32) {
    %c0_i32 = arith.constant 0 : i32
    %c0_i32_0 = arith.constant 0 : i32
    %c0_i32_1 = arith.constant 0 : i32
    return %c0_i32, %c0_i32_0 : i32, i32
  }
  func.func @transform_5(%arg0: i32) -> (i32, i32, i32) {
    %c0_i32 = arith.constant 0 : i32
    %c0_i32_0 = arith.constant 0 : i32
    %c0_i32_1 = arith.constant 0 : i32
    return %arg0, %c0_i32, %c0_i32_0 : i32, i32, i32
  }
  func.func @transform_6(%arg0: i32) -> (i32, i32, i32) {
    %c0_i32 = arith.constant 0 : i32
    %c0_i32_0 = arith.constant 0 : i32
    %c0_i32_1 = arith.constant 0 : i32
    return %arg0, %c0_i32, %c0_i32_0 : i32, i32, i32
  }
}

</mosaic_0001>

<bundles_post_ra>
// kernel: tpu_custom_call.1
= control target key start
LH: loop header
LB: loop body
LE: loop exit
PB: predicated region body
PF: predicated region fallthrough
CT: control target
= control target key end

     0   :  { %s8253_s21 = smov 0   ;;  %s11822_s0 = inlined_call_operand.vmem [shape: f32[2,18,18,4], index: 0, kind: input, shape index: {}]   ;;  %s11823_s1 = inlined_call_operand.vmem [shape: f32[2,18,18,4], index: 1, kind: input, shape index: {}]   ;;  %s11824_s2 = inlined_call_operand.vmem [shape: f32[3,3,4,4], index: 2, kind: input, shape index: {}]   ;;  %s11825_s3 = inlined_call_operand.vmem [shape: f32[1,4], index: 3, kind: input, shape index: {}]   ;;  %s11826_s4 = inlined_call_operand.vmem [shape: f32[1,4], index: 4, kind: input, shape index: {}]   ;;  %s11827_s5 = inlined_call_operand.vmem [shape: f32[2,256,4], index: 5, kind: output, shape index: {0}]   ;;  %s11828_s6 = inlined_call_operand.vmem [shape: f32[2,256,4], index: 6, kind: output, shape index: {1}]  }
   0x1 LB: > { %s6297_s22 = sadd.s32 4294967295, %s8215_s21   ;;  %p6301_p0 = scmp.ge.s32.totalorder %s8215_s21, 1  ;;  %s8215_s21 = sphi %s8253_s21, %s17_s21  }
   0x2   : > { %p225_p1 = scmp.lt.s32.totalorder %s8215_s21, 3 }
   0x4   : > { %p226_p2 = pnand %p6301_p0, %p225_p1 }
   0x6   : > { %229 = sbr.rel (%p226_p2) target bundleno = 923 (0x39b), region = 40 }
   0xd   : > { %p265_p3 = scmp.lt.s32.totalorder %s6297_s22, 1  ;;  %v6308_v0 = vld [vmem:[%s11824_s2 + $0x4] sm:$0xf]  ;;  %vm705_vm0 = vcmask 1043456   ;;  %v6571_v1 = vld [vmem:[%s11824_s2 + $0x10] sm:$0xf] }
   0xe   : > { %7300 = vmatprep.subr.msk.mxu1 %vm705_vm0, %v6308_v0  ;;  %v6669_v2 = vld [vmem:[%s11824_s2 + $0x14] sm:$0xf]  ;;  %v8274_v3 = vld [vmem:[%s11824_s2] sm:$0xf]  ;;  %7500 = vmatprep.subr.msk.mxu0 %vm705_vm0, %v6571_v1  ;;  %vm382_vm1 = vcmask 31744  }
   0xf   : > { %s12111_s22 = smov (!%p265_p3, %s6297_s22), 1  ;;  %7301 = vmatpush3.msk.msra.mxu1 %vm705_vm0, %v6308_v0  ;;  %7501 = vmatpush3.msk.msra.mxu0 %vm705_vm0, %v6571_v1  ;;  %v8389_v44 = vld [vmem:[%s11824_s2 + $0x18] sm:$0xf] }
  0x10   : > { %7350 = vmatprep.subr.msk.mxu1 %vm705_vm0, %v8274_v3  ;;  %s8008_s7 = smul.u32 432, %s12111_s22  ;;  %7550 = vmatprep.subr.msk.mxu0 %vm705_vm0, %v6669_v2  ;;  %s7001_s28 = sshll.u32 %s12111_s22, 8 }
  0x11   : > { %s11599_s14 = scalar_lea.vmem %s11827_s5, %s7001_s28 }
  0x12   : > { %s8288_s10 = scalar_lea.vmem %s11823_s1, %s8008_s7  ;;  %s8293_s13 = scalar_lea.vmem %s11822_s0, %s8008_s7 }
  0x13   : > { %v8296_v4 = vld [vmem:[%s8288_s10 + $0x18] sm:$0xff]  ;;  %v8299_v5 = vld [vmem:[%s8288_s10] sm:$0xff]  ;;  %v8309_v9 = vld [vmem:[%s8288_s10 + $0x8] sm:$0xff]  ;;  %s10640_s7 = scalar_lea.vmem %s11828_s6, %s7001_s28 }
  0x14   : > { %v389_v6 = vsel %vm382_vm1, %v8296_v4, 0.0  ;;  %v383_v7 = vsel %vm382_vm1, %v8299_v5, 0.0  ;;  %v8306_v8 = vld [vmem:[%s8288_s10 + $0x20] sm:$0xff]  ;;  %v386_v12 = vsel %vm382_vm1, %v8309_v9, 0.0  ;;  %v512_v18 = vld [vmem:[%s8293_s13 + $0x9] sm:$0xff]  ;;  %v8335_v23 = vld [vmem:[%s8288_s10 + $0x38] sm:$0xff] }
  0x15   : > { %390 = vadd.xlane.f32.xlu1 %v389_v6  ;;  %384 = vadd.xlane.f32.xlu0 %v383_v7  ;;  %v511_v10 = vld [vmem:[%s8293_s13 + $0x1] sm:$0xff]  ;;  %v392_v11 = vsel %vm382_vm1, %v8306_v8, 0.0  ;;  %v6507_v14 = vld [vmem:[%s8293_s13 + $0x19] sm:$0xff]  ;;  %v8327_v19 = vld [vmem:[%s8288_s10 + $0x9] sm:$0xff]  ;;  %v398_v27 = vsel %vm382_vm1, %v8335_v23, 0.0 }
  0x16   : > { %v8317_v13 = vld [vmem:[%s8288_s10 + $0x1] sm:$0xff]  ;;  %v8321_v15 = vld [vmem:[%s8288_s10 + $0x19] sm:$0xff]  ;;  %v576_v21 = vmul.f32 %v8327_v19, %v512_v18  ;;  %v8339_v25 = vld [vmem:[%s8288_s10 + $0x30] sm:$0xff] }
  0x17   : > { %v575_v16 = vmul.f32 %v8317_v13, %v511_v10  ;;  %v2616_v17 = vmul.f32 %v8321_v15, %v6507_v14  ;;  %v6508_v20 = vld [vmem:[%s8293_s13 + $0x21] sm:$0xff]  ;;  %v6509_v26 = vld [vmem:[%s8293_s13 + $0x31] sm:$0xff]  ;;  %v395_v28 = vsel %vm382_vm1, %v8339_v25, 0.0  ;;  %v6510_v30 = vld [vmem:[%s8293_s13 + $0x39] sm:$0xff] }
  0x18   : > { %v8332_v22 = vld [vmem:[%s8288_s10 + $0x21] sm:$0xff]  ;;  %v8349_v29 = vld [vmem:[%s8288_s10 + $0x31] sm:$0xff]  ;;  %v8353_v31 = vld [vmem:[%s8288_s10 + $0x39] sm:$0xff] }
  0x19   : > { %393 = vadd.xlane.f32.xlu1 %v392_v11  ;;  %387 = vadd.xlane.f32.xlu0 %v386_v12  ;;  %v2617_v24 = vmul.f32 %v8332_v22, %v6508_v20  ;;  %v2618_v32 = vmul.f32 %v8349_v29, %v6509_v26  ;;  %v2619_v33 = vmul.f32 %v8353_v31, %v6510_v30  ;;  %v8360_v34 = vld [vmem:[%s8288_s10 + $0x50] sm:$0xff]  ;;  %v8363_v35 = vld [vmem:[%s8288_s10 + $0x48] sm:$0xff]  ;;  %v8395_v46 = vld [vmem:[%s8288_s10 + $0x60] sm:$0xff] }
  0x1a   : > { %7302 = vmatprep.mubr.msk.f32.mxu1 %vm382_vm1, %v575_v16  ;;  %7502 = vmatprep.mubr.msk.f32.mxu0 %vm382_vm1, %v2616_v17  ;;  %v6511_v36 = vld [vmem:[%s8293_s13 + $0x49] sm:$0xff]  ;;  %v6512_v39 = vld [vmem:[%s8293_s13 + $0x51] sm:$0xff]  ;;  %v404_v41 = vsel %vm382_vm1, %v8360_v34, 0.0  ;;  %v401_v42 = vsel %vm382_vm1, %v8363_v35, 0.0  ;;  %v6513_v47 = vld [vmem:[%s8293_s13 + $0x61] sm:$0xff]  ;;  %v407_v54 = vsel %vm382_vm1, %v8395_v46, 0.0 }
  0x1b   : > { %7303 = vmatmul.mubr.msk.f32.vlgmr.msra.gmra.mrb[0].mxu1 %vm382_vm1, %v576_v21  ;;  %7503 = vmatmul.mubr.msk.f32.vlgmr.msra.gmra.mrb[0].mxu0 %vm382_vm1, %v2617_v24  ;;  %v8368_v37 = vld [vmem:[%s8288_s10 + $0x49] sm:$0xff]  ;;  %v8374_v40 = vld [vmem:[%s8288_s10 + $0x51] sm:$0xff]  ;;  %v8399_v48 = vld [vmem:[%s8288_s10 + $0x61] sm:$0xff] }
  0x1c   : > { %7305 = vmatprep.mubr.msk.f32.mxu1 %vm382_vm1, %v2616_v17  ;;  %7551 = vmatpush3.msk.msra.mxu0 %vm705_vm0, %v6669_v2  ;;  %v2620_v38 = vmul.f32 %v8368_v37, %v6511_v36  ;;  %v8382_v43 = vld [vmem:[%s8288_s10 + $0x68] sm:$0xff]  ;;  %v2621_v45 = vmul.f32 %v8374_v40, %v6512_v39  ;;  %v2622_v49 = vmul.f32 %v8399_v48, %v6513_v47  ;;  %v6515_v52 = vld [vmem:[%s8293_s13 + $0x79] sm:$0xff]  ;;  %v6517_v62 = vld [vmem:[%s8293_s13 + $0x91] sm:$0xff] }
  0x1d   : > { %399 = vadd.xlane.f32.xlu1 %v398_v27  ;;  %396 = vadd.xlane.f32.xlu0 %v395_v28  ;;  %v6514_v50 = vld [vmem:[%s8293_s13 + $0x69] sm:$0xff]  ;;  %v410_v53 = vsel %vm382_vm1, %v8382_v43, 0.0  ;;  %v8414_v55 = vld [vmem:[%s8288_s10 + $0x79] sm:$0xff]  ;;  %v6516_v60 = vld [vmem:[%s8293_s13 + $0x81] sm:$0xff] }
  0x1e   : > { %7505 = vmatprep.mubr.msk.f32.mxu0 %vm382_vm1, %v2618_v32  ;;  %7351 = vmatpush3.msk.msra.mxu1 %vm705_vm0, %v8274_v3  ;;  %v8406_v51 = vld [vmem:[%s8288_s10 + $0x69] sm:$0xff]  ;;  %v8422_v57 = vld [vmem:[%s8288_s10 + $0x80] sm:$0xff]  ;;  %v8425_v58 = vld [vmem:[%s8288_s10 + $0x78] sm:$0xff]  ;;  %v2624_v59 = vmul.f32 %v8414_v55, %v6515_v52 }
  0x1f   : > { %7306 = vmatmul.mubr.msk.f32.gmra.mrb[2].mxu1 %vm382_vm1, %v2617_v24  ;;  %7506 = vmatmul.mubr.msk.f32.gmra.mrb[2].mxu0 %vm382_vm1, %v2619_v33  ;;  %v2623_v56 = vmul.f32 %v8406_v51, %v6514_v50  ;;  %v8432_v61 = vld [vmem:[%s8288_s10 + $0x81] sm:$0xff]  ;;  %v8436_v63 = vld [vmem:[%s8288_s10 + $0x91] sm:$0xff]  ;;  %v416_v0 = vsel %vm382_vm1, %v8422_v57, 0.0  ;;  %v413_v1 = vsel %vm382_vm1, %v8425_v58, 0.0  ;;  %v6518_v10 = vld [vmem:[%s8293_s13 + $0x99] sm:$0xff] }
  0x20   : > { %7308 = vmatprep.mubr.msk.f32.mxu1 %vm382_vm1, %v2618_v32  ;;  %7508 = vmatprep.mubr.msk.f32.mxu0 %vm382_vm1, %v2620_v38  ;;  %v2625_v2 = vmul.f32 %v8432_v61, %v6516_v60  ;;  %v8446_v3 = vld [vmem:[%s8288_s10 + $0x98] sm:$0xff]  ;;  %v8449_v6 = vld [vmem:[%s8288_s10 + $0x90] sm:$0xff]  ;;  %v2626_v7 = vmul.f32 %v8436_v63, %v6517_v62  ;;  %v8473_v21 = vld [vmem:[%s8288_s10 + $0xa8] sm:$0xff] }
  0x21   : > { %405 = vadd.xlane.f32.xlu1 %v404_v41  ;;  %402 = vadd.xlane.f32.xlu0 %v401_v42  ;;  %v8456_v11 = vld [vmem:[%s8288_s10 + $0x99] sm:$0xff]  ;;  %v6519_v12 = vld [vmem:[%s8293_s13 + $0xa9] sm:$0xff]  ;;  %v422_v16 = vsel %vm382_vm1, %v8446_v3, 0.0  ;;  %v419_v17 = vsel %vm382_vm1, %v8449_v6, 0.0  ;;  %v6520_v26 = vld [vmem:[%s8293_s13 + $0xb1] sm:$0xff] }
  0x22   : > { %7600 = vmatprep.subr.msk.mxu0 %vm705_vm0, %v8389_v44  ;;  %v8460_v14 = vld [vmem:[%s8288_s10 + $0xa9] sm:$0xff]  ;;  %v2627_v18 = vmul.f32 %v8456_v11, %v6518_v10  ;;  %v8480_v27 = vld [vmem:[%s8288_s10 + $0xb1] sm:$0xff]  ;;  %v6521_v28 = vld [vmem:[%s8293_s13 + $0xc1] sm:$0xff] }
  0x23   : > { %7309 = vmatmul.mubr.msk.f32.gmra.mrb[4].mxu1 %vm382_vm1, %v2619_v33  ;;  %7509 = vmatmul.mubr.msk.f32.gmra.mrb[4].mxu0 %vm382_vm1, %v2621_v45  ;;  %v8470_v20 = vld [vmem:[%s8288_s10 + $0xb0] sm:$0xff]  ;;  %v2628_v24 = vmul.f32 %v8460_v14, %v6519_v12  ;;  %v8484_v30 = vld [vmem:[%s8288_s10 + $0xc1] sm:$0xff]  ;;  %v425_v33 = vsel %vm382_vm1, %v8473_v21, 0.0  ;;  %v2629_v36 = vmul.f32 %v8480_v27, %v6520_v26 }
  0x24   : > { %7311 = vmatprep.mubr.msk.f32.mxu1 %vm382_vm1, %v2620_v38  ;;  %7511 = vmatprep.mubr.msk.f32.mxu0 %vm382_vm1, %v2622_v49  ;;  %v428_v32 = vsel %vm382_vm1, %v8470_v20, 0.0  ;;  %v8494_v38 = vld [vmem:[%s8288_s10 + $0xc8] sm:$0xff]  ;;  %v8497_v39 = vld [vmem:[%s8288_s10 + $0xc0] sm:$0xff]  ;;  %v2630_v41 = vmul.f32 %v8484_v30, %v6521_v28 }
  0x25   : > { %411 = vadd.xlane.f32.xlu1 %v410_v53  ;;  %408 = vadd.xlane.f32.xlu0 %v407_v54  ;;  %v6522_v42 = vld [vmem:[%s8293_s13 + $0xc9] sm:$0xff]  ;;  %v6605_v47 = vld [vmem:[%s8293_s13 + $0x1a] sm:$0xff]  ;;  %v434_v50 = vsel %vm382_vm1, %v8494_v38, 0.0  ;;  %v431_v52 = vsel %vm382_vm1, %v8497_v39, 0.0 }
  0x26   : > { %v8518_v54 = vld [vmem:[%s8288_s10 + $0xe0] sm:$0xff] }
  0x27   : > { %7312 = vmatmul.mubr.msk.f32.gmra.mrb[6].mxu1 %vm382_vm1, %v2621_v45  ;;  %7512 = vmatmul.mubr.msk.f32.gmra.mrb[6].mxu0 %vm382_vm1, %v2623_v56  ;;  %v8504_v45 = vld [vmem:[%s8288_s10 + $0xc9] sm:$0xff]  ;;  %v440_v10 = vsel %vm382_vm1, %v8518_v54, 0.0  ;;  %v8557_v26 = vld [vmem:[%s8288_s10 + $0xe1] sm:$0xff] }
  0x28   : > { %7314 = vmatprep.mubr.msk.f32.mxu1 %vm382_vm1, %v2622_v49  ;;  %7514 = vmatprep.mubr.msk.f32.mxu0 %vm382_vm1, %v2624_v59  ;;  %v8508_v49 = vld [vmem:[%s8288_s10 + $0x1a] sm:$0xff]  ;;  %v2631_v53 = vmul.f32 %v8504_v45, %v6522_v42  ;;  %v6606_v60 = vld [vmem:[%s8293_s13 + $0x22] sm:$0xff]  ;;  %v531_v42 = vld [vmem:[%s8293_s13 + $0xf1] sm:$0xff] }
  0x29   : > { %417 = vadd.xlane.f32.xlu1 %v416_v0  ;;  %414 = vadd.xlane.f32.xlu0 %v413_v1  ;;  %11908 = vst [vmem:[#allocation2_spill] sm:$0xff] %v8508_v49  ;;  %v8530_v62 = vld [vmem:[%s8288_s10 + $0x22] sm:$0xff]  ;;  %v529_v0 = vld [vmem:[%s8293_s13 + $0xd9] sm:$0xff] }
  0x2a   : > { %11910 = vst [vmem:[#allocation4_spill] sm:$0xff] %v8530_v62  ;;  %v8534_v1 = vld [vmem:[%s8288_s10 + $0xd9] sm:$0xff] }
  0x2b   : > { %7315 = vmatmul.mubr.msk.f32.gmra.mrb[8].mxu1 %vm382_vm1, %v2623_v56  ;;  %7515 = vmatmul.mubr.msk.f32.gmra.mrb[8].mxu0 %vm382_vm1, %v2625_v2  ;;  %v8521_v56 = vld [vmem:[%s8288_s10 + $0xd8] sm:$0xff]  ;;  %v593_v28 = vmul.f32 %v8534_v1, %v529_v0  ;;  %v8583_v0 = vld [vmem:[%s8288_s10 + $0x110] sm:$0xff] }
  0x2c   : > { %7317 = vmatprep.mubr.msk.f32.mxu1 %vm382_vm1, %v2624_v59  ;;  %7517 = vmatprep.mubr.msk.f32.mxu0 %vm382_vm1, %v2626_v7  ;;  %v8526_v59 = vmul.f32 %v8508_v49, %v6605_v47  ;;  %v437_v12 = vsel %vm382_vm1, %v8521_v56, 0.0  ;;  %v8572_v47 = vld [vmem:[%s8288_s10 + $0xf1] sm:$0xff]  ;;  %11917 = vst [vmem:[#allocation11_spill] sm:$0xff] %v8583_v0  ;;  %v8612_v49 = vld [vmem:[%s8288_s10 + $0x109] sm:$0xff] }
  0x2d   : > { %423 = vadd.xlane.f32.xlu1 %v422_v16  ;;  %420 = vadd.xlane.f32.xlu0 %v419_v17  ;;  %v8545_v16 = vld [vmem:[%s8288_s10 + $0xf8] sm:$0xff]  ;;  %v8550_v17 = vmul.f32 %v8530_v62, %v6606_v60  ;;  %11922 = vst [vmem:[#allocation16_spill] sm:$0xff] %v8612_v49  ;;  %v8616_v62 = vld [vmem:[%s8288_s10 + $0x62] sm:$0xff] }
  0x2e   : > { %11909 = vst [vmem:[#allocation3_spill] sm:$0xff] %v8526_v59  ;;  %11912 = vst [vmem:[#allocation6_spill] sm:$0xff] %v8545_v16 }
  0x2f   : > { %7318 = vmatmul.mubr.msk.f32.gmra.mrb[10].mxu1 %vm382_vm1, %v2625_v2  ;;  %7518 = vmatmul.mubr.msk.f32.gmra.mrb[10].mxu0 %vm382_vm1, %v2627_v18  ;;  %v6607_v2 = vld [vmem:[%s8293_s13 + $0x32] sm:$0xff]  ;;  %11913 = vst [vmem:[#allocation7_spill] sm:$0xff] %v8550_v17  ;;  %11923 = vst [vmem:[#allocation17_spill] sm:$0xff] %v8616_v62 }
  0x30   : > { %7320 = vmatprep.mubr.msk.f32.mxu1 %vm382_vm1, %v2626_v7  ;;  %7520 = vmatprep.mubr.msk.f32.mxu0 %vm382_vm1, %v2628_v24  ;;  %v8538_v7 = vld [vmem:[%s8288_s10 + $0x32] sm:$0xff] }
  0x31   : > { %429 = vadd.xlane.f32.xlu1 %v428_v32  ;;  %426 = vadd.xlane.f32.xlu0 %v425_v33  ;;  %11911 = vst [vmem:[#allocation5_spill] sm:$0xff] %v8538_v7  ;;  %v8564_v32 = vmul.f32 %v8538_v7, %v6607_v2  ;;  %v6608_v33 = vld [vmem:[%s8293_s13 + $0x3a] sm:$0xff] }
  0x32   : > { %v8597_v7 = vld [vmem:[%s8288_s10 + $0xf9] sm:$0xff] }
  0x33   : > { %7321 = vmatmul.mubr.msk.f32.gmra.mrb[12].mxu1 %vm382_vm1, %v2627_v18  ;;  %7521 = vmatmul.mubr.msk.f32.gmra.mrb[12].mxu0 %vm382_vm1, %v2629_v36  ;;  %v8553_v18 = vld [vmem:[%s8288_s10 + $0xf0] sm:$0xff]  ;;  %11914 = vst [vmem:[#allocation8_spill] sm:$0xff] %v8564_v32 }
  0x34   : > { %7323 = vmatprep.mubr.msk.f32.mxu1 %vm382_vm1, %v2628_v24  ;;  %7523 = vmatprep.mubr.msk.f32.mxu0 %vm382_vm1, %v2630_v41  ;;  %v530_v24 = vld [vmem:[%s8293_s13 + $0xe1] sm:$0xff]  ;;  %v443_v60 = vsel %vm382_vm1, %v8553_v18, 0.0 }
  0x35   : > { %435 = vadd.xlane.f32.xlu1 %v434_v50  ;;  %432 = vadd.xlane.f32.xlu0 %v431_v52  ;;  %v8576_v50 = vld [vmem:[%s8288_s10 + $0x4a] sm:$0xff]  ;;  %v446_v52 = vsel %vm382_vm1, %v8545_v16, 0.0  ;;  %v594_v2 = vmul.f32 %v8557_v26, %v530_v24  ;;  %v6610_v24 = vld [vmem:[%s8293_s13 + $0x52] sm:$0xff]  ;;  %v8658_v16 = vld [vmem:[%s8288_s10 + $0x7a] sm:$0xff] }
  0x36   : > { %11916 = vst [vmem:[#allocation10_spill] sm:$0xff] %v8576_v50  ;;  %11931 = vst [vmem:[#allocation25_spill] sm:$0xff] %v8658_v16 }
  0x37   : > { %7324 = vmatmul.mubr.msk.f32.gmra.mrb[14].mxu1 %vm382_vm1, %v2629_v36  ;;  %7524 = vmatmul.mubr.msk.f32.gmra.mrb[14].mxu0 %vm382_vm1, %v2631_v53  ;;  %v8568_v36 = vld [vmem:[%s8288_s10 + $0x3a] sm:$0xff] }
  0x38   : > { %7326 = vmatprep.mubr.msk.f32.mxu1 %vm382_vm1, %v2630_v41  ;;  %7552 = vmatprep.mubr.msk.f32.mxu0 %vm382_vm1, %v8526_v59  ;;  %11915 = vst [vmem:[#allocation9_spill] sm:$0xff] %v8568_v36  ;;  %v6609_v41 = vld [vmem:[%s8293_s13 + $0x4a] sm:$0xff]  ;;  %v532_v59 = vld [vmem:[%s8293_s13 + $0xf9] sm:$0xff] }
  0x39   : > { %441 = vadd.xlane.f32.xlu1 %v440_v10  ;;  %438 = vadd.xlane.f32.xlu0 %v437_v12  ;;  %v8590_v10 = vmul.f32 %v8568_v36, %v6608_v33  ;;  %v8593_v12 = vld [vmem:[%s8288_s10 + $0x108] sm:$0xff]  ;;  %v8608_v33 = vld [vmem:[%s8288_s10 + $0x52] sm:$0xff] }
  0x3a   : > { %11919 = vst [vmem:[#allocation13_spill] sm:$0xff] %v8593_v12  ;;  %11921 = vst [vmem:[#allocation15_spill] sm:$0xff] %v8608_v33  ;;  %v533_v36 = vld [vmem:[%s8293_s13 + $0x109] sm:$0xff] }
  0x3b   : > { %7327 = vmatmul.mubr.msk.f32.gmra.mrb[16].mxu1 %vm382_vm1, %v2631_v53  ;;  %7553 = vmatmul.mubr.msk.f32.vlgmr.msra.gmra.mrb[0].mxu0 %vm382_vm1, %v8550_v17  ;;  %11918 = vst [vmem:[#allocation12_spill] sm:$0xff] %v8590_v10  ;;  %v595_v53 = vmul.f32 %v8572_v47, %v531_v42  ;;  %v8604_v17 = vmul.f32 %v8576_v50, %v6609_v41  ;;  %v452_v42 = vsel %vm382_vm1, %v8583_v0, 0.0  ;;  %v449_v41 = vsel %vm382_vm1, %v8593_v12, 0.0  ;;  %v8635_v50 = vld [vmem:[%s8288_s10 + $0x120] sm:$0xff]  ;;  %v534_v0 = vld [vmem:[%s8293_s13 + $0x111] sm:$0xff] }
  0x3c   : > { %7329 = vmatprep.mubr.msk.f32.mxu1 %vm382_vm1, %v593_v28  ;;  %7555 = vmatprep.mubr.msk.f32.mxu0 %vm382_vm1, %v8564_v32  ;;  %v6611_v28 = vld [vmem:[%s8293_s13 + $0x62] sm:$0xff]  ;;  %11926 = vst [vmem:[#allocation20_spill] sm:$0xff] %v8635_v50  ;;  %v8639_v12 = vld [vmem:[%s8288_s10 + $0x111] sm:$0xff] }
  0x3d   : > { %11920 = vst [vmem:[#allocation14_spill] sm:$0xff] %v8604_v17  ;;  %447 = vadd.xlane.f32.xlu1 %v446_v52  ;;  %444 = vadd.xlane.f32.xlu0 %v443_v60  ;;  %v8623_v32 = vld [vmem:[%s8288_s10 + $0x128] sm:$0xff]  ;;  %v596_v52 = vmul.f32 %v8597_v7, %v532_v59  ;;  %v8632_v60 = vmul.f32 %v8608_v33, %v6610_v24  ;;  %11927 = vst [vmem:[#allocation21_spill] sm:$0xff] %v8639_v12 }
  0x3e   : > { %11924 = vst [vmem:[#allocation18_spill] sm:$0xff] %v8623_v32  ;;  %7601 = vmatpush3.msk.msra.mxu0 %vm705_vm0, %v8389_v44  ;;  %v597_v44 = vmul.f32 %v8612_v49, %v533_v36  ;;  %v6612_v59 = vld [vmem:[%s8293_s13 + $0x6a] sm:$0xff]  ;;  %v8654_v33 = vld [vmem:[%s8288_s10 + $0x121] sm:$0xff]  ;;  %v458_v36 = vsel %vm382_vm1, %v8623_v32, 0.0  ;;  %v8694_v49 = vld [vmem:[%s8288_s10 + $0x139] sm:$0xff] }
  0x3f   : > { %7330 = vmatmul.mubr.msk.f32.gmra.mrb[18].mxu1 %vm382_vm1, %v594_v2  ;;  %7556 = vmatmul.mubr.msk.f32.gmra.mrb[2].mxu0 %vm382_vm1, %v8590_v10  ;;  %11925 = vst [vmem:[#allocation19_spill] sm:$0xff] %v8632_v60  ;;  %v8646_v2 = vmul.f32 %v8616_v62, %v6611_v28  ;;  %v8650_v24 = vld [vmem:[%s8288_s10 + $0x6a] sm:$0xff]  ;;  %v535_v10 = vld [vmem:[%s8293_s13 + $0x121] sm:$0xff]  ;;  %11930 = vst [vmem:[#allocation24_spill] sm:$0xff] %v8654_v33  ;;  %v455_v28 = vsel %vm382_vm1, %v8635_v50, 0.0 }
  0x40   : > { %7332 = vmatprep.mubr.msk.f32.mxu1 %vm382_vm1, %v595_v53  ;;  %7558 = vmatprep.mubr.msk.f32.mxu0 %vm382_vm1, %v8604_v17  ;;  %11929 = vst [vmem:[#allocation23_spill] sm:$0xff] %v8650_v24  ;;  %v6613_v53 = vld [vmem:[%s8293_s13 + $0x7a] sm:$0xff]  ;;  %v536_v32 = vld [vmem:[%s8293_s13 + $0x129] sm:$0xff]  ;;  %11938 = vst [vmem:[#allocation32_spill] sm:$0xff] %v8694_v49 }
  0x41   : > { %11928 = vst [vmem:[#allocation22_spill] sm:$0xff] %v8646_v2  ;;  %453 = vadd.xlane.f32.xlu1 %v452_v42  ;;  %450 = vadd.xlane.f32.xlu0 %v449_v41  ;;  %v8665_v17 = vld [vmem:[%s8288_s10 + $0x140] sm:$0xff]  ;;  %v598_v42 = vmul.f32 %v8639_v12, %v534_v0  ;;  %v8672_v41 = vmul.f32 %v8650_v24, %v6612_v59  ;;  %v8675_v62 = vld [vmem:[%s8288_s10 + $0x138] sm:$0xff]  ;;  %v8679_v50 = vld [vmem:[%s8288_s10 + $0x129] sm:$0xff] }
  0x42   : > { %11932 = vst [vmem:[#allocation26_spill] sm:$0xff] %v8665_v17  ;;  %11934 = vst [vmem:[#allocation28_spill] sm:$0xff] %v8675_v62  ;;  %v6614_v0 = vld [vmem:[%s8293_s13 + $0x82] sm:$0xff]  ;;  %v537_v24 = vld [vmem:[%s8293_s13 + $0x139] sm:$0xff] }
  0x43   : > { %7333 = vmatmul.mubr.msk.f32.gmra.mrb[20].mxu1 %vm382_vm1, %v596_v52  ;;  %7559 = vmatmul.mubr.msk.f32.gmra.mrb[4].mxu0 %vm382_vm1, %v8632_v60  ;;  %11933 = vst [vmem:[#allocation27_spill] sm:$0xff] %v8672_v41  ;;  %11935 = vst [vmem:[#allocation29_spill] sm:$0xff] %v8679_v50  ;;  %v599_v52 = vmul.f32 %v8654_v33, %v535_v10  ;;  %v8686_v60 = vmul.f32 %v8658_v16, %v6613_v53  ;;  %v8690_v59 = vld [vmem:[%s8288_s10 + $0x82] sm:$0xff]  ;;  %v8698_v12 = vld [vmem:[%s8288_s10 + $0x92] sm:$0xff]  ;;  %v464_v10 = vsel %vm382_vm1, %v8665_v17, 0.0 }
  0x44   : > { %7335 = vmatprep.mubr.msk.f32.mxu1 %vm382_vm1, %v597_v44  ;;  %7561 = vmatprep.mubr.msk.f32.mxu0 %vm382_vm1, %v8646_v2  ;;  %11937 = vst [vmem:[#allocation31_spill] sm:$0xff] %v8690_v59  ;;  %v6615_v44 = vld [vmem:[%s8293_s13 + $0x92] sm:$0xff]  ;;  %11939 = vst [vmem:[#allocation33_spill] sm:$0xff] %v8698_v12  ;;  %v461_v53 = vsel %vm382_vm1, %v8675_v62, 0.0  ;;  %v538_v17 = vld [vmem:[%s8293_s13 + $0x141] sm:$0xff] }
  0x45   : > { %11936 = vst [vmem:[#allocation30_spill] sm:$0xff] %v8686_v60  ;;  %459 = vadd.xlane.f32.xlu1 %v458_v36  ;;  %456 = vadd.xlane.f32.xlu0 %v455_v28  ;;  %v8705_v2 = vld [vmem:[%s8288_s10 + $0x158] sm:$0xff]  ;;  %v600_v36 = vmul.f32 %v8679_v50, %v536_v32  ;;  %v8712_v28 = vmul.f32 %v8690_v59, %v6614_v0  ;;  %v8715_v16 = vld [vmem:[%s8288_s10 + $0x150] sm:$0xff]  ;;  %v8719_v62 = vld [vmem:[%s8288_s10 + $0x141] sm:$0xff] }
  0x46   : > { %11940 = vst [vmem:[#allocation34_spill] sm:$0xff] %v8705_v2  ;;  %11942 = vst [vmem:[#allocation36_spill] sm:$0xff] %v8715_v16  ;;  %v6616_v32 = vld [vmem:[%s8293_s13 + $0x9a] sm:$0xff]  ;;  %v539_v59 = vld [vmem:[%s8293_s13 + $0x151] sm:$0xff] }
  0x47   : > { %7336 = vmatmul.mubr.msk.f32.gmra.mrb[22].mxu1 %vm382_vm1, %v598_v42  ;;  %7562 = vmatmul.mubr.msk.f32.gmra.mrb[6].mxu0 %vm382_vm1, %v8672_v41  ;;  %11941 = vst [vmem:[#allocation35_spill] sm:$0xff] %v8712_v28  ;;  %v601_v42 = vmul.f32 %v8694_v49, %v537_v24  ;;  %v8726_v41 = vmul.f32 %v8698_v12, %v6615_v44  ;;  %v8730_v0 = vld [vmem:[%s8288_s10 + $0x9a] sm:$0xff]  ;;  %v8734_v33 = vld [vmem:[%s8288_s10 + $0x151] sm:$0xff]  ;;  %v470_v24 = vsel %vm382_vm1, %v8705_v2, 0.0  ;;  %v467_v44 = vsel %vm382_vm1, %v8715_v16, 0.0  ;;  %v8755_v12 = vld [vmem:[%s8288_s10 + $0x168] sm:$0xff] }
  0x48   : > { %7338 = vmatprep.mubr.msk.f32.mxu1 %vm382_vm1, %v599_v52  ;;  %7564 = vmatprep.mubr.msk.f32.mxu0 %vm382_vm1, %v8686_v60  ;;  %11944 = vst [vmem:[#allocation38_spill] sm:$0xff] %v8730_v0  ;;  %11945 = vst [vmem:[#allocation39_spill] sm:$0xff] %v8734_v33  ;;  %v6617_v52 = vld [vmem:[%s8293_s13 + $0xaa] sm:$0xff]  ;;  %v540_v2 = vld [vmem:[%s8293_s13 + $0x159] sm:$0xff] }
  0x49   : > { %11943 = vst [vmem:[#allocation37_spill] sm:$0xff] %v8726_v41  ;;  %465 = vadd.xlane.f32.xlu1 %v464_v10  ;;  %462 = vadd.xlane.f32.xlu0 %v461_v53  ;;  %v8738_v50 = vld [vmem:[%s8288_s10 + $0xaa] sm:$0xff]  ;;  %v602_v10 = vmul.f32 %v8719_v62, %v538_v17  ;;  %v8752_v53 = vmul.f32 %v8730_v0, %v6616_v32  ;;  %11949 = vst [vmem:[#allocation43_spill] sm:$0xff] %v8755_v12  ;;  %v8759_v49 = vld [vmem:[%s8288_s10 + $0x159] sm:$0xff] }
  0x4a   : > { %11946 = vst [vmem:[#allocation40_spill] sm:$0xff] %v8738_v50  ;;  %v8745_v60 = vld [vmem:[%s8288_s10 + $0x170] sm:$0xff] }
  0x4b   : > { %11947 = vst [vmem:[#allocation41_spill] sm:$0xff] %v8745_v60  ;;  %7339 = vmatmul.mubr.msk.f32.gmra.mrb[24].mxu1 %vm382_vm1, %v600_v36  ;;  %7565 = vmatmul.mubr.msk.f32.gmra.mrb[8].mxu0 %vm382_vm1, %v8712_v28  ;;  %11948 = vst [vmem:[#allocation42_spill] sm:$0xff] %v8752_v53  ;;  %v603_v36 = vmul.f32 %v8734_v33, %v539_v59  ;;  %v8766_v28 = vmul.f32 %v8738_v50, %v6617_v52  ;;  %v6618_v17 = vld [vmem:[%s8293_s13 + $0xb2] sm:$0xff]  ;;  %v541_v32 = vld [vmem:[%s8293_s13 + $0x169] sm:$0xff]  ;;  %v476_v59 = vsel %vm382_vm1, %v8745_v60, 0.0 }
  0x4c   : > { %7341 = vmatprep.mubr.msk.f32.mxu1 %vm382_vm1, %v601_v42  ;;  %7567 = vmatprep.mubr.msk.f32.mxu0 %vm382_vm1, %v8726_v41  ;;  %v8770_v16 = vld [vmem:[%s8288_s10 + $0xb2] sm:$0xff]  ;;  %v8774_v0 = vld [vmem:[%s8288_s10 + $0x169] sm:$0xff]  ;;  %v473_v52 = vsel %vm382_vm1, %v8755_v12, 0.0 }
  0x4d   : > { %11950 = vst [vmem:[#allocation44_spill] sm:$0xff] %v8766_v28  ;;  %471 = vadd.xlane.f32.xlu1 %v470_v24  ;;  %468 = vadd.xlane.f32.xlu0 %v467_v44  ;;  %v6619_v42 = vld [vmem:[%s8293_s13 + $0xc2] sm:$0xff]  ;;  %v604_v24 = vmul.f32 %v8759_v49, %v540_v2  ;;  %v8789_v44 = vmul.f32 %v8770_v16, %v6618_v17  ;;  %v542_v50 = vld [vmem:[%s8293_s13 + $0x171] sm:$0xff]  ;;  %v6621_v17 = vld [vmem:[%s8293_s13 + $0xda] sm:$0xff] }
  0x4e   : > { %v8778_v41 = vld [vmem:[%s8288_s10 + $0xc2] sm:$0xff]  ;;  %v605_v60 = vmul.f32 %v8774_v0, %v541_v32  ;;  %v8800_v12 = vld [vmem:[%s8288_s10 + $0x171] sm:$0xff]  ;;  %v1261_v32 = vsel %vm382_vm1, %v8327_v19, 0.0 }
  0x4f   : > { %11951 = vst [vmem:[#allocation45_spill] sm:$0xff] %v8778_v41  ;;  %7342 = vmatmul.mubr.msk.f32.gmra.mrb[26].mxu1 %vm382_vm1, %v602_v10  ;;  %7568 = vmatmul.mubr.msk.f32.gmra.mrb[10].mxu0 %vm382_vm1, %v8752_v53  ;;  %v8797_v10 = vmul.f32 %v8778_v41, %v6619_v42  ;;  %v6620_v53 = vld [vmem:[%s8293_s13 + $0xca] sm:$0xff]  ;;  %v285_v2 = vld [vmem:[%s8293_s13] sm:$0xff]  ;;  %v1258_v42 = vsel %vm382_vm1, %v8317_v13, 0.0 }
  0x50   : > { %7344 = vmatprep.mubr.msk.f32.mxu1 %vm382_vm1, %v603_v36  ;;  %7570 = vmatprep.mubr.msk.f32.mxu0 %vm382_vm1, %v8766_v28  ;;  %v8804_v33 = vld [vmem:[%s8288_s10 + $0xca] sm:$0xff]  ;;  %v8809_v36 = vld [vmem:[%s8288_s10 + $0xda] sm:$0xff]  ;;  %v349_v41 = vmul.f32 %v8299_v5, %v285_v2  ;;  %v6622_v19 = vld [vmem:[%s8293_s13 + $0xe2] sm:$0xff]  ;;  %v1267_v2 = vsel %vm382_vm1, %v8332_v22, 0.0 }
  0x51   : > { %11952 = vst [vmem:[#allocation46_spill] sm:$0xff] %v8797_v10  ;;  %477 = vadd.xlane.f32.xlu1 %v476_v59  ;;  %474 = vadd.xlane.f32.xlu0 %v473_v52  ;;  %v286_v28 = vld [vmem:[%s8293_s13 + $0x8] sm:$0xff]  ;;  %v606_v59 = vmul.f32 %v8800_v12, %v542_v50  ;;  %v8821_v52 = vmul.f32 %v8804_v33, %v6620_v53  ;;  %v287_v53 = vld [vmem:[%s8293_s13 + $0x18] sm:$0xff] }
  0x52   : > { %v8828_v13 = vmul.f32 %v8809_v36, %v6621_v17  ;;  %v6375_v50 = vld [vmem:[%s11824_s2 + $0x8] sm:$0xf]  ;;  %v6623_v5 = vld [vmem:[%s8293_s13 + $0xf2] sm:$0xff]  ;;  %v1264_v17 = vsel %vm382_vm1, %v8321_v15, 0.0  ;;  %v8857_v22 = vld [vmem:[%s11824_s2 + $0x1c] sm:$0xf]  ;;  %v351_v15 = vmul.f32 %v8296_v4, %v287_v53 }
  0x53   : > { %7345 = vmatmul.mubr.msk.f32.gmra.mrb[28].mxu1 %vm382_vm1, %v604_v24  ;;  %7571 = vmatmul.mubr.msk.f32.gmra.mrb[12].mxu0 %vm382_vm1, %v8789_v44  ;;  %11953 = vst [vmem:[#allocation47_spill] sm:$0xff] %v8821_v52  ;;  %v8832_v24 = vld [vmem:[%s8288_s10 + $0xe2] sm:$0xff]  ;;  %v8874_v4 = vld [vmem:[%s8288_s10 + $0x10a] sm:$0xff]  ;;  %v1270_v53 = vsel %vm382_vm1, %v8349_v29, 0.0  ;;  %v6626_v29 = vld [vmem:[%s8293_s13 + $0x112] sm:$0xff] }
  0x54   : > { %7347 = vmatprep.mubr.msk.f32.mxu1 %vm382_vm1, %v605_v60  ;;  %7573 = vmatprep.mubr.msk.f32.mxu0 %vm382_vm1, %v8797_v10  ;;  %v8840_v60 = vld [vmem:[%s8288_s10 + $0xf2] sm:$0xff]  ;;  %v350_v10 = vmul.f32 %v8309_v9, %v286_v28  ;;  %v6624_v28 = vld [vmem:[%s8293_s13 + $0xfa] sm:$0xff] }
  0x55   : > { %1262 = vadd.xlane.f32.xlu1 %v1261_v32  ;;  %1259 = vadd.xlane.f32.xlu0 %v1258_v42  ;;  %v8852_v32 = vmul.f32 %v8832_v24, %v6622_v19  ;;  %v288_v42 = vld [vmem:[%s8293_s13 + $0x20] sm:$0xff]  ;;  %v8865_v9 = vmul.f32 %v8840_v60, %v6623_v5  ;;  %v289_v19 = vld [vmem:[%s8293_s13 + $0x30] sm:$0xff] }
  0x56   : > { %7400 = vmatprep.subr.msk.mxu1 %vm705_vm0, %v6375_v50  ;;  %7650 = vmatprep.subr.msk.mxu0 %vm705_vm0, %v8857_v22  ;;  %v352_v5 = vmul.f32 %v8306_v8, %v288_v42  ;;  %v291_v42 = vld [vmem:[%s8293_s13 + $0x48] sm:$0xff] }
  0x57   : > { %7348 = vmatmul.mubr.msk.f32.gmra.mrb[30].mxu1 %vm382_vm1, %v606_v59  ;;  %7574 = vmatmul.mubr.msk.f32.gmra.mrb[14].mxu0 %vm382_vm1, %v8821_v52  ;;  %v8869_v59 = vld [vmem:[%s8288_s10 + $0xfa] sm:$0xff]  ;;  %v6625_v52 = vld [vmem:[%s8293_s13 + $0x10a] sm:$0xff] }
  0x58   : > { %7352 = vmatprep.mubr.msk.f32.mxu1 %vm382_vm1, %v349_v41  ;;  %7576 = vmatprep.mubr.msk.f32.mxu0 %vm382_vm1, %v8828_v13  ;;  %v1273_v41 = vsel %vm382_vm1, %v8353_v31, 0.0  ;;  %v8893_v31 = vmul.f32 %v8339_v25, %v289_v19  ;;  %v8899_v8 = vmul.f32 %v8874_v4, %v6625_v52  ;;  %v8908_v25 = vld [vmem:[%s8288_s10 + $0x122] sm:$0xff]  ;;  %v1276_v19 = vsel %vm382_vm1, %v8368_v37, 0.0  ;;  %v6628_v37 = vld [vmem:[%s8293_s13 + $0x12a] sm:$0xff] }
  0x59   : > { %1268 = vadd.xlane.f32.xlu1 %v1267_v2  ;;  %1265 = vadd.xlane.f32.xlu0 %v1264_v17  ;;  %v8887_v2 = vmul.f32 %v8869_v59, %v6624_v28  ;;  %v8890_v17 = vld [vmem:[%s8293_s13 + $0x38] sm:$0xff]  ;;  %v6627_v28 = vld [vmem:[%s8293_s13 + $0x122] sm:$0xff] }
  0x5a   : > { %11955 = vst [vmem:[#allocation49_spill] sm:$0xff] %v8899_v8  ;;  %v354_v52 = vmul.f32 %v8335_v23, %v8890_v17  ;;  %v8932_v23 = vmul.f32 %v8908_v25, %v6627_v28 }
  0x5b   : > { %7353 = vmatmul.mubr.msk.f32.vlgmr.msra.gmra.mrb[0].mxu1 %vm382_vm1, %v350_v10  ;;  %7577 = vmatmul.mubr.msk.f32.gmra.mrb[16].mxu0 %vm382_vm1, %v8852_v32  ;;  %11954 = vst [vmem:[#allocation48_spill] sm:$0xff] %v8887_v2  ;;  %v8903_v10 = vld [vmem:[%s8288_s10 + $0x112] sm:$0xff] }
  0x5c   : > { %7355 = vmatprep.mubr.msk.f32.mxu1 %vm382_vm1, %v351_v15  ;;  %7579 = vmatprep.mubr.msk.f32.mxu0 %vm382_vm1, %v8865_v9  ;;  %v1279_v15 = vsel %vm382_vm1, %v8374_v40, 0.0  ;;  %v292_v40 = vld [vmem:[%s8293_s13 + $0x50] sm:$0xff]  ;;  %11956 = vst [vmem:[#allocation50_spill] sm:$0xff] %v8932_v23 }
  0x5d   : > { %1274 = vadd.xlane.f32.xlu1 %v1273_v41  ;;  %1271 = vadd.xlane.f32.xlu0 %v1270_v53  ;;  %v8921_v41 = vmul.f32 %v8903_v10, %v6626_v29  ;;  %v8925_v53 = vmul.f32 %v8363_v35, %v291_v42  ;;  %v6629_v29 = vld [vmem:[%s8293_s13 + $0x13a] sm:$0xff]  ;;  %v1285_v42 = vsel %vm382_vm1, %v8406_v51, 0.0  ;;  %v8948_v28 = vmul.f32 %v8360_v34, %v292_v40  ;;  %v8969_v51 = vld [vmem:[%s8288_s10 + $0x142] sm:$0xff]  ;;  %v6631_v40 = vld [vmem:[%s8293_s13 + $0x152] sm:$0xff] }
  0x5e   : > { %7401 = vmatpush3.msk.msra.mxu1 %vm705_vm0, %v6375_v50  ;;  %v8936_v50 = vld [vmem:[%s8288_s10 + $0x12a] sm:$0xff]  ;;  %v8941_v35 = vld [vmem:[%s8288_s10 + $0x13a] sm:$0xff] }
  0x5f   : > { %7356 = vmatmul.mubr.msk.f32.gmra.mrb[2].mxu1 %vm382_vm1, %v352_v5  ;;  %7580 = vmatmul.mubr.msk.f32.gmra.mrb[18].mxu0 %vm382_vm1, %v8887_v2  ;;  %v293_v5 = vld [vmem:[%s8293_s13 + $0x60] sm:$0xff]  ;;  %v294_v2 = vld [vmem:[%s8293_s13 + $0x68] sm:$0xff]  ;;  %v8965_v34 = vmul.f32 %v8941_v35, %v6629_v29  ;;  %v1288_v29 = vsel %vm382_vm1, %v8414_v55, 0.0 }
  0x60   : > { %7358 = vmatprep.mubr.msk.f32.mxu1 %vm382_vm1, %v8893_v31  ;;  %7582 = vmatprep.mubr.msk.f32.mxu0 %vm382_vm1, %v8899_v8  ;;  %v1282_v8 = vsel %vm382_vm1, %v8399_v48, 0.0  ;;  %v6630_v48 = vld [vmem:[%s8293_s13 + $0x142] sm:$0xff] }
  0x61   : > { %1280 = vadd.xlane.f32.xlu1 %v1279_v15  ;;  %1277 = vadd.xlane.f32.xlu0 %v1276_v19  ;;  %v8955_v15 = vmul.f32 %v8936_v50, %v6628_v37  ;;  %v8958_v19 = vmul.f32 %v8395_v46, %v293_v5  ;;  %11958 = vst [vmem:[#allocation52_spill] sm:$0xff] %v8965_v34  ;;  %v295_v46 = vld [vmem:[%s8293_s13 + $0x78] sm:$0xff]  ;;  %v1291_v5 = vsel %vm382_vm1, %v8432_v61, 0.0  ;;  %v296_v61 = vld [vmem:[%s8293_s13 + $0x80] sm:$0xff] }
  0x62   : > { %v8979_v37 = vld [vmem:[%s8288_s10 + $0x152] sm:$0xff]  ;;  %v8999_v55 = vmul.f32 %v8425_v58, %v295_v46  ;;  %v6633_v58 = vld [vmem:[%s8293_s13 + $0x16a] sm:$0xff]  ;;  %v1297_v46 = vsel %vm382_vm1, %v8456_v11, 0.0 }
  0x63   : > { %7359 = vmatmul.mubr.msk.f32.gmra.mrb[4].mxu1 %vm382_vm1, %v354_v52  ;;  %7583 = vmatmul.mubr.msk.f32.gmra.mrb[20].mxu0 %vm382_vm1, %v8921_v41  ;;  %11957 = vst [vmem:[#allocation51_spill] sm:$0xff] %v8955_v15  ;;  %v8974_v52 = vld [vmem:[%s11824_s2 + $0xc] sm:$0xf] }
  0x64   : > { %7361 = vmatprep.mubr.msk.f32.mxu1 %vm382_vm1, %v8925_v53  ;;  %7585 = vmatprep.mubr.msk.f32.mxu0 %vm382_vm1, %v8932_v23  ;;  %v9010_v23 = vld [vmem:[%s8288_s10 + $0x15a] sm:$0xff] }
  0x65   : > { %1286 = vadd.xlane.f32.xlu1 %v1285_v42  ;;  %1283 = vadd.xlane.f32.xlu0 %v1282_v8  ;;  %v8988_v42 = vmul.f32 %v8382_v43, %v294_v2  ;;  %v8995_v8 = vmul.f32 %v8969_v51, %v6630_v48  ;;  %v9006_v43 = vmul.f32 %v8979_v37, %v6631_v40  ;;  %v6632_v2 = vld [vmem:[%s8293_s13 + $0x15a] sm:$0xff]  ;;  %v9015_v48 = vld [vmem:[%s8288_s10 + $0x16a] sm:$0xff]  ;;  %v1294_v40 = vsel %vm382_vm1, %v8436_v63, 0.0  ;;  %v6634_v63 = vld [vmem:[%s8293_s13 + $0x172] sm:$0xff] }
  0x66   : > { %7450 = vmatprep.subr.msk.mxu1 %vm705_vm0, %v8974_v52  ;;  %11961 = vst [vmem:[#allocation55_spill] sm:$0xff] %v9015_v48 }
  0x67   : > { %7362 = vmatmul.mubr.msk.f32.gmra.mrb[6].mxu1 %vm382_vm1, %v8948_v28  ;;  %7586 = vmatmul.mubr.msk.f32.gmra.mrb[22].mxu0 %vm382_vm1, %v8955_v15  ;;  %11959 = vst [vmem:[#allocation53_spill] sm:$0xff] %v8995_v8  ;;  %11960 = vst [vmem:[#allocation54_spill] sm:$0xff] %v9006_v43  ;;  %v297_v15 = vld [vmem:[%s8293_s13 + $0x90] sm:$0xff] }
  0x68   : > { %7364 = vmatprep.mubr.msk.f32.mxu1 %vm382_vm1, %v8958_v19  ;;  %7588 = vmatprep.mubr.msk.f32.mxu0 %vm382_vm1, %v8965_v34  ;;  %v9022_v34 = vmul.f32 %v8422_v57, %v296_v61  ;;  %v9033_v11 = vmul.f32 %v8449_v6, %v297_v15  ;;  %v9040_v57 = vmul.f32 %v9015_v48, %v6633_v58  ;;  %v9044_v61 = vld [vmem:[%s8288_s10 + $0x172] sm:$0xff]  ;;  %v6635_v6 = vld [vmem:[%s8293_s13 + $0x182] sm:$0xff] }
  0x69   : > { %1292 = vadd.xlane.f32.xlu1 %v1291_v5  ;;  %1289 = vadd.xlane.f32.xlu0 %v1288_v29  ;;  %v9029_v5 = vmul.f32 %v9010_v23, %v6632_v2  ;;  %v298_v29 = vld [vmem:[%s8293_s13 + $0x98] sm:$0xff]  ;;  %v6667_v15 = vld [vmem:[%s8288_s10 + $0x182] sm:$0xff]  ;;  %v1303_v2 = vsel %vm382_vm1, %v8480_v27, 0.0  ;;  %v6668_v27 = vld [vmem:[%s8288_s10 + $0x18a] sm:$0xff] }
  0x6a   : > { %v9054_v58 = vmul.f32 %v8446_v3, %v298_v29  ;;  %v3228_v3 = vmul.f32 %v6667_v15, %v6635_v6  ;;  %v301_v29 = vld [vmem:[%s8293_s13 + $0xc0] sm:$0xff]  ;;  %v302_v15 = vld [vmem:[%s8293_s13 + $0xc8] sm:$0xff] }
  0x6b   : > { %7365 = vmatmul.mubr.msk.f32.gmra.mrb[8].mxu1 %vm382_vm1, %v8988_v42  ;;  %7589 = vmatmul.mubr.msk.f32.gmra.mrb[24].mxu0 %vm382_vm1, %v8995_v8  ;;  %v299_v8 = vld [vmem:[%s8293_s13 + $0xa8] sm:$0xff] }
  0x6c   : > { %7367 = vmatprep.mubr.msk.f32.mxu1 %vm382_vm1, %v8999_v55  ;;  %7591 = vmatprep.mubr.msk.f32.mxu0 %vm382_vm1, %v9006_v43  ;;  %v1300_v43 = vsel %vm382_vm1, %v8460_v14, 0.0  ;;  %v9065_v48 = vmul.f32 %v8473_v21, %v299_v8  ;;  %v6636_v14 = vld [vmem:[%s8293_s13 + $0x18a] sm:$0xff]  ;;  %v1306_v21 = vsel %vm382_vm1, %v8484_v30, 0.0  ;;  %v303_v30 = vld [vmem:[%s8293_s13 + $0xd8] sm:$0xff] }
  0x6d   : > { %1298 = vadd.xlane.f32.xlu1 %v1297_v46  ;;  %1295 = vadd.xlane.f32.xlu0 %v1294_v40  ;;  %v9061_v46 = vmul.f32 %v9044_v61, %v6634_v63  ;;  %v300_v40 = vld [vmem:[%s8293_s13 + $0xb0] sm:$0xff]  ;;  %v1309_v63 = vsel %vm382_vm1, %v8504_v45, 0.0  ;;  %v3229_v6 = vmul.f32 %v6668_v27, %v6636_v14  ;;  %v1315_v45 = vsel %vm382_vm1, %v8557_v26, 0.0 }
  0x6e   : > { %v9079_v8 = vmul.f32 %v8470_v20, %v300_v40  ;;  %v9093_v20 = vld [vmem:[%s8288_s10 + $0x38] sm:$0xff]  ;;  %v9110_v14 = vmul.f32 %v8521_v56, %v303_v30  ;;  %v1318_v26 = vsel %vm382_vm1, %v8572_v47, 0.0  ;;  %v11963_v27 = vld [vmem:[#allocation16_spill] sm:$0xff] }
  0x6f   : > { %7368 = vmatmul.mubr.msk.f32.gmra.mrb[10].mxu1 %vm382_vm1, %v9022_v34  ;;  %7592 = vmatmul.mubr.msk.f32.gmra.mrb[26].mxu0 %vm382_vm1, %v9029_v5  ;;  %v3783_v40 = vmul.f32 %v9093_v20, %v8890_v17  ;;  %v306_v56 = vld [vmem:[%s8293_s13 + $0xf8] sm:$0xff] }
  0x70   : > { %7370 = vmatprep.mubr.msk.f32.mxu1 %vm382_vm1, %v9033_v11  ;;  %7594 = vmatprep.mubr.msk.f32.mxu0 %vm382_vm1, %v9040_v57 }
  0x71   : > { %1304 = vadd.xlane.f32.xlu1 %v1303_v2  ;;  %1301 = vadd.xlane.f32.xlu0 %v1300_v43  ;;  %v9087_v43 = vmul.f32 %v8497_v39, %v301_v29  ;;  %v1312_v2 = vsel %vm382_vm1, %v8534_v1, 0.0  ;;  %v9101_v39 = vmul.f32 %v8494_v38, %v302_v15  ;;  %v305_v38 = vld [vmem:[%s8293_s13 + $0xf0] sm:$0xff]  ;;  %v1321_v1 = vsel %vm382_vm1, %v8597_v7, 0.0  ;;  %v307_v7 = vld [vmem:[%s8293_s13 + $0x108] sm:$0xff] }
  0x72   : > { %v1324_v29 = vsel %vm382_vm1, %v11963_v27, 0.0  ;;  %v11972_v27 = vld [vmem:[#allocation28_spill] sm:$0xff] }
  0x73   : > { %7371 = vmatmul.mubr.msk.f32.gmra.mrb[12].mxu1 %vm382_vm1, %v9054_v58  ;;  %7595 = vmatmul.mubr.msk.f32.gmra.mrb[28].mxu0 %vm382_vm1, %v9061_v46 }
  0x74   : > { %7373 = vmatprep.mubr.msk.f32.mxu1 %vm382_vm1, %v9065_v48  ;;  %7597 = vmatprep.mubr.msk.f32.mxu0 %vm382_vm1, %v3228_v3  ;;  %v304_v3 = vld [vmem:[%s8293_s13 + $0xe0] sm:$0xff] }
  0x75   : > { %1310 = vadd.xlane.f32.xlu1 %v1309_v63  ;;  %1307 = vadd.xlane.f32.xlu0 %v1306_v21  ;;  %v9122_v17 = vmul.f32 %v8518_v54, %v304_v3  ;;  %v11962_v54 = vld [vmem:[#allocation21_spill] sm:$0xff]  ;;  %v308_v21 = vld [vmem:[%s8293_s13 + $0x110] sm:$0xff] }
  0x76   : > { %v1327_v47 = vsel %vm382_vm1, %v11962_v54, 0.0  ;;  %v11971_v54 = vld [vmem:[#allocation18_spill] sm:$0xff] }
  0x77   : > { %7374 = vmatmul.mubr.msk.f32.gmra.mrb[14].mxu1 %vm382_vm1, %v9079_v8  ;;  %7598 = vmatmul.mubr.msk.f32.gmra.mrb[30].mxu0 %vm382_vm1, %v3229_v6  ;;  %v11965_v6 = vld [vmem:[#allocation13_spill] sm:$0xff] }
  0x78   : > { %7376 = vmatprep.mubr.msk.f32.mxu1 %vm382_vm1, %v9087_v43  ;;  %7602 = vmatprep.mubr.msk.f32.mxu0 %vm382_vm1, %v8893_v31  ;;  %v9129_v31 = vmul.f32 %v8553_v18, %v305_v38  ;;  %v11964_v18 = vld [vmem:[#allocation6_spill] sm:$0xff]  ;;  %v9156_v15 = vmul.f32 %v11965_v6, %v307_v7  ;;  %v11969_v38 = vld [vmem:[#allocation20_spill] sm:$0xff] }
  0x79   : > { %1316 = vadd.xlane.f32.xlu1 %v1315_v45  ;;  %1313 = vadd.xlane.f32.xlu0 %v1312_v2  ;;  %v9143_v63 = vmul.f32 %v11964_v18, %v306_v56  ;;  %v11967_v45 = vld [vmem:[#allocation24_spill] sm:$0xff]  ;;  %v1339_v56 = vsel %vm382_vm1, %v8719_v62, 0.0  ;;  %v1345_v18 = vsel %vm382_vm1, %v8759_v49, 0.0  ;;  %v11974_v6 = vld [vmem:[#allocation26_spill] sm:$0xff]  ;;  %v315_v49 = vld [vmem:[%s8293_s13 + $0x168] sm:$0xff] }
  0x7a   : > { %v1330_v2 = vsel %vm382_vm1, %v11967_v45, 0.0  ;;  %v11970_v7 = vld [vmem:[#allocation32_spill] sm:$0xff]  ;;  %v1351_v45 = vsel %vm382_vm1, %v8800_v12, 0.0  ;;  %v1386_v12 = vld [vmem:[%s8293_s13 + $0x2] sm:$0xff] }
  0x7b   : > { %7377 = vmatmul.mubr.msk.f32.gmra.mrb[16].mxu1 %vm382_vm1, %v9101_v39  ;;  %7603 = vmatmul.mubr.msk.f32.vlgmr.msra.gmra.mrb[0].mxu0 %vm382_vm1, %v3783_v40  ;;  %v11968_v40 = vld [vmem:[#allocation11_spill] sm:$0xff]  ;;  %v313_v62 = vld [vmem:[%s8293_s13 + $0x150] sm:$0xff] }
  0x7c   : > { %7379 = vmatprep.mubr.msk.f32.mxu1 %vm382_vm1, %v9110_v14  ;;  %7605 = vmatprep.mubr.msk.f32.mxu0 %vm382_vm1, %v8925_v53  ;;  %v9152_v53 = vld [vmem:[%s11824_s2 + $0x20] sm:$0xf]  ;;  %v9170_v3 = vmul.f32 %v11968_v40, %v308_v21  ;;  %v11973_v21 = vld [vmem:[#allocation39_spill] sm:$0xff] }
  0x7d   : > { %1322 = vadd.xlane.f32.xlu1 %v1321_v1  ;;  %1319 = vadd.xlane.f32.xlu0 %v1318_v26  ;;  %v311_v26 = vld [vmem:[%s8293_s13 + $0x138] sm:$0xff] }
  0x7e   : > { %7651 = vmatpush3.msk.msra.mxu0 %vm705_vm0, %v8857_v22  ;;  %v309_v22 = vld [vmem:[%s8293_s13 + $0x120] sm:$0xff] }
  0x7f   : > { %7380 = vmatmul.mubr.msk.f32.gmra.mrb[18].mxu1 %vm382_vm1, %v9122_v17  ;;  %7606 = vmatmul.mubr.msk.f32.gmra.mrb[2].mxu0 %vm382_vm1, %v8948_v28  ;;  %v11966_v28 = vld [vmem:[#allocation29_spill] sm:$0xff]  ;;  %v9178_v1 = vmul.f32 %v11969_v38, %v309_v22  ;;  %v316_v38 = vld [vmem:[%s8293_s13 + $0x170] sm:$0xff] }
  0x80   : > { %7382 = vmatprep.mubr.msk.f32.mxu1 %vm382_vm1, %v9129_v31  ;;  %7608 = vmatprep.mubr.msk.f32.mxu0 %vm382_vm1, %v8958_v19  ;;  %v1333_v30 = vsel %vm382_vm1, %v11966_v28, 0.0  ;;  %v310_v19 = vld [vmem:[%s8293_s13 + $0x128] sm:$0xff]  ;;  %v11975_v28 = vld [vmem:[#allocation36_spill] sm:$0xff] }
  0x81   : > { %1328 = vadd.xlane.f32.xlu1 %v1327_v47  ;;  %1325 = vadd.xlane.f32.xlu0 %v1324_v29  ;;  %v9190_v47 = vmul.f32 %v11971_v54, %v310_v19  ;;  %v9198_v29 = vmul.f32 %v11972_v27, %v311_v26  ;;  %v1418_v19 = vld [vmem:[%s8288_s10 + $0x2] sm:$0xff]  ;;  %v1387_v54 = vld [vmem:[%s8293_s13 + $0xa] sm:$0xff] }
  0x82   : > { %7700 = vmatprep.subr.msk.mxu0 %vm705_vm0, %v9152_v53  ;;  %v11977_v26 = vld [vmem:[#allocation43_spill] sm:$0xff] }
  0x83   : > { %7383 = vmatmul.mubr.msk.f32.gmra.mrb[20].mxu1 %vm382_vm1, %v9143_v63  ;;  %7609 = vmatmul.mubr.msk.f32.gmra.mrb[4].mxu0 %vm382_vm1, %v8988_v42  ;;  %v1336_v42 = vsel %vm382_vm1, %v11970_v7, 0.0  ;;  %v1840_v7 = vsel %vm382_vm1, %v1418_v19, 0.0 }
  0x84   : > { %7385 = vmatprep.mubr.msk.f32.mxu1 %vm382_vm1, %v9156_v15  ;;  %7611 = vmatprep.mubr.msk.f32.mxu0 %vm382_vm1, %v8999_v55  ;;  %v312_v55 = vld [vmem:[%s8293_s13 + $0x140] sm:$0xff] }
  0x85   : > { %1334 = vadd.xlane.f32.xlu1 %v1333_v30  ;;  %1331 = vadd.xlane.f32.xlu0 %v1330_v2  ;;  %v9210_v22 = vmul.f32 %v11974_v6, %v312_v55  ;;  %v9218_v30 = vmul.f32 %v11975_v28, %v313_v62  ;;  %v11976_v2 = vld [vmem:[#allocation34_spill] sm:$0xff]  ;;  %v1450_v55 = vmul.f32 %v1418_v19, %v1386_v12 }
  0x86   : > { %v11980_v62 = vld [vmem:[#allocation2_spill] sm:$0xff] }
  0x87   : > { %7386 = vmatmul.mubr.msk.f32.gmra.mrb[22].mxu1 %vm382_vm1, %v9170_v3  ;;  %7612 = vmatmul.mubr.msk.f32.gmra.mrb[6].mxu0 %vm382_vm1, %v9022_v34  ;;  %v1342_v34 = vsel %vm382_vm1, %v11973_v21, 0.0  ;;  %v11985_v28 = vld [vmem:[#allocation10_spill] sm:$0xff] }
  0x88   : > { %7388 = vmatprep.mubr.msk.f32.mxu1 %vm382_vm1, %v9178_v1  ;;  %7614 = vmatprep.mubr.msk.f32.mxu0 %vm382_vm1, %v9033_v11  ;;  %v314_v11 = vld [vmem:[%s8293_s13 + $0x158] sm:$0xff] }
  0x89   : > { %1340 = vadd.xlane.f32.xlu1 %v1339_v56  ;;  %1337 = vadd.xlane.f32.xlu0 %v1336_v42  ;;  %v9230_v40 = vmul.f32 %v11976_v2, %v314_v11  ;;  %v9240_v56 = vmul.f32 %v11977_v26, %v315_v49  ;;  %v11983_v11 = vld [vmem:[#allocation3_spill] sm:$0xff]  ;;  %v1858_v49 = vsel %vm382_vm1, %v11985_v28, 0.0 }
  0x8a   : > { %v11988_v2 = vld [vmem:[#allocation23_spill] sm:$0xff] }
  0x8b   : > { %7389 = vmatmul.mubr.msk.f32.gmra.mrb[24].mxu1 %vm382_vm1, %v9190_v47  ;;  %7615 = vmatmul.mubr.msk.f32.gmra.mrb[8].mxu0 %vm382_vm1, %v9054_v58  ;;  %v1348_v58 = vsel %vm382_vm1, %v8774_v0, 0.0 }
  0x8c   : > { %7391 = vmatprep.mubr.msk.f32.mxu1 %vm382_vm1, %v9198_v29  ;;  %7617 = vmatprep.mubr.msk.f32.mxu0 %vm382_vm1, %v9065_v48  ;;  %v1419_v48 = vld [vmem:[%s8288_s10 + $0xa] sm:$0xff] }
  0x8d   : > { %1346 = vadd.xlane.f32.xlu1 %v1345_v18  ;;  %1343 = vadd.xlane.f32.xlu0 %v1342_v34  ;;  %v1843_v0 = vsel %vm382_vm1, %v1419_v48, 0.0  ;;  %v1846_v18 = vsel %vm382_vm1, %v11980_v62, 0.0  ;;  %v1451_v21 = vmul.f32 %v1419_v48, %v1387_v54  ;;  %v11982_v34 = vld [vmem:[#allocation5_spill] sm:$0xff] }
  0x8e   : > { %v1852_v6 = vsel %vm382_vm1, %v11982_v34, 0.0  ;;  %v11989_v48 = vld [vmem:[#allocation17_spill] sm:$0xff] }
  0x8f   : > { %7392 = vmatmul.mubr.msk.f32.gmra.mrb[26].mxu1 %vm382_vm1, %v9210_v22  ;;  %7618 = vmatmul.mubr.msk.f32.gmra.mrb[10].mxu0 %vm382_vm1, %v9079_v8  ;;  %v11978_v8 = vld [vmem:[#allocation41_spill] sm:$0xff]  ;;  %v1864_v19 = vsel %vm382_vm1, %v11989_v48, 0.0 }
  0x90   : > { %7394 = vmatprep.mubr.msk.f32.mxu1 %vm382_vm1, %v9218_v30  ;;  %7620 = vmatprep.mubr.msk.f32.mxu0 %vm382_vm1, %v9087_v43  ;;  %v9250_v42 = vmul.f32 %v11978_v8, %v316_v38  ;;  %v11979_v43 = vld [vmem:[#allocation4_spill] sm:$0xff]  ;;  %v11991_v38 = vld [vmem:[#allocation14_spill] sm:$0xff]  ;;  %v11993_v8 = vld [vmem:[#allocation25_spill] sm:$0xff] }
  0x91   : > { %1352 = vadd.xlane.f32.xlu1 %v1351_v45  ;;  %1349 = vadd.xlane.f32.xlu0 %v1348_v58  ;;  %v1849_v27 = vsel %vm382_vm1, %v11979_v43, 0.0  ;;  %v11986_v45 = vld [vmem:[#allocation7_spill] sm:$0xff]  ;;  %v1870_v54 = vsel %vm382_vm1, %v11993_v8, 0.0  ;;  %v6763_v43 = vld [vmem:[%s8288_s10 + $0x180] sm:$0xff]  ;;  %v12003_v8 = vld [vmem:[#allocation45_spill] sm:$0xff] }
  0x93   : > { %7395 = vmatmul.mubr.msk.f32.gmra.mrb[28].mxu1 %vm382_vm1, %v9230_v40  ;;  %7621 = vmatmul.mubr.msk.f32.gmra.mrb[12].mxu0 %vm382_vm1, %v9101_v39  ;;  %v11981_v39 = vld [vmem:[#allocation9_spill] sm:$0xff] }
  0x94   : > { %7397 = vmatprep.mubr.msk.f32.mxu1 %vm382_vm1, %v9240_v56  ;;  %7623 = vmatprep.mubr.msk.f32.mxu0 %vm382_vm1, %v9110_v14  ;;  %v1855_v14 = vsel %vm382_vm1, %v11981_v39, 0.0 }
  0x95   : > { %1844 = vadd.xlane.f32.xlu1 %v1843_v0  ;;  %1841 = vadd.xlane.f32.xlu0 %v1840_v7  ;;  %v11992_v0 = vld [vmem:[#allocation31_spill] sm:$0xff] }
  0x96   : > { %v1873_v7 = vsel %vm382_vm1, %v11992_v0, 0.0 }
  0x97   : > { %7398 = vmatmul.mubr.msk.f32.gmra.mrb[30].mxu1 %vm382_vm1, %v9250_v42  ;;  %7624 = vmatmul.mubr.msk.f32.gmra.mrb[14].mxu0 %vm382_vm1, %v9122_v17  ;;  %v11984_v17 = vld [vmem:[#allocation15_spill] sm:$0xff] }
  0x98   : > { %7402 = vmatprep.mubr.msk.f32.mxu1 %vm382_vm1, %v1450_v55  ;;  %7626 = vmatprep.mubr.msk.f32.mxu0 %vm382_vm1, %v9129_v31  ;;  %v1861_v31 = vsel %vm382_vm1, %v11984_v17, 0.0  ;;  %v11995_v55 = vld [vmem:[#allocation22_spill] sm:$0xff]  ;;  %v6733_v17 = vld [vmem:[%s8293_s13 + $0x198] sm:$0xff] }
  0x99   : > { %1850 = vadd.xlane.f32.xlu1 %v1849_v27  ;;  %1847 = vadd.xlane.f32.xlu0 %v1846_v18  ;;  %v11996_v18 = vld [vmem:[#allocation38_spill] sm:$0xff] }
  0x9b   : > { %7403 = vmatmul.mubr.msk.f32.vlgmr.msra.gmra.mrb[0].mxu1 %vm382_vm1, %v1451_v21  ;;  %7627 = vmatmul.mubr.msk.f32.gmra.mrb[16].mxu0 %vm382_vm1, %v9143_v63  ;;  %v11987_v63 = vld [vmem:[#allocation8_spill] sm:$0xff]  ;;  %v11997_v21 = vld [vmem:[#allocation33_spill] sm:$0xff] }
  0x9c   : > { %7405 = vmatprep.mubr.msk.f32.mxu1 %vm382_vm1, %v11983_v11  ;;  %7629 = vmatprep.mubr.msk.f32.mxu0 %vm382_vm1, %v9156_v15  ;;  %v1876_v39 = vsel %vm382_vm1, %v11997_v21, 0.0  ;;  %v6764_v11 = vld [vmem:[%s8288_s10 + $0x188] sm:$0xff] }
  0x9d   : > { %1856 = vadd.xlane.f32.xlu1 %v1855_v14  ;;  %1853 = vadd.xlane.f32.xlu0 %v1852_v6  ;;  %v11998_v14 = vld [vmem:[#allocation27_spill] sm:$0xff] }
  0x9e   : > { %7451 = vmatpush3.msk.msra.mxu1 %vm705_vm0, %v8974_v52  ;;  %v1867_v52 = vsel %vm382_vm1, %v11988_v2, 0.0  ;;  %v6732_v6 = vld [vmem:[%s8293_s13 + $0x188] sm:$0xff] }
  0x9f   : > { %7406 = vmatmul.mubr.msk.f32.gmra.mrb[2].mxu1 %vm382_vm1, %v11986_v45  ;;  %7630 = vmatmul.mubr.msk.f32.gmra.mrb[18].mxu0 %vm382_vm1, %v9170_v3  ;;  %v9308_v3 = vld [vmem:[%s11824_s2 + $0x10] sm:$0xf]  ;;  %v3811_v2 = vmul.f32 %v6764_v11, %v6732_v6  ;;  %v12006_v11 = vld [vmem:[#allocation46_spill] sm:$0xff] }
  0xa0   : > { %7408 = vmatprep.mubr.msk.f32.mxu1 %vm382_vm1, %v11987_v63  ;;  %7632 = vmatprep.mubr.msk.f32.mxu0 %vm382_vm1, %v9178_v1  ;;  %v11990_v1 = vld [vmem:[#allocation12_spill] sm:$0xff]  ;;  %v12001_v63 = vld [vmem:[#allocation35_spill] sm:$0xff] }
  0xa1   : > { %1862 = vadd.xlane.f32.xlu1 %v1861_v31  ;;  %1859 = vadd.xlane.f32.xlu0 %v1858_v49  ;;  %v6765_v31 = vld [vmem:[%s8288_s10 + $0x198] sm:$0xff]  ;;  %v1885_v49 = vsel %vm382_vm1, %v8770_v16, 0.0  ;;  %v12000_v45 = vld [vmem:[#allocation40_spill] sm:$0xff] }
  0xa2   : > { %v9297_v15 = vpop.xlane.xlu1 %390  ;;  %v9299_v58 = vpop.xlane.xlu0 %384  ;;  %7750 = vmatprep.subr.msk.mxu1 %vm705_vm0, %v9308_v3  ;;  %v3812_v48 = vmul.f32 %v6765_v31, %v6733_v17  ;;  %v6801_v16 = vld [vmem:[%s8293_s13 + $0x31] sm:$0xff]  ;;  %v6835_v21 = vld [vmem:[%s8288_s10 + $0x49] sm:$0xff] }
  0xa3   : > { %7409 = vmatmul.mubr.msk.f32.gmra.mrb[4].mxu1 %vm382_vm1, %v11990_v1  ;;  %7633 = vmatmul.mubr.msk.f32.gmra.mrb[20].mxu0 %vm382_vm1, %v9190_v47  ;;  %v11994_v47 = vld [vmem:[#allocation19_spill] sm:$0xff]  ;;  %v6766_v1 = vld [vmem:[%s8288_s10 + $0x1a0] sm:$0xff]  ;;  %v6804_v31 = vld [vmem:[%s8293_s13 + $0x51] sm:$0xff] }
  0xa4   : > { %7411 = vmatprep.mubr.msk.f32.mxu1 %vm382_vm1, %v11991_v38  ;;  %7635 = vmatprep.mubr.msk.f32.mxu0 %vm382_vm1, %v9198_v29  ;;  %v6731_v29 = vld [vmem:[%s8293_s13 + $0x180] sm:$0xff]  ;;  %v6833_v38 = vld [vmem:[%s8288_s10 + $0x31] sm:$0xff] }
  0xa5   : > { %1868 = vadd.xlane.f32.xlu1 %v1867_v52  ;;  %1865 = vadd.xlane.f32.xlu0 %v1864_v19  ;;  %v3810_v34 = vmul.f32 %v6763_v43, %v6731_v29  ;;  %v12002_v52 = vld [vmem:[#allocation37_spill] sm:$0xff]  ;;  %v6734_v19 = vld [vmem:[%s8293_s13 + $0x1a0] sm:$0xff]  ;;  %v12005_v29 = vld [vmem:[#allocation44_spill] sm:$0xff]  ;;  %v4364_v43 = vmul.f32 %v6833_v38, %v6801_v16 }
  0xa6   : > { %v9320_v26 = vpop.xlane.xlu1 %393  ;;  %v9322_v12 = vpop.xlane.xlu0 %387 }
  0xa7   : > { %7412 = vmatmul.mubr.msk.f32.gmra.mrb[6].mxu1 %vm382_vm1, %v11994_v47  ;;  %7636 = vmatmul.mubr.msk.f32.gmra.mrb[22].mxu0 %vm382_vm1, %v9210_v22  ;;  %v1879_v22 = vsel %vm382_vm1, %v11996_v18, 0.0  ;;  %v12004_v47 = vld [vmem:[#allocation42_spill] sm:$0xff] }
  0xa8   : > { %7414 = vmatprep.mubr.msk.f32.mxu1 %vm382_vm1, %v11995_v55  ;;  %7638 = vmatprep.mubr.msk.f32.mxu0 %vm382_vm1, %v9218_v30  ;;  %v11999_v30 = vld [vmem:[#allocation30_spill] sm:$0xff]  ;;  %v3813_v55 = vmul.f32 %v6766_v1, %v6734_v19  ;;  %v6806_v19 = vld [vmem:[%s8293_s13 + $0x69] sm:$0xff] }
  0xa9   : > { %1874 = vadd.xlane.f32.xlu1 %v1873_v7  ;;  %1871 = vadd.xlane.f32.xlu0 %v1870_v54  ;;  %v1891_v7 = vsel %vm382_vm1, %v8804_v33, 0.0  ;;  %v1888_v54 = vsel %vm382_vm1, %v12003_v8, 0.0  ;;  %v6802_v18 = vld [vmem:[%s8293_s13 + $0x39] sm:$0xff]  ;;  %v6803_v33 = vld [vmem:[%s8293_s13 + $0x49] sm:$0xff] }
  0xaa   : > { %v9338_v27 = vpop.xlane.xlu1 %399  ;;  %v9340_v62 = vpop.xlane.xlu0 %396  ;;  %v4366_v17 = vmul.f32 %v6835_v21, %v6803_v33  ;;  %v6838_v1 = vld [vmem:[%s8288_s10 + $0x69] sm:$0xff]  ;;  %v6810_v21 = vld [vmem:[%s8293_s13 + $0x99] sm:$0xff] }
  0xab   : > { %7415 = vmatmul.mubr.msk.f32.gmra.mrb[8].mxu1 %vm382_vm1, %v11998_v14  ;;  %7639 = vmatmul.mubr.msk.f32.gmra.mrb[24].mxu0 %vm382_vm1, %v9230_v40  ;;  %v4369_v8 = vmul.f32 %v6838_v1, %v6806_v19  ;;  %v12012_v1 = vld [vmem:[#allocation52_spill] sm:$0xff] }
  0xac   : > { %7417 = vmatprep.mubr.msk.f32.mxu1 %vm382_vm1, %v11999_v30  ;;  %7641 = vmatprep.mubr.msk.f32.mxu0 %vm382_vm1, %v9240_v56  ;;  %v1882_v56 = vsel %vm382_vm1, %v12000_v45, 0.0  ;;  %v1897_v30 = vsel %vm382_vm1, %v8832_v24, 0.0  ;;  %v6805_v24 = vld [vmem:[%s8293_s13 + $0x61] sm:$0xff] }
  0xad   : > { %1880 = vadd.xlane.f32.xlu1 %v1879_v22  ;;  %1877 = vadd.xlane.f32.xlu0 %v1876_v39  ;;  %v6834_v22 = vld [vmem:[%s8288_s10 + $0x39] sm:$0xff] }
  0xae   : > { %v9358_v28 = vpop.xlane.xlu1 %405  ;;  %v9360_v40 = vpop.xlane.xlu0 %402  ;;  %v4365_v6 = vmul.f32 %v6834_v22, %v6802_v18  ;;  %v12009_v22 = vld [vmem:[#allocation49_spill] sm:$0xff] }
  0xaf   : > { %7418 = vmatmul.mubr.msk.f32.gmra.mrb[10].mxu1 %vm382_vm1, %v12001_v63  ;;  %7642 = vmatmul.mubr.msk.f32.gmra.mrb[26].mxu0 %vm382_vm1, %v9250_v42  ;;  %v1900_v63 = vsel %vm382_vm1, %v8840_v60, 0.0  ;;  %v6839_v60 = vld [vmem:[%s8288_s10 + $0x79] sm:$0xff] }
  0xb0   : > { %7420 = vmatprep.mubr.msk.f32.mxu1 %vm382_vm1, %v12002_v52  ;;  %7644 = vmatprep.mubr.msk.f32.mxu0 %vm382_vm1, %v3810_v34  ;;  %v1894_v34 = vsel %vm382_vm1, %v8809_v36, 0.0  ;;  %v6837_v36 = vld [vmem:[%s8288_s10 + $0x61] sm:$0xff] }
  0xb1   : > { %1886 = vadd.xlane.f32.xlu1 %v1885_v49  ;;  %1883 = vadd.xlane.f32.xlu0 %v1882_v56  ;;  %v6836_v49 = vld [vmem:[%s8288_s10 + $0x51] sm:$0xff]  ;;  %v1903_v56 = vsel %vm382_vm1, %v8869_v59, 0.0  ;;  %v6807_v59 = vld [vmem:[%s8293_s13 + $0x79] sm:$0xff] }
  0xb2   : > { %v9377_v0 = vpop.xlane.xlu1 %411  ;;  %v9379_v42 = vpop.xlane.xlu0 %408  ;;  %v4367_v52 = vmul.f32 %v6836_v49, %v6804_v31  ;;  %v12010_v49 = vld [vmem:[#allocation50_spill] sm:$0xff] }
  0xb3   : > { %7421 = vmatmul.mubr.msk.f32.gmra.mrb[12].mxu1 %vm382_vm1, %v12004_v47  ;;  %7645 = vmatmul.mubr.msk.f32.gmra.mrb[28].mxu0 %vm382_vm1, %v3811_v2  ;;  %v12007_v2 = vld [vmem:[#allocation47_spill] sm:$0xff] }
  0xb4   : > { %7423 = vmatprep.mubr.msk.f32.mxu1 %vm382_vm1, %v12005_v29  ;;  %7647 = vmatprep.mubr.msk.f32.mxu0 %vm382_vm1, %v3812_v48  ;;  %v4368_v48 = vmul.f32 %v6837_v36, %v6805_v24  ;;  %v6808_v47 = vld [vmem:[%s8293_s13 + $0x81] sm:$0xff]  ;;  %v1912_v29 = vsel %vm382_vm1, %v8908_v25, 0.0  ;;  %v6843_v25 = vld [vmem:[%s8288_s10 + $0xa9] sm:$0xff]  ;;  %v6812_v36 = vld [vmem:[%s8293_s13 + $0xb1] sm:$0xff] }
  0xb5   : > { %1892 = vadd.xlane.f32.xlu1 %v1891_v7  ;;  %1889 = vadd.xlane.f32.xlu0 %v1888_v54  ;;  %v1906_v7 = vsel %vm382_vm1, %v8874_v4, 0.0  ;;  %v4370_v54 = vmul.f32 %v6839_v60, %v6807_v59  ;;  %v6809_v4 = vld [vmem:[%s8293_s13 + $0x91] sm:$0xff]  ;;  %v6814_v60 = vld [vmem:[%s8293_s13 + $0xc9] sm:$0xff] }
  0xb6   : > { %v9395_v39 = vpop.xlane.xlu1 %417  ;;  %v9397_v14 = vpop.xlane.xlu0 %414 }
  0xb7   : > { %7424 = vmatmul.mubr.msk.f32.gmra.mrb[14].mxu1 %vm382_vm1, %v8789_v44  ;;  %7648 = vmatmul.mubr.msk.f32.gmra.mrb[30].mxu0 %vm382_vm1, %v3813_v55 }
  0xb8   : > { %7426 = vmatprep.mubr.msk.f32.mxu1 %vm382_vm1, %v12006_v11  ;;  %7652 = vmatprep.mubr.msk.f32.mxu0 %vm382_vm1, %v4364_v43  ;;  %v12008_v43 = vld [vmem:[#allocation48_spill] sm:$0xff]  ;;  %v1921_v11 = vsel %vm382_vm1, %v8969_v51, 0.0  ;;  %v6813_v51 = vld [vmem:[%s8293_s13 + $0xc1] sm:$0xff] }
  0xb9   : > { %1898 = vadd.xlane.f32.xlu1 %v1897_v30  ;;  %1895 = vadd.xlane.f32.xlu0 %v1894_v34  ;;  %v6842_v30 = vld [vmem:[%s8288_s10 + $0x99] sm:$0xff] }
  0xba   : > { %v9413_v44 = vpop.xlane.xlu1 %423  ;;  %v9415_v45 = vpop.xlane.xlu0 %420  ;;  %v4373_v31 = vmul.f32 %v6842_v30, %v6810_v21  ;;  %v6817_v21 = vld [vmem:[%s8293_s13 + $0xf1] sm:$0xff] }
  0xbb   : > { %7427 = vmatmul.mubr.msk.f32.gmra.mrb[16].mxu1 %vm382_vm1, %v12007_v2  ;;  %7653 = vmatmul.mubr.msk.f32.vlgmr.msra.gmra.mrb[0].mxu0 %vm382_vm1, %v4365_v6  ;;  %v1927_v2 = vsel %vm382_vm1, %v9010_v23, 0.0  ;;  %v6815_v23 = vld [vmem:[%s8293_s13 + $0xd9] sm:$0xff]  ;;  %v6849_v30 = vld [vmem:[%s8288_s10 + $0xf1] sm:$0xff] }
  0xbc   : > { %7429 = vmatprep.mubr.msk.f32.mxu1 %vm382_vm1, %v8828_v13  ;;  %7655 = vmatprep.mubr.msk.f32.mxu0 %vm382_vm1, %v4366_v17  ;;  %v1909_v13 = vsel %vm382_vm1, %v8903_v10, 0.0  ;;  %v6840_v10 = vld [vmem:[%s8288_s10 + $0x81] sm:$0xff]  ;;  %v1918_v17 = vsel %vm382_vm1, %v8941_v35, 0.0 }
  0xbd   : > { %1904 = vadd.xlane.f32.xlu1 %v1903_v56  ;;  %1901 = vadd.xlane.f32.xlu0 %v1900_v63  ;;  %v4371_v18 = vmul.f32 %v6840_v10, %v6808_v47  ;;  %v6844_v56 = vld [vmem:[%s8288_s10 + $0xb1] sm:$0xff]  ;;  %v6845_v35 = vld [vmem:[%s8288_s10 + $0xc1] sm:$0xff] }
  0xbe   : > { %v9431_v16 = vpop.xlane.xlu1 %429  ;;  %v9433_v38 = vpop.xlane.xlu0 %426  ;;  %7701 = vmatpush3.msk.msra.mxu0 %vm705_vm0, %v9152_v53  ;;  %v6841_v53 = vld [vmem:[%s8288_s10 + $0x91] sm:$0xff]  ;;  %v4375_v19 = vmul.f32 %v6844_v56, %v6812_v36  ;;  %v4376_v59 = vmul.f32 %v6845_v35, %v6813_v51  ;;  %v12013_v47 = vld [vmem:[#allocation55_spill] sm:$0xff]  ;;  %v9545_v56 = vmul.f32 %v6849_v30, %v6817_v21  ;;  %v6818_v51 = vld [vmem:[%s8293_s13 + $0xf9] sm:$0xff] }
  0xbf   : > { %7430 = vmatmul.mubr.msk.f32.gmra.mrb[18].mxu1 %vm382_vm1, %v8852_v32  ;;  %7656 = vmatmul.mubr.msk.f32.gmra.mrb[2].mxu0 %vm382_vm1, %v4367_v52  ;;  %v4372_v33 = vmul.f32 %v6841_v53, %v6809_v4  ;;  %v1924_v52 = vsel %vm382_vm1, %v8979_v37, 0.0  ;;  %v6847_v37 = vld [vmem:[%s8288_s10 + $0xd9] sm:$0xff]  ;;  %v1930_v10 = vsel %vm382_vm1, %v12013_v47, 0.0  ;;  %v6448_v30 = vld [vmem:[%s8288_s10 + $0x68] sm:$0xff] }
  0xc0   : > { %7432 = vmatprep.mubr.msk.f32.mxu1 %vm382_vm1, %v8865_v9  ;;  %7658 = vmatprep.mubr.msk.f32.mxu0 %vm382_vm1, %v4368_v48  ;;  %v1915_v9 = vsel %vm382_vm1, %v8936_v50, 0.0  ;;  %v6811_v50 = vld [vmem:[%s8293_s13 + $0xa9] sm:$0xff]  ;;  %v12014_v4 = vld [vmem:[#allocation53_spill] sm:$0xff] }
  0xc1   : > { %1910 = vadd.xlane.f32.xlu1 %v1909_v13  ;;  %1907 = vadd.xlane.f32.xlu0 %v1906_v7  ;;  %v4374_v24 = vmul.f32 %v6843_v25, %v6811_v50  ;;  %v12011_v48 = vld [vmem:[#allocation51_spill] sm:$0xff]  ;;  %v6850_v35 = vld [vmem:[%s8288_s10 + $0xf9] sm:$0xff] }
  0xc2   : > { %v9451_v32 = vpop.xlane.xlu1 %435  ;;  %v9453_v55 = vpop.xlane.xlu0 %432  ;;  %v6846_v13 = vld [vmem:[%s8288_s10 + $0xc9] sm:$0xff] }
  0xc3   : > { %7433 = vmatmul.mubr.msk.f32.gmra.mrb[20].mxu1 %vm382_vm1, %v12008_v43  ;;  %7659 = vmatmul.mubr.msk.f32.gmra.mrb[4].mxu0 %vm382_vm1, %v4369_v8  ;;  %v4377_v53 = vmul.f32 %v6846_v13, %v6814_v60  ;;  %v12015_v43 = vld [vmem:[#allocation54_spill] sm:$0xff]  ;;  %v9563_v60 = vmul.f32 %v6850_v35, %v6818_v51  ;;  %v6446_v13 = vld [vmem:[%s8288_s10 + $0x50] sm:$0xff] }
  0xc4   : > { %7435 = vmatprep.mubr.msk.f32.mxu1 %vm382_vm1, %v12009_v22  ;;  %7661 = vmatprep.mubr.msk.f32.mxu0 %vm382_vm1, %v4370_v54  ;;  %v1933_v54 = vsel %vm382_vm1, %v9044_v61, 0.0  ;;  %v6816_v61 = vld [vmem:[%s8293_s13 + $0xe1] sm:$0xff]  ;;  %v6823_v35 = vld [vmem:[%s8293_s13 + $0x139] sm:$0xff] }
  0xc5   : > { %1916 = vadd.xlane.f32.xlu1 %v1915_v9  ;;  %1913 = vadd.xlane.f32.xlu0 %v1912_v29  ;;  %v6442_v9 = vld [vmem:[%s8288_s10 + $0x20] sm:$0xff]  ;;  %v6441_v29 = vld [vmem:[%s8288_s10 + $0x18] sm:$0xff] }
  0xc6   : > { %v9469_v34 = vpop.xlane.xlu1 %441  ;;  %v9471_v6 = vpop.xlane.xlu0 %438  ;;  %v6848_v22 = vld [vmem:[%s8288_s10 + $0xe1] sm:$0xff] }
  0xc7   : > { %7436 = vmatmul.mubr.msk.f32.gmra.mrb[22].mxu1 %vm382_vm1, %v8921_v41  ;;  %7662 = vmatmul.mubr.msk.f32.gmra.mrb[6].mxu0 %vm382_vm1, %v4371_v18  ;;  %v9521_v18 = vmul.f32 %v6847_v37, %v6815_v23  ;;  %v6445_v23 = vld [vmem:[%s8288_s10 + $0x48] sm:$0xff]  ;;  %v6412_v37 = vld [vmem:[%s8293_s13 + $0x38] sm:$0xff]  ;;  %v6415_v51 = vld [vmem:[%s8293_s13 + $0x60] sm:$0xff] }
  0xc8   : > { %7438 = vmatprep.mubr.msk.f32.mxu1 %vm382_vm1, %v12010_v49  ;;  %7664 = vmatprep.mubr.msk.f32.mxu0 %vm382_vm1, %v4372_v33  ;;  %v6409_v33 = vld [vmem:[%s8293_s13 + $0x18] sm:$0xff]  ;;  %v6443_v49 = vld [vmem:[%s8288_s10 + $0x30] sm:$0xff] }
  0xc9   : > { %1922 = vadd.xlane.f32.xlu1 %v1921_v11  ;;  %1919 = vadd.xlane.f32.xlu0 %v1918_v17  ;;  %v2427_v11 = vsel %vm382_vm1, %v6442_v9, 0.0  ;;  %v2424_v17 = vsel %vm382_vm1, %v6441_v29, 0.0  ;;  %v2034_v36 = vmul.f32 %v6441_v29, %v6409_v33  ;;  %v2037_v33 = vmul.f32 %v9093_v20, %v6412_v37 }
  0xca   : > { %v9487_v41 = vpop.xlane.xlu1 %447  ;;  %v9489_v63 = vpop.xlane.xlu0 %444 }
  0xcb   : > { %7439 = vmatmul.mubr.msk.f32.gmra.mrb[24].mxu1 %vm382_vm1, %v12011_v48  ;;  %7665 = vmatmul.mubr.msk.f32.gmra.mrb[8].mxu0 %vm382_vm1, %v4373_v31  ;;  %v9537_v31 = vmul.f32 %v6848_v22, %v6816_v61  ;;  %v2439_v61 = vsel %vm382_vm1, %v6446_v13, 0.0  ;;  %v2436_v22 = vsel %vm382_vm1, %v6445_v23, 0.0 }
  0xcc   : > { %7441 = vmatprep.mubr.msk.f32.mxu1 %vm382_vm1, %v12012_v1  ;;  %7667 = vmatprep.mubr.msk.f32.mxu0 %vm382_vm1, %v4374_v24  ;;  %v6410_v24 = vld [vmem:[%s8293_s13 + $0x20] sm:$0xff]  ;;  %v2430_v1 = vsel %vm382_vm1, %v6443_v49, 0.0 }
  0xcd   : > { %1928 = vadd.xlane.f32.xlu1 %v1927_v2  ;;  %1925 = vadd.xlane.f32.xlu0 %v1924_v52  ;;  %v6819_v2 = vld [vmem:[%s8293_s13 + $0x109] sm:$0xff] }
  0xce   : > { %v9505_v7 = vpop.xlane.xlu1 %453  ;;  %v9507_v8 = vpop.xlane.xlu0 %450  ;;  %v6851_v52 = vld [vmem:[%s8288_s10 + $0x109] sm:$0xff] }
  0xcf   : > { %7442 = vmatmul.mubr.msk.f32.gmra.mrb[26].mxu1 %vm382_vm1, %v12014_v4  ;;  %7668 = vmatmul.mubr.msk.f32.gmra.mrb[10].mxu0 %vm382_vm1, %v4375_v19  ;;  %v2433_v19 = vsel %vm382_vm1, %v9093_v20, 0.0  ;;  %v9571_v47 = vmul.f32 %v6851_v52, %v6819_v2  ;;  %v6413_v4 = vld [vmem:[%s8293_s13 + $0x48] sm:$0xff] }
  0xd0   : > { %7444 = vmatprep.mubr.msk.f32.mxu1 %vm382_vm1, %v12015_v43  ;;  %7670 = vmatprep.mubr.msk.f32.mxu0 %vm382_vm1, %v4376_v59  ;;  %v2035_v59 = vmul.f32 %v6442_v9, %v6410_v24  ;;  %v6853_v9 = vld [vmem:[%s8288_s10 + $0x121] sm:$0xff]  ;;  %v6822_v24 = vld [vmem:[%s8293_s13 + $0x129] sm:$0xff] }
  0xd1   : > { %1934 = vadd.xlane.f32.xlu1 %v1933_v54  ;;  %1931 = vadd.xlane.f32.xlu0 %v1930_v10  ;;  %v6820_v10 = vld [vmem:[%s8293_s13 + $0x111] sm:$0xff] }
  0xd2   : > { %v9528_v50 = vpop.xlane.xlu1 %459  ;;  %v9530_v25 = vpop.xlane.xlu0 %456 }
  0xd3   : > { %7445 = vmatmul.mubr.msk.f32.gmra.mrb[28].mxu1 %vm382_vm1, %v9029_v5  ;;  %7671 = vmatmul.mubr.msk.f32.gmra.mrb[12].mxu0 %vm382_vm1, %v4377_v53  ;;  %v6411_v5 = vld [vmem:[%s8293_s13 + $0x30] sm:$0xff]  ;;  %v6821_v53 = vld [vmem:[%s8293_s13 + $0x121] sm:$0xff] }
  0xd4   : > { %7447 = vmatprep.mubr.msk.f32.mxu1 %vm382_vm1, %v9040_v57  ;;  %7673 = vmatprep.mubr.msk.f32.mxu0 %vm382_vm1, %v9521_v18  ;;  %v2036_v54 = vmul.f32 %v6443_v49, %v6411_v5  ;;  %v2038_v49 = vmul.f32 %v6445_v23, %v6413_v4  ;;  %v9599_v20 = vmul.f32 %v6853_v9, %v6821_v53  ;;  %v6855_v5 = vld [vmem:[%s8288_s10 + $0x139] sm:$0xff]  ;;  %v6416_v23 = vld [vmem:[%s8293_s13 + $0x68] sm:$0xff] }
  0xd5   : > { %2428 = vadd.xlane.f32.xlu1 %v2427_v11  ;;  %2425 = vadd.xlane.f32.xlu0 %v2424_v17  ;;  %v6447_v11 = vld [vmem:[%s8288_s10 + $0x60] sm:$0xff]  ;;  %v6414_v17 = vld [vmem:[%s8293_s13 + $0x50] sm:$0xff]  ;;  %v6417_v9 = vld [vmem:[%s8293_s13 + $0x78] sm:$0xff] }
  0xd6   : > { %v9552_v48 = vpop.xlane.xlu1 %465  ;;  %v9554_v57 = vpop.xlane.xlu0 %462  ;;  %v2040_v4 = vmul.f32 %v6447_v11, %v6415_v51  ;;  %v6856_v53 = vld [vmem:[%s8288_s10 + $0x141] sm:$0xff] }
  0xd7   : > { %7448 = vmatmul.mubr.msk.f32.gmra.mrb[30].mxu1 %vm382_vm1, %v9061_v46  ;;  %7674 = vmatmul.mubr.msk.f32.gmra.mrb[14].mxu0 %vm382_vm1, %v9537_v31  ;;  %v9575_v46 = vld [vmem:[%s8288_s10 + $0x111] sm:$0xff] }
  0xd8   : > { %7452 = vmatprep.mubr.msk.f32.mxu1 %vm382_vm1, %v2034_v36  ;;  %7676 = vmatprep.mubr.msk.f32.mxu0 %vm382_vm1, %v9545_v56  ;;  %12016 = vst [vmem:[#allocation21_spill] sm:$0xff] %v9575_v46  ;;  %v9591_v21 = vmul.f32 %v9575_v46, %v6820_v10  ;;  %v6854_v36 = vld [vmem:[%s8288_s10 + $0x129] sm:$0xff]  ;;  %v6449_v10 = vld [vmem:[%s8288_s10 + $0x78] sm:$0xff] }
  0xd9   : > { %2434 = vadd.xlane.f32.xlu1 %v2433_v19  ;;  %2431 = vadd.xlane.f32.xlu0 %v2430_v1  ;;  %v2445_v19 = vsel %vm382_vm1, %v6448_v30, 0.0  ;;  %v2442_v1 = vsel %vm382_vm1, %v6447_v11, 0.0  ;;  %v9618_v37 = vmul.f32 %v6854_v36, %v6822_v24  ;;  %v2448_v24 = vsel %vm382_vm1, %v6449_v10, 0.0  ;;  %v6453_v46 = vld [vmem:[%s8288_s10 + $0xa8] sm:$0xff] }
  0xda   : > { %v9580_v29 = vpop.xlane.xlu1 %471  ;;  %v9582_v43 = vpop.xlane.xlu0 %468 }
  0xdb   : > { %7453 = vmatmul.mubr.msk.f32.vlgmr.msra.gmra.mrb[0].mxu1 %vm382_vm1, %v2035_v59  ;;  %7677 = vmatmul.mubr.msk.f32.gmra.mrb[16].mxu0 %vm382_vm1, %v9563_v60  ;;  %v2039_v59 = vmul.f32 %v6446_v13, %v6414_v17  ;;  %v6824_v13 = vld [vmem:[%s8293_s13 + $0x141] sm:$0xff] }
  0xdc   : > { %7455 = vmatprep.mubr.msk.f32.mxu1 %vm382_vm1, %v2036_v54  ;;  %7679 = vmatprep.mubr.msk.f32.mxu0 %vm382_vm1, %v9571_v47  ;;  %v6450_v54 = vld [vmem:[%s8288_s10 + $0x80] sm:$0xff] }
  0xdd   : > { %2440 = vadd.xlane.f32.xlu1 %v2439_v61  ;;  %2437 = vadd.xlane.f32.xlu0 %v2436_v22  ;;  %v6825_v61 = vld [vmem:[%s8293_s13 + $0x151] sm:$0xff] }
  0xde   : > { %v9606_v2 = vpop.xlane.xlu1 %477  ;;  %v9608_v52 = vpop.xlane.xlu0 %474  ;;  %7751 = vmatpush3.msk.msra.mxu1 %vm705_vm0, %v9308_v3  ;;  %v9625_v3 = vmul.f32 %v6855_v5, %v6823_v35  ;;  %v6857_v22 = vld [vmem:[%s8288_s10 + $0x151] sm:$0xff] }
  0xdf   : > { %7456 = vmatmul.mubr.msk.f32.gmra.mrb[2].mxu1 %vm382_vm1, %v2037_v33  ;;  %7680 = vmatmul.mubr.msk.f32.gmra.mrb[18].mxu0 %vm382_vm1, %v9591_v21  ;;  %v2041_v33 = vmul.f32 %v6448_v30, %v6416_v23  ;;  %v9643_v30 = vmul.f32 %v6856_v53, %v6824_v13  ;;  %v6452_v35 = vld [vmem:[%s8288_s10 + $0x98] sm:$0xff]  ;;  %v6451_v5 = vld [vmem:[%s8288_s10 + $0x90] sm:$0xff] }
  0xe0   : > { %7458 = vmatprep.mubr.msk.f32.mxu1 %vm382_vm1, %v2038_v49  ;;  %7682 = vmatprep.mubr.msk.f32.mxu0 %vm382_vm1, %v9599_v20  ;;  %12017 = vst [vmem:[#allocation16_spill] sm:$0xff] %v9625_v3  ;;  %v2451_v49 = vsel %vm382_vm1, %v6450_v54, 0.0  ;;  %v6419_v23 = vld [vmem:[%s8293_s13 + $0x90] sm:$0xff] }
  0xe1   : > { %2446 = vadd.xlane.f32.xlu1 %v2445_v19  ;;  %2443 = vadd.xlane.f32.xlu0 %v2442_v1  ;;  %12018 = vst [vmem:[#allocation6_spill] sm:$0xff] %v9643_v30  ;;  %v6418_v19 = vld [vmem:[%s8293_s13 + $0x80] sm:$0xff]  ;;  %v2042_v1 = vmul.f32 %v6449_v10, %v6417_v9  ;;  %v6827_v13 = vld [vmem:[%s8293_s13 + $0x169] sm:$0xff]  ;;  %v2454_v9 = vsel %vm382_vm1, %v6451_v5, 0.0 }
  0xe2   : > { %v1263_v17 = vpop.xlane.xlu1 %1262  ;;  %v1260_v11 = vpop.xlane.xlu0 %1259  ;;  %v6859_v53 = vld [vmem:[%s8288_s10 + $0x169] sm:$0xff] }
  0xe3   : > { %v9635_v36 = vadd.f32 %v1263_v17, %v9322_v12  ;;  %v9638_v51 = vadd.f32 %v1260_v11, %v9299_v58  ;;  %7459 = vmatmul.mubr.msk.f32.gmra.mrb[4].mxu1 %vm382_vm1, %v2039_v59  ;;  %7683 = vmatmul.mubr.msk.f32.gmra.mrb[20].mxu0 %vm382_vm1, %v9618_v37  ;;  %v9651_v58 = vmul.f32 %v6857_v22, %v6825_v61  ;;  %v6826_v12 = vld [vmem:[%s8293_s13 + $0x159] sm:$0xff] }
  0xe4   : > { %7461 = vmatprep.mubr.msk.f32.mxu1 %vm382_vm1, %v2040_v4  ;;  %7685 = vmatprep.mubr.msk.f32.mxu0 %vm382_vm1, %v9625_v3  ;;  %v6858_v59 = vld [vmem:[%s8288_s10 + $0x159] sm:$0xff]  ;;  %v2457_v4 = vsel %vm382_vm1, %v6452_v35, 0.0  ;;  %v2043_v61 = vmul.f32 %v6450_v54, %v6418_v19  ;;  %v2044_v3 = vmul.f32 %v6451_v5, %v6419_v23  ;;  %v6828_v54 = vld [vmem:[%s8293_s13 + $0x171] sm:$0xff]  ;;  %v6421_v19 = vld [vmem:[%s8293_s13 + $0xa8] sm:$0xff]  ;;  %v2460_v23 = vsel %vm382_vm1, %v6453_v46, 0.0 }
  0xe5   : > { %12019 = vst [vmem:[#allocation13_spill] sm:$0xff] %v9651_v58  ;;  %2452 = vadd.xlane.f32.xlu1 %v2451_v49  ;;  %2449 = vadd.xlane.f32.xlu0 %v2448_v24  ;;  %v6420_v11 = vld [vmem:[%s8293_s13 + $0x98] sm:$0xff]  ;;  %v9669_v49 = vmul.f32 %v6858_v59, %v6826_v12  ;;  %v6454_v24 = vld [vmem:[%s8288_s10 + $0xb0] sm:$0xff]  ;;  %v6829_v12 = vld [vmem:[%s8293_s13 + $0x181] sm:$0xff] }
  0xe6   : > { %v1269_v17 = vpop.xlane.xlu1 %1268  ;;  %v9658_v10 = vpop.xlane.xlu0 %1265  ;;  %v6861_v59 = vld [vmem:[%s8288_s10 + $0x181] sm:$0xff] }
  0xe7   : > { %v9663_v22 = vadd.f32 %v1269_v17, %v9320_v26  ;;  %7462 = vmatmul.mubr.msk.f32.gmra.mrb[6].mxu1 %vm382_vm1, %v2041_v33  ;;  %7686 = vmatmul.mubr.msk.f32.gmra.mrb[22].mxu0 %vm382_vm1, %v9643_v30  ;;  %12020 = vst [vmem:[#allocation29_spill] sm:$0xff] %v9669_v49  ;;  %v9676_v26 = vmul.f32 %v6859_v53, %v6827_v13  ;;  %v6860_v33 = vld [vmem:[%s8288_s10 + $0x171] sm:$0xff] }
  0xe8   : > { %7464 = vmatprep.mubr.msk.f32.mxu1 %vm382_vm1, %v2042_v1  ;;  %7688 = vmatprep.mubr.msk.f32.mxu0 %vm382_vm1, %v9651_v58  ;;  %v2045_v17 = vmul.f32 %v6452_v35, %v6420_v11  ;;  %v2463_v1 = vsel %vm382_vm1, %v6454_v24, 0.0  ;;  %v6422_v35 = vld [vmem:[%s8293_s13 + $0xb0] sm:$0xff]  ;;  %v6455_v11 = vld [vmem:[%s8288_s10 + $0xc0] sm:$0xff]  ;;  %v2046_v58 = vmul.f32 %v6453_v46, %v6421_v19 }
  0xe9   : > { %12021 = vst [vmem:[#allocation24_spill] sm:$0xff] %v9676_v26  ;;  %2458 = vadd.xlane.f32.xlu1 %v2457_v4  ;;  %2455 = vadd.xlane.f32.xlu0 %v2454_v9  ;;  %v9695_v4 = vmul.f32 %v6860_v33, %v6828_v54  ;;  %v6456_v9 = vld [vmem:[%s8288_s10 + $0xc8] sm:$0xff]  ;;  %v6831_v54 = vld [vmem:[%s8293_s13 + $0x199] sm:$0xff]  ;;  %v2466_v19 = vsel %vm382_vm1, %v6455_v11, 0.0 }
  0xea   : > { %v1275_v30 = vpop.xlane.xlu1 %1274  ;;  %v1272_v5 = vpop.xlane.xlu0 %1271  ;;  %v6863_v33 = vld [vmem:[%s8288_s10 + $0x199] sm:$0xff] }
  0xeb   : > { %v9686_v13 = vadd.f32 %v1275_v30, %v9338_v27  ;;  %v9689_v53 = vadd.f32 %v1272_v5, %v9340_v62  ;;  %7465 = vmatmul.mubr.msk.f32.gmra.mrb[8].mxu1 %vm382_vm1, %v2043_v61  ;;  %7689 = vmatmul.mubr.msk.f32.gmra.mrb[24].mxu0 %vm382_vm1, %v9669_v49  ;;  %12022 = vst [vmem:[#allocation11_spill] sm:$0xff] %v9695_v4  ;;  %v6830_v62 = vld [vmem:[%s8293_s13 + $0x189] sm:$0xff]  ;;  %v6423_v61 = vld [vmem:[%s8293_s13 + $0xc0] sm:$0xff] }
  0xec   : > { %7467 = vmatprep.mubr.msk.f32.mxu1 %vm382_vm1, %v2044_v3  ;;  %7691 = vmatprep.mubr.msk.f32.mxu0 %vm382_vm1, %v9676_v26  ;;  %v9702_v27 = vmul.f32 %v6861_v59, %v6829_v12  ;;  %v6862_v30 = vld [vmem:[%s8288_s10 + $0x189] sm:$0xff]  ;;  %v2047_v5 = vmul.f32 %v6454_v24, %v6422_v35  ;;  %v2469_v3 = vsel %vm382_vm1, %v6456_v9, 0.0  ;;  %v6457_v35 = vld [vmem:[%s8288_s10 + $0xd8] sm:$0xff]  ;;  %v2048_v26 = vmul.f32 %v6455_v11, %v6423_v61 }
  0xed   : > { %2464 = vadd.xlane.f32.xlu1 %v2463_v1  ;;  %2461 = vadd.xlane.f32.xlu0 %v2460_v23  ;;  %v6424_v24 = vld [vmem:[%s8293_s13 + $0xc8] sm:$0xff]  ;;  %v9721_v1 = vmul.f32 %v6862_v30, %v6830_v62  ;;  %v6458_v23 = vld [vmem:[%s8288_s10 + $0xe0] sm:$0xff]  ;;  %v9733_v62 = vld [vmem:[%s8288_s10 + $0x32] sm:$0xff]  ;;  %v2472_v61 = vsel %vm382_vm1, %v6457_v35, 0.0 }
  0xee   : > { %12023 = vst [vmem:[#allocation20_spill] sm:$0xff] %v9702_v27  ;;  %v1281_v49 = vpop.xlane.xlu1 %1280  ;;  %v1278_v46 = vpop.xlane.xlu0 %1277  ;;  %12025 = vst [vmem:[#allocation18_spill] sm:$0xff] %v9733_v62  ;;  %v2049_v30 = vmul.f32 %v6456_v9, %v6424_v24  ;;  %v6426_v9 = vld [vmem:[%s8293_s13 + $0xe0] sm:$0xff]  ;;  %v6459_v24 = vld [vmem:[%s8288_s10 + $0xf0] sm:$0xff] }
  0xef   : > { %v9712_v12 = vadd.f32 %v1281_v49, %v9358_v28  ;;  %v9715_v59 = vadd.f32 %v1278_v46, %v9360_v40  ;;  %7468 = vmatmul.mubr.msk.f32.gmra.mrb[10].mxu1 %vm382_vm1, %v2045_v17  ;;  %7692 = vmatmul.mubr.msk.f32.gmra.mrb[26].mxu0 %vm382_vm1, %v9695_v4  ;;  %12024 = vst [vmem:[#allocation32_spill] sm:$0xff] %v9721_v1  ;;  %v6832_v40 = vld [vmem:[%s8293_s13 + $0x1a1] sm:$0xff]  ;;  %v6425_v17 = vld [vmem:[%s8293_s13 + $0xd8] sm:$0xff] }
  0xf0   : > { %7470 = vmatprep.mubr.msk.f32.mxu1 %vm382_vm1, %v2046_v58  ;;  %7694 = vmatprep.mubr.msk.f32.mxu0 %vm382_vm1, %v9702_v27  ;;  %v4394_v28 = vmul.f32 %v6863_v33, %v6831_v54  ;;  %v6864_v49 = vld [vmem:[%s8288_s10 + $0x1a1] sm:$0xff]  ;;  %v6899_v46 = vld [vmem:[%s8293_s13 + $0x32] sm:$0xff]  ;;  %v2475_v58 = vsel %vm382_vm1, %v6458_v23, 0.0  ;;  %v2050_v27 = vmul.f32 %v6457_v35, %v6425_v17  ;;  %v2478_v17 = vsel %vm382_vm1, %v6459_v24, 0.0 }
  0xf1   : > { %2470 = vadd.xlane.f32.xlu1 %v2469_v3  ;;  %2467 = vadd.xlane.f32.xlu0 %v2466_v19  ;;  %v4395_v3 = vmul.f32 %v6864_v49, %v6832_v40  ;;  %v6460_v19 = vld [vmem:[%s8288_s10 + $0xf8] sm:$0xff]  ;;  %v9759_v40 = vld [vmem:[%s8288_s10 + $0x4a] sm:$0xff]  ;;  %v2051_v49 = vmul.f32 %v6458_v23, %v6426_v9 }
  0xf2   : > { %v1287_v4 = vpop.xlane.xlu1 %1286  ;;  %v1284_v11 = vpop.xlane.xlu0 %1283  ;;  %12027 = vst [vmem:[#allocation39_spill] sm:$0xff] %v9759_v40  ;;  %v6428_v23 = vld [vmem:[%s8293_s13 + $0xf8] sm:$0xff]  ;;  %v6462_v9 = vld [vmem:[%s8288_s10 + $0x110] sm:$0xff] }
  0xf3   : > { %v9738_v54 = vadd.f32 %v1287_v4, %v9377_v0  ;;  %v9741_v33 = vadd.f32 %v1284_v11, %v9379_v42  ;;  %7471 = vmatmul.mubr.msk.f32.gmra.mrb[12].mxu1 %vm382_vm1, %v2047_v5  ;;  %7695 = vmatmul.mubr.msk.f32.gmra.mrb[28].mxu0 %vm382_vm1, %v9721_v1  ;;  %v4946_v0 = vmul.f32 %v9733_v62, %v6899_v46  ;;  %v6900_v42 = vld [vmem:[%s8293_s13 + $0x3a] sm:$0xff]  ;;  %v6427_v5 = vld [vmem:[%s8293_s13 + $0xf0] sm:$0xff]  ;;  %v6461_v62 = vld [vmem:[%s8288_s10 + $0x108] sm:$0xff] }
  0xf4   : > { %7473 = vmatprep.mubr.msk.f32.mxu1 %vm382_vm1, %v2048_v26  ;;  %7697 = vmatprep.mubr.msk.f32.mxu0 %vm382_vm1, %v4394_v28  ;;  %v9754_v4 = vld [vmem:[%s8288_s10 + $0x3a] sm:$0xff]  ;;  %v6901_v11 = vld [vmem:[%s8293_s13 + $0x4a] sm:$0xff]  ;;  %v2481_v28 = vsel %vm382_vm1, %v6460_v19, 0.0  ;;  %v2052_v1 = vmul.f32 %v6459_v24, %v6427_v5  ;;  %v2484_v5 = vsel %vm382_vm1, %v6461_v62, 0.0 }
  0xf5   : > { %12026 = vst [vmem:[#allocation28_spill] sm:$0xff] %v9754_v4  ;;  %2476 = vadd.xlane.f32.xlu1 %v2475_v58  ;;  %2473 = vadd.xlane.f32.xlu0 %v2472_v61  ;;  %v4947_v61 = vmul.f32 %v9754_v4, %v6900_v42  ;;  %v9785_v42 = vld [vmem:[%s8288_s10 + $0x62] sm:$0xff] }
  0xf6   : > { %v1293_v35 = vpop.xlane.xlu1 %1292  ;;  %v1290_v26 = vpop.xlane.xlu0 %1289  ;;  %12029 = vst [vmem:[#allocation36_spill] sm:$0xff] %v9785_v42 }
  0xf7   : > { %v9764_v46 = vadd.f32 %v1293_v35, %v9395_v39  ;;  %v9767_v58 = vadd.f32 %v1290_v26, %v9397_v14  ;;  %7474 = vmatmul.mubr.msk.f32.gmra.mrb[14].mxu1 %vm382_vm1, %v2049_v30  ;;  %7698 = vmatmul.mubr.msk.f32.gmra.mrb[30].mxu0 %vm382_vm1, %v4395_v3  ;;  %v4948_v39 = vmul.f32 %v9759_v40, %v6901_v11  ;;  %v6902_v14 = vld [vmem:[%s8293_s13 + $0x52] sm:$0xff]  ;;  %v6429_v30 = vld [vmem:[%s8293_s13 + $0x108] sm:$0xff]  ;;  %v6463_v40 = vld [vmem:[%s8288_s10 + $0x120] sm:$0xff] }
  0xf8   : > { %7476 = vmatprep.mubr.msk.f32.mxu1 %vm382_vm1, %v2050_v27  ;;  %7702 = vmatprep.mubr.msk.f32.mxu0 %vm382_vm1, %v4946_v0  ;;  %v9780_v35 = vld [vmem:[%s8288_s10 + $0x52] sm:$0xff]  ;;  %v6903_v3 = vld [vmem:[%s8293_s13 + $0x62] sm:$0xff]  ;;  %v2053_v26 = vmul.f32 %v6460_v19, %v6428_v23  ;;  %v2487_v0 = vsel %vm382_vm1, %v6462_v9, 0.0  ;;  %v2054_v4 = vmul.f32 %v6461_v62, %v6429_v30  ;;  %v2490_v30 = vsel %vm382_vm1, %v6463_v40, 0.0 }
  0xf9   : > { %12028 = vst [vmem:[#allocation26_spill] sm:$0xff] %v9780_v35  ;;  %2482 = vadd.xlane.f32.xlu1 %v2481_v28  ;;  %2479 = vadd.xlane.f32.xlu0 %v2478_v17  ;;  %v6430_v19 = vld [vmem:[%s8293_s13 + $0x110] sm:$0xff]  ;;  %v4949_v17 = vmul.f32 %v9780_v35, %v6902_v14  ;;  %v6464_v23 = vld [vmem:[%s8288_s10 + $0x128] sm:$0xff]  ;;  %v9811_v14 = vld [vmem:[%s8288_s10 + $0x7a] sm:$0xff] }
  0xfa   : > { %v1299_v24 = vpop.xlane.xlu1 %1298  ;;  %v1296_v27 = vpop.xlane.xlu0 %1295  ;;  %12031 = vst [vmem:[#allocation43_spill] sm:$0xff] %v9811_v14 }
  0xfb   : > { %v9790_v11 = vadd.f32 %v1299_v24, %v9413_v44  ;;  %v9793_v28 = vadd.f32 %v1296_v27, %v9415_v45  ;;  %7477 = vmatmul.mubr.msk.f32.gmra.mrb[16].mxu1 %vm382_vm1, %v2051_v49  ;;  %7703 = vmatmul.mubr.msk.f32.vlgmr.msra.gmra.mrb[0].mxu0 %vm382_vm1, %v4947_v61  ;;  %v4950_v44 = vmul.f32 %v9785_v42, %v6903_v3  ;;  %v6904_v45 = vld [vmem:[%s8293_s13 + $0x6a] sm:$0xff]  ;;  %v6431_v49 = vld [vmem:[%s8293_s13 + $0x120] sm:$0xff]  ;;  %v6465_v42 = vld [vmem:[%s8288_s10 + $0x138] sm:$0xff] }
  0xfc   : > { %7479 = vmatprep.mubr.msk.f32.mxu1 %vm382_vm1, %v2052_v1  ;;  %7705 = vmatprep.mubr.msk.f32.mxu0 %vm382_vm1, %v4948_v39  ;;  %v9806_v24 = vld [vmem:[%s8288_s10 + $0x6a] sm:$0xff]  ;;  %v6905_v61 = vld [vmem:[%s8293_s13 + $0x7a] sm:$0xff]  ;;  %v2055_v27 = vmul.f32 %v6462_v9, %v6430_v19  ;;  %v2493_v39 = vsel %vm382_vm1, %v6464_v23, 0.0  ;;  %v2056_v35 = vmul.f32 %v6463_v40, %v6431_v49  ;;  %v2496_v49 = vsel %vm382_vm1, %v6465_v42, 0.0 }
  0xfd   : > { %12030 = vst [vmem:[#allocation34_spill] sm:$0xff] %v9806_v24  ;;  %2488 = vadd.xlane.f32.xlu1 %v2487_v0  ;;  %2485 = vadd.xlane.f32.xlu0 %v2484_v5  ;;  %v6432_v9 = vld [vmem:[%s8293_s13 + $0x128] sm:$0xff]  ;;  %v4951_v5 = vmul.f32 %v9806_v24, %v6904_v45  ;;  %v6466_v19 = vld [vmem:[%s8288_s10 + $0x140] sm:$0xff]  ;;  %v9837_v45 = vld [vmem:[%s8288_s10 + $0x92] sm:$0xff] }
  0xfe   : > { %v1305_v62 = vpop.xlane.xlu1 %1304  ;;  %v1302_v1 = vpop.xlane.xlu0 %1301  ;;  %12033 = vst [vmem:[#allocation4_spill] sm:$0xff] %v9837_v45 }
  0xff   : > { %v9816_v3 = vadd.f32 %v1305_v62, %v9431_v16  ;;  %v9819_v0 = vadd.f32 %v1302_v1, %v9433_v38  ;;  %7480 = vmatmul.mubr.msk.f32.gmra.mrb[18].mxu1 %vm382_vm1, %v2053_v26  ;;  %7706 = vmatmul.mubr.msk.f32.gmra.mrb[2].mxu0 %vm382_vm1, %v4949_v17  ;;  %v4952_v16 = vmul.f32 %v9811_v14, %v6905_v61  ;;  %v6906_v38 = vld [vmem:[%s8293_s13 + $0x82] sm:$0xff]  ;;  %v6433_v26 = vld [vmem:[%s8293_s13 + $0x138] sm:$0xff]  ;;  %v6467_v14 = vld [vmem:[%s8288_s10 + $0x150] sm:$0xff] }
 0x100   : > { %7482 = vmatprep.mubr.msk.f32.mxu1 %vm382_vm1, %v2054_v4  ;;  %7708 = vmatprep.mubr.msk.f32.mxu0 %vm382_vm1, %v4950_v44  ;;  %v9832_v62 = vld [vmem:[%s8288_s10 + $0x82] sm:$0xff]  ;;  %v6907_v17 = vld [vmem:[%s8293_s13 + $0x92] sm:$0xff]  ;;  %v2057_v1 = vmul.f32 %v6464_v23, %v6432_v9  ;;  %v2499_v44 = vsel %vm382_vm1, %v6466_v19, 0.0  ;;  %v2058_v24 = vmul.f32 %v6465_v42, %v6433_v26  ;;  %v2502_v26 = vsel %vm382_vm1, %v6467_v14, 0.0 }
 0x101   : > { %12032 = vst [vmem:[#allocation41_spill] sm:$0xff] %v9832_v62  ;;  %2494 = vadd.xlane.f32.xlu1 %v2493_v39  ;;  %2491 = vadd.xlane.f32.xlu0 %v2490_v30  ;;  %v6434_v23 = vld [vmem:[%s8293_s13 + $0x140] sm:$0xff]  ;;  %v4953_v30 = vmul.f32 %v9832_v62, %v6906_v38  ;;  %v6468_v9 = vld [vmem:[%s8288_s10 + $0x158] sm:$0xff]  ;;  %v9863_v38 = vld [vmem:[%s8288_s10 + $0xaa] sm:$0xff] }
 0x102   : > { %v1311_v40 = vpop.xlane.xlu1 %1310  ;;  %v1308_v4 = vpop.xlane.xlu0 %1307  ;;  %12035 = vst [vmem:[#allocation9_spill] sm:$0xff] %v9863_v38 }
 0x103   : > { %v9842_v61 = vadd.f32 %v1311_v40, %v9451_v32  ;;  %v9845_v39 = vadd.f32 %v1308_v4, %v9453_v55  ;;  %7483 = vmatmul.mubr.msk.f32.gmra.mrb[20].mxu1 %vm382_vm1, %v2055_v27  ;;  %7709 = vmatmul.mubr.msk.f32.gmra.mrb[4].mxu0 %vm382_vm1, %v4951_v5  ;;  %v4954_v32 = vmul.f32 %v9837_v45, %v6907_v17  ;;  %v6908_v55 = vld [vmem:[%s8293_s13 + $0x9a] sm:$0xff]  ;;  %v6435_v27 = vld [vmem:[%s8293_s13 + $0x150] sm:$0xff]  ;;  %v6469_v45 = vld [vmem:[%s8288_s10 + $0x168] sm:$0xff] }
 0x104   : > { %7485 = vmatprep.mubr.msk.f32.mxu1 %vm382_vm1, %v2056_v35  ;;  %7711 = vmatprep.mubr.msk.f32.mxu0 %vm382_vm1, %v4952_v16  ;;  %v9858_v40 = vld [vmem:[%s8288_s10 + $0x9a] sm:$0xff]  ;;  %v6909_v5 = vld [vmem:[%s8293_s13 + $0xaa] sm:$0xff]  ;;  %v2059_v4 = vmul.f32 %v6466_v19, %v6434_v23  ;;  %v2505_v16 = vsel %vm382_vm1, %v6468_v9, 0.0  ;;  %v2060_v62 = vmul.f32 %v6467_v14, %v6435_v27  ;;  %v2508_v27 = vsel %vm382_vm1, %v6469_v45, 0.0 }
 0x105   : > { %12034 = vst [vmem:[#allocation2_spill] sm:$0xff] %v9858_v40  ;;  %2500 = vadd.xlane.f32.xlu1 %v2499_v44  ;;  %2497 = vadd.xlane.f32.xlu0 %v2496_v49  ;;  %v6436_v19 = vld [vmem:[%s8293_s13 + $0x158] sm:$0xff]  ;;  %v4955_v49 = vmul.f32 %v9858_v40, %v6908_v55  ;;  %v6470_v23 = vld [vmem:[%s8288_s10 + $0x170] sm:$0xff]  ;;  %v9889_v55 = vld [vmem:[%s8288_s10 + $0xc2] sm:$0xff] }
 0x106   : > { %v1317_v42 = vpop.xlane.xlu1 %1316  ;;  %v1314_v35 = vpop.xlane.xlu0 %1313  ;;  %12036 = vst [vmem:[#allocation5_spill] sm:$0xff] %v9889_v55 }
 0x107   : > { %v9868_v17 = vadd.f32 %v1317_v42, %v9469_v34  ;;  %v9871_v44 = vadd.f32 %v1314_v35, %v9471_v6  ;;  %7486 = vmatmul.mubr.msk.f32.gmra.mrb[22].mxu1 %vm382_vm1, %v2057_v1  ;;  %7712 = vmatmul.mubr.msk.f32.gmra.mrb[6].mxu0 %vm382_vm1, %v4953_v30  ;;  %v4956_v34 = vmul.f32 %v9863_v38, %v6909_v5  ;;  %v6910_v6 = vld [vmem:[%s8293_s13 + $0xb2] sm:$0xff]  ;;  %v6437_v1 = vld [vmem:[%s8293_s13 + $0x168] sm:$0xff]  ;;  %v6471_v38 = vld [vmem:[%s8288_s10 + $0x180] sm:$0xff] }
 0x108   : > { %7488 = vmatprep.mubr.msk.f32.mxu1 %vm382_vm1, %v2058_v24  ;;  %7714 = vmatprep.mubr.msk.f32.mxu0 %vm382_vm1, %v4954_v32  ;;  %v9884_v42 = vld [vmem:[%s8288_s10 + $0xb2] sm:$0xff]  ;;  %v6911_v30 = vld [vmem:[%s8293_s13 + $0xc2] sm:$0xff]  ;;  %v2061_v35 = vmul.f32 %v6468_v9, %v6436_v19  ;;  %v2511_v32 = vsel %vm382_vm1, %v6470_v23, 0.0  ;;  %v2062_v40 = vmul.f32 %v6469_v45, %v6437_v1 }
 0x109   : > { %2506 = vadd.xlane.f32.xlu1 %v2505_v16  ;;  %2503 = vadd.xlane.f32.xlu0 %v2502_v26  ;;  %v6438_v9 = vld [vmem:[%s8293_s13 + $0x170] sm:$0xff]  ;;  %v4957_v26 = vmul.f32 %v9884_v42, %v6910_v6  ;;  %v6472_v19 = vld [vmem:[%s8288_s10 + $0x188] sm:$0xff] }
 0x10a   : > { %v1323_v14 = vpop.xlane.xlu1 %1322  ;;  %v1320_v24 = vpop.xlane.xlu0 %1319  ;;  %v2063_v6 = vmul.f32 %v6470_v23, %v6438_v9  ;;  %v6440_v23 = vld [vmem:[%s8293_s13 + $0x188] sm:$0xff] }
 0x10b   : > { %v9894_v5 = vadd.f32 %v1323_v14, %v9487_v41  ;;  %v9897_v16 = vadd.f32 %v1320_v24, %v9489_v63  ;;  %7489 = vmatmul.mubr.msk.f32.gmra.mrb[24].mxu1 %vm382_vm1, %v2059_v4  ;;  %7715 = vmatmul.mubr.msk.f32.gmra.mrb[8].mxu0 %vm382_vm1, %v4955_v49  ;;  %v4958_v41 = vmul.f32 %v9889_v55, %v6911_v30  ;;  %v6912_v63 = vld [vmem:[%s8293_s13 + $0xca] sm:$0xff]  ;;  %v6439_v4 = vld [vmem:[%s8293_s13 + $0x180] sm:$0xff] }
 0x10c   : > { %7491 = vmatprep.mubr.msk.f32.mxu1 %vm382_vm1, %v2060_v62  ;;  %7717 = vmatprep.mubr.msk.f32.mxu0 %vm382_vm1, %v4956_v34  ;;  %v9910_v14 = vld [vmem:[%s8288_s10 + $0xca] sm:$0xff]  ;;  %v6913_v49 = vld [vmem:[%s8293_s13 + $0xda] sm:$0xff]  ;;  %v2517_v62 = vsel %vm382_vm1, %v6472_v19, 0.0  ;;  %v2514_v34 = vsel %vm382_vm1, %v6471_v38, 0.0  ;;  %v2064_v9 = vmul.f32 %v6471_v38, %v6439_v4  ;;  %v9934_v55 = vld [vmem:[%s8288_s10 + $0xe2] sm:$0xff] }
 0x10d   : > { %2512 = vadd.xlane.f32.xlu1 %v2511_v32  ;;  %2509 = vadd.xlane.f32.xlu0 %v2508_v27  ;;  %v9915_v24 = vld [vmem:[%s8288_s10 + $0xda] sm:$0xff]  ;;  %v4959_v27 = vmul.f32 %v9910_v14, %v6912_v63 }
 0x10e   : > { %v1329_v45 = vpop.xlane.xlu1 %1328  ;;  %v1326_v1 = vpop.xlane.xlu0 %1325  ;;  %v8085_v38 = vld [vmem:[%s8288_s10 + $0x21] sm:$0xff] }
 0x10f   : > { %v9920_v30 = vadd.f32 %v1329_v45, %v9505_v7  ;;  %v9923_v32 = vadd.f32 %v1326_v1, %v9507_v8  ;;  %7492 = vmatmul.mubr.msk.f32.gmra.mrb[26].mxu1 %vm382_vm1, %v2061_v35  ;;  %7718 = vmatmul.mubr.msk.f32.gmra.mrb[10].mxu0 %vm382_vm1, %v4957_v26  ;;  %v4960_v7 = vmul.f32 %v9915_v24, %v6913_v49  ;;  %v6914_v45 = vld [vmem:[%s8293_s13 + $0xe2] sm:$0xff]  ;;  %v6915_v8 = vld [vmem:[%s8293_s13 + $0xf2] sm:$0xff] }
 0x110   : > { %7494 = vmatprep.mubr.msk.f32.mxu1 %vm382_vm1, %v2062_v40  ;;  %7720 = vmatprep.mubr.msk.f32.mxu0 %vm382_vm1, %v4958_v41  ;;  %v9938_v35 = vld [vmem:[%s8288_s10 + $0xf2] sm:$0xff]  ;;  %v2065_v26 = vmul.f32 %v6472_v19, %v6440_v23  ;;  %v3009_v40 = vsel %vm382_vm1, %v8085_v38, 0.0  ;;  %v4961_v19 = vmul.f32 %v9934_v55, %v6914_v45  ;;  %v6916_v23 = vld [vmem:[%s8293_s13 + $0xfa] sm:$0xff] }
 0x111   : > { %2518 = vadd.xlane.f32.xlu1 %v2517_v62  ;;  %2515 = vadd.xlane.f32.xlu0 %v2514_v34  ;;  %v8086_v41 = vld [vmem:[%s8288_s10 + $0x19] sm:$0xff]  ;;  %v4962_v34 = vmul.f32 %v9938_v35, %v6915_v8 }
 0x112   : > { %v1335_v63 = vpop.xlane.xlu1 %1334  ;;  %v1332_v1 = vpop.xlane.xlu0 %1331  ;;  %v3006_v4 = vsel %vm382_vm1, %v8086_v41, 0.0 }
 0x113   : > { %v9945_v49 = vadd.f32 %v1335_v63, %v9528_v50  ;;  %v9948_v62 = vadd.f32 %v1332_v1, %v9530_v25  ;;  %7495 = vmatmul.mubr.msk.f32.gmra.mrb[28].mxu1 %vm382_vm1, %v2063_v6  ;;  %7721 = vmatmul.mubr.msk.f32.gmra.mrb[12].mxu0 %vm382_vm1, %v4959_v27  ;;  %v9958_v50 = vld [vmem:[%s8288_s10 + $0xfa] sm:$0xff]  ;;  %v6917_v25 = vld [vmem:[%s8293_s13 + $0x10a] sm:$0xff] }
 0x114   : > { %7497 = vmatprep.mubr.msk.f32.mxu1 %vm382_vm1, %v2064_v9  ;;  %7723 = vmatprep.mubr.msk.f32.mxu0 %vm382_vm1, %v4960_v7  ;;  %v9962_v63 = vld [vmem:[%s8288_s10 + $0x10a] sm:$0xff]  ;;  %v8087_v1 = vld [vmem:[%s8288_s10 + $0x39] sm:$0xff] }
 0x115   : > { %3010 = vadd.xlane.f32.xlu1 %v3009_v40  ;;  %3007 = vadd.xlane.f32.xlu0 %v3006_v4  ;;  %v3015_v9 = vsel %vm382_vm1, %v8087_v1, 0.0  ;;  %v8088_v7 = vld [vmem:[%s8288_s10 + $0x31] sm:$0xff]  ;;  %v4963_v40 = vmul.f32 %v9958_v50, %v6916_v23  ;;  %v4964_v41 = vmul.f32 %v9962_v63, %v6917_v25 }
 0x116   : > { %v1341_v6 = vpop.xlane.xlu1 %1340  ;;  %v1338_v27 = vpop.xlane.xlu0 %1337  ;;  %v3012_v45 = vsel %vm382_vm1, %v8088_v7, 0.0  ;;  %v6950_v4 = vld [vmem:[%s8288_s10 + $0x112] sm:$0xff] }
 0x117   : > { %v9969_v8 = vadd.f32 %v1341_v6, %v9552_v48  ;;  %v9972_v38 = vadd.f32 %v1338_v27, %v9554_v57  ;;  %7498 = vmatmul.mubr.msk.f32.gmra.mrb[30].mxu1 %vm382_vm1, %v2065_v26  ;;  %7724 = vmatmul.mubr.msk.f32.gmra.mrb[14].mxu0 %vm382_vm1, %v4961_v19  ;;  %v6918_v48 = vld [vmem:[%s8293_s13 + $0x112] sm:$0xff]  ;;  %v6919_v57 = vld [vmem:[%s8293_s13 + $0x122] sm:$0xff] }
 0x118   : > { %7526 = vmatprep.mubr.msk.f32.mxu1 %vm382_vm1, %v9521_v18  ;;  %7726 = vmatprep.mubr.msk.f32.mxu0 %vm382_vm1, %v4962_v34  ;;  %v6951_v6 = vld [vmem:[%s8288_s10 + $0x122] sm:$0xff]  ;;  %v8089_v19 = vld [vmem:[%s8288_s10 + $0x51] sm:$0xff] }
 0x119   : > { %3016 = vadd.xlane.f32.xlu1 %v3015_v9  ;;  %3013 = vadd.xlane.f32.xlu0 %v3012_v45  ;;  %v3021_v23 = vsel %vm382_vm1, %v8089_v19, 0.0  ;;  %v8090_v18 = vld [vmem:[%s8288_s10 + $0x49] sm:$0xff]  ;;  %v4965_v9 = vmul.f32 %v6950_v4, %v6918_v48  ;;  %v4966_v7 = vmul.f32 %v6951_v6, %v6919_v57  ;;  %v8092_v48 = vld [vmem:[%s8288_s10 + $0x61] sm:$0xff] }
 0x11a   : > { %v1347_v26 = vpop.xlane.xlu1 %1346  ;;  %v1344_v27 = vpop.xlane.xlu0 %1343  ;;  %v3018_v34 = vsel %vm382_vm1, %v8090_v18, 0.0  ;;  %v6920_v45 = vld [vmem:[%s8293_s13 + $0x12a] sm:$0xff]  ;;  %v6923_v18 = vld [vmem:[%s8293_s13 + $0x152] sm:$0xff] }
 0x11b   : > { %v9990_v25 = vadd.f32 %v1347_v26, %v9580_v29  ;;  %v9993_v1 = vadd.f32 %v1344_v27, %v9582_v43  ;;  %7527 = vmatmul.mubr.msk.f32.vlgmr.msra.gmra.mrb[16].mxu1 %vm382_vm1, %v9537_v31  ;;  %7727 = vmatmul.mubr.msk.f32.gmra.mrb[16].mxu0 %vm382_vm1, %v4963_v40  ;;  %v6952_v29 = vld [vmem:[%s8288_s10 + $0x12a] sm:$0xff]  ;;  %v6921_v26 = vld [vmem:[%s8293_s13 + $0x13a] sm:$0xff] }
 0x11c   : > { %7529 = vmatprep.mubr.msk.f32.mxu1 %vm382_vm1, %v9545_v56  ;;  %7729 = vmatprep.mubr.msk.f32.mxu0 %vm382_vm1, %v4964_v41  ;;  %v6953_v43 = vld [vmem:[%s8288_s10 + $0x13a] sm:$0xff]  ;;  %v8091_v19 = vld [vmem:[%s8288_s10 + $0x69] sm:$0xff]  ;;  %v3024_v56 = vsel %vm382_vm1, %v8092_v48, 0.0  ;;  %v4967_v57 = vmul.f32 %v6952_v29, %v6920_v45 }
 0x11d   : > { %3022 = vadd.xlane.f32.xlu1 %v3021_v23  ;;  %3019 = vadd.xlane.f32.xlu0 %v3018_v34  ;;  %v3027_v40 = vsel %vm382_vm1, %v8091_v19, 0.0  ;;  %v4968_v6 = vmul.f32 %v6953_v43, %v6921_v26  ;;  %v6922_v23 = vld [vmem:[%s8293_s13 + $0x142] sm:$0xff]  ;;  %v8094_v45 = vld [vmem:[%s8288_s10 + $0x79] sm:$0xff]  ;;  %v6925_v19 = vld [vmem:[%s8293_s13 + $0x16a] sm:$0xff] }
 0x11e   : > { %v1353_v27 = vpop.xlane.xlu1 %1352  ;;  %v1350_v31 = vpop.xlane.xlu0 %1349 }
 0x11f   : > { %v10010_v41 = vadd.f32 %v1353_v27, %v9606_v2  ;;  %v10013_v4 = vadd.f32 %v1350_v31, %v9608_v52  ;;  %7530 = vmatmul.mubr.msk.f32.gmra.mrb[18].mxu1 %vm382_vm1, %v9563_v60  ;;  %7730 = vmatmul.mubr.msk.f32.gmra.mrb[18].mxu0 %vm382_vm1, %v4965_v9  ;;  %v6954_v2 = vld [vmem:[%s8288_s10 + $0x142] sm:$0xff]  ;;  %v6955_v52 = vld [vmem:[%s8288_s10 + $0x152] sm:$0xff]  ;;  %v6924_v31 = vld [vmem:[%s8293_s13 + $0x15a] sm:$0xff] }
 0x120   : > { %7532 = vmatprep.mubr.msk.f32.mxu1 %vm382_vm1, %v9571_v47  ;;  %7732 = vmatprep.mubr.msk.f32.mxu0 %vm382_vm1, %v4966_v7  ;;  %v8093_v27 = vld [vmem:[%s8288_s10 + $0x81] sm:$0xff]  ;;  %v3030_v47 = vsel %vm382_vm1, %v8094_v45, 0.0  ;;  %v4969_v26 = vmul.f32 %v6954_v2, %v6922_v23  ;;  %v4970_v43 = vmul.f32 %v6955_v52, %v6923_v18  ;;  %v12037_v2 = vld [vmem:[#allocation16_spill] sm:$0xff] }
 0x121   : > { %3028 = vadd.xlane.f32.xlu1 %v3027_v40  ;;  %3025 = vadd.xlane.f32.xlu0 %v3024_v56  ;;  %v3033_v9 = vsel %vm382_vm1, %v8093_v27, 0.0  ;;  %v8095_v56 = vld [vmem:[%s8288_s10 + $0x99] sm:$0xff] }
 0x122   : > { %v1845_v34 = vpop.xlane.xlu1 %1844  ;;  %v1842_v60 = vpop.xlane.xlu0 %1841  ;;  %v6926_v52 = vld [vmem:[%s8293_s13 + $0x172] sm:$0xff] }
 0x123   : > { %v10030_v7 = vadd.f32 %v1845_v34, %v9635_v36  ;;  %v10033_v29 = vadd.f32 %v1842_v60, %v9638_v51  ;;  %7533 = vmatmul.mubr.msk.f32.gmra.mrb[20].mxu1 %vm382_vm1, %v9591_v21  ;;  %7733 = vmatmul.mubr.msk.f32.gmra.mrb[20].mxu0 %vm382_vm1, %v4967_v57  ;;  %v6956_v36 = vld [vmem:[%s8288_s10 + $0x15a] sm:$0xff]  ;;  %v1356_v51 = vadd.f32 %v9658_v10, %v9297_v15  ;;  %v6957_v21 = vld [vmem:[%s8288_s10 + $0x16a] sm:$0xff]  ;;  %v6958_v34 = vld [vmem:[%s8288_s10 + $0x172] sm:$0xff] }
 0x124   : > { %7535 = vmatprep.mubr.msk.f32.mxu1 %vm382_vm1, %v9599_v20  ;;  %7735 = vmatprep.mubr.msk.f32.mxu0 %vm382_vm1, %v4968_v6  ;;  %v3039_v20 = vsel %vm382_vm1, %v8095_v56, 0.0  ;;  %v8096_v57 = vld [vmem:[%s8288_s10 + $0x91] sm:$0xff]  ;;  %v4971_v10 = vmul.f32 %v6956_v36, %v6924_v31  ;;  %v4972_v18 = vmul.f32 %v6957_v21, %v6925_v19  ;;  %v6959_v60 = vld [vmem:[%s8288_s10 + $0x182] sm:$0xff] }
 0x125   : > { %3034 = vadd.xlane.f32.xlu1 %v3033_v9  ;;  %3031 = vadd.xlane.f32.xlu0 %v3030_v47  ;;  %v3036_v6 = vsel %vm382_vm1, %v8096_v57, 0.0  ;;  %v8097_v9 = vld [vmem:[%s8288_s10 + $0xb1] sm:$0xff]  ;;  %v8098_v47 = vld [vmem:[%s8288_s10 + $0xa9] sm:$0xff]  ;;  %v12038_v36 = vld [vmem:[#allocation6_spill] sm:$0xff] }
 0x126   : > { %v1851_v40 = vpop.xlane.xlu1 %1850  ;;  %v1848_v48 = vpop.xlane.xlu0 %1847  ;;  %v3045_v45 = vsel %vm382_vm1, %v8097_v9, 0.0  ;;  %v12039_v19 = vld [vmem:[#allocation13_spill] sm:$0xff]  ;;  %v8099_v57 = vld [vmem:[%s8288_s10 + $0xc9] sm:$0xff] }
 0x127   : > { %v10052_v23 = vadd.f32 %v1851_v40, %v9663_v22  ;;  %v10054_v15 = vadd.f32 %v1848_v48, %v1356_v51  ;;  %7536 = vmatmul.mubr.msk.f32.gmra.mrb[22].mxu1 %vm382_vm1, %v9618_v37  ;;  %7736 = vmatmul.mubr.msk.f32.gmra.mrb[22].mxu0 %vm382_vm1, %v4969_v26  ;;  %v6927_v22 = vld [vmem:[%s8293_s13 + $0x182] sm:$0xff]  ;;  %v3042_v26 = vsel %vm382_vm1, %v8098_v47, 0.0  ;;  %v4973_v51 = vmul.f32 %v6958_v34, %v6926_v52  ;;  %v6928_v40 = vld [vmem:[%s8293_s13 + $0x18a] sm:$0xff]  ;;  %v6929_v48 = vld [vmem:[%s8293_s13 + $0x19a] sm:$0xff] }
 0x128   : > { %7538 = vmatprep.mubr.msk.f32.mxu1 %vm382_vm1, %v12037_v2  ;;  %7738 = vmatprep.mubr.msk.f32.mxu0 %vm382_vm1, %v4970_v43  ;;  %v4974_v21 = vmul.f32 %v6959_v60, %v6927_v22  ;;  %v12040_v34 = vld [vmem:[#allocation29_spill] sm:$0xff]  ;;  %v12041_v60 = vld [vmem:[#allocation24_spill] sm:$0xff]  ;;  %v6962_v9 = vld [vmem:[%s8288_s10 + $0x1a2] sm:$0xff] }
 0x129   : > { %3040 = vadd.xlane.f32.xlu1 %v3039_v20  ;;  %3037 = vadd.xlane.f32.xlu0 %v3036_v6  ;;  %v3051_v6 = vsel %vm382_vm1, %v8099_v57, 0.0 }
 0x12a   : > { %v1857_v27 = vpop.xlane.xlu1 %1856  ;;  %v1854_v37 = vpop.xlane.xlu0 %1853 }
 0x12b   : > { %v10071_v43 = vadd.f32 %v1857_v27, %v9686_v13  ;;  %v10074_v31 = vadd.f32 %v1854_v37, %v9689_v53  ;;  %7539 = vmatmul.mubr.msk.f32.gmra.mrb[24].mxu1 %vm382_vm1, %v12038_v36  ;;  %7739 = vmatmul.mubr.msk.f32.gmra.mrb[24].mxu0 %vm382_vm1, %v4971_v10  ;;  %v6960_v13 = vld [vmem:[%s8288_s10 + $0x18a] sm:$0xff]  ;;  %v6961_v53 = vld [vmem:[%s8288_s10 + $0x19a] sm:$0xff]  ;;  %v6930_v37 = vld [vmem:[%s8293_s13 + $0x1a2] sm:$0xff] }
 0x12c   : > { %7541 = vmatprep.mubr.msk.f32.mxu1 %vm382_vm1, %v12039_v19  ;;  %7741 = vmatprep.mubr.msk.f32.mxu0 %vm382_vm1, %v4972_v18  ;;  %v8100_v10 = vld [vmem:[%s8288_s10 + $0xc1] sm:$0xff]  ;;  %v4975_v22 = vmul.f32 %v6960_v13, %v6928_v40  ;;  %v4976_v27 = vmul.f32 %v6961_v53, %v6929_v48  ;;  %v4977_v40 = vmul.f32 %v6962_v9, %v6930_v37  ;;  %v12043_v13 = vld [vmem:[#allocation20_spill] sm:$0xff] }
 0x12d   : > { %3046 = vadd.xlane.f32.xlu1 %v3045_v45  ;;  %3043 = vadd.xlane.f32.xlu0 %v3042_v26  ;;  %v3048_v2 = vsel %vm382_vm1, %v8100_v10, 0.0  ;;  %v8102_v26 = vld [vmem:[%s8288_s10 + $0xd9] sm:$0xff]  ;;  %v12044_v10 = vld [vmem:[#allocation32_spill] sm:$0xff] }
 0x12e   : > { %v1863_v56 = vpop.xlane.xlu1 %1862  ;;  %v1860_v20 = vpop.xlane.xlu0 %1859  ;;  %v10110_v36 = vsel %vm382_vm1, %v8102_v26, 0.0  ;;  %v8107_v26 = vld [vmem:[%s8288_s10 + $0x1a] sm:$0xff] }
 0x12f   : > { %v10091_v18 = vadd.f32 %v1863_v56, %v9712_v12  ;;  %v10094_v52 = vadd.f32 %v1860_v20, %v9715_v59  ;;  %7542 = vmatmul.mubr.msk.f32.gmra.mrb[26].mxu1 %vm382_vm1, %v12040_v34  ;;  %7742 = vmatmul.mubr.msk.f32.gmra.mrb[26].mxu0 %vm382_vm1, %v4973_v51  ;;  %v8101_v59 = vld [vmem:[%s8288_s10 + $0xe1] sm:$0xff]  ;;  %v8104_v56 = vld [vmem:[%s8288_s10 + $0xf1] sm:$0xff] }
 0x130   : > { %7544 = vmatprep.mubr.msk.f32.mxu1 %vm382_vm1, %v12041_v60  ;;  %7744 = vmatprep.mubr.msk.f32.mxu0 %vm382_vm1, %v4974_v21  ;;  %v10106_v47 = vsel %vm382_vm1, %v8101_v59, 0.0  ;;  %v12042_v21 = vld [vmem:[#allocation11_spill] sm:$0xff]  ;;  %v10132_v20 = vsel %vm382_vm1, %v8104_v56, 0.0 }
 0x131   : > { %3052 = vadd.xlane.f32.xlu1 %v3051_v6  ;;  %3049 = vadd.xlane.f32.xlu0 %v3048_v2  ;;  %v8105_v60 = vld [vmem:[%s8288_s10 + $0x109] sm:$0xff] }
 0x132   : > { %v1869_v12 = vpop.xlane.xlu1 %1868  ;;  %v1866_v45 = vpop.xlane.xlu0 %1865 }
 0x133   : > { %v10113_v51 = vadd.f32 %v1869_v12, %v9738_v54  ;;  %v10116_v19 = vadd.f32 %v1866_v45, %v9741_v33  ;;  %7545 = vmatmul.mubr.msk.f32.gmra.mrb[28].mxu1 %vm382_vm1, %v12042_v21  ;;  %7745 = vmatmul.mubr.msk.f32.gmra.mrb[28].mxu0 %vm382_vm1, %v4975_v22  ;;  %v8103_v33 = vld [vmem:[%s8288_s10 + $0xf9] sm:$0xff]  ;;  %v8106_v45 = vld [vmem:[%s8288_s10 + $0x22] sm:$0xff]  ;;  %v3588_v21 = vsel %vm382_vm1, %v8107_v26, 0.0 }
 0x134   : > { %7547 = vmatprep.mubr.msk.f32.mxu1 %vm382_vm1, %v12043_v13  ;;  %7747 = vmatprep.mubr.msk.f32.mxu0 %vm382_vm1, %v4976_v27  ;;  %v10128_v53 = vsel %vm382_vm1, %v8103_v33, 0.0  ;;  %v12045_v22 = vld [vmem:[#allocation21_spill] sm:$0xff]  ;;  %v3591_v59 = vsel %vm382_vm1, %v8106_v45, 0.0 }
 0x135   : > { %3058 = vadd.xlane.f32.xlu1 %v10106_v47  ;;  %3055 = vadd.xlane.f32.xlu0 %v10110_v36  ;;  %v8109_v33 = vld [vmem:[%s8288_s10 + $0x32] sm:$0xff] }
 0x136   : > { %v1875_v54 = vpop.xlane.xlu1 %1874  ;;  %v1872_v48 = vpop.xlane.xlu0 %1871  ;;  %v3594_v56 = vsel %vm382_vm1, %v8109_v33, 0.0 }
 0x137   : > { %v10135_v57 = vadd.f32 %v1875_v54, %v9764_v46  ;;  %v10138_v6 = vadd.f32 %v1872_v48, %v9767_v58  ;;  %7548 = vmatmul.mubr.msk.f32.gmra.mrb[30].mxu1 %vm382_vm1, %v12044_v10  ;;  %7748 = vmatmul.mubr.msk.f32.gmra.mrb[30].mxu0 %vm382_vm1, %v4977_v40  ;;  %v10147_v46 = vsel %vm382_vm1, %v12045_v22, 0.0  ;;  %v10151_v58 = vsel %vm382_vm1, %v8105_v60, 0.0  ;;  %v8108_v54 = vld [vmem:[%s8288_s10 + $0x30] sm:$0xff]  ;;  %v8111_v60 = vld [vmem:[%s8288_s10 + $0x38] sm:$0xff] }
 0x138   : > { %v4172_v48 = vsel %vm382_vm1, %v8108_v54, 0.0 }
 0x139   : > { %3064 = vadd.xlane.f32.xlu1 %v10128_v53  ;;  %3061 = vadd.xlane.f32.xlu0 %v10132_v20 }
 0x13a   : > { %v1881_v2 = vpop.xlane.xlu1 %1880  ;;  %v1878_v34 = vpop.xlane.xlu0 %1877 }
 0x13b   : > { %v10154_v27 = vadd.f32 %v1881_v2, %v9790_v11  ;;  %v10157_v37 = vadd.f32 %v1878_v34, %v9793_v28  ;;  %v8110_v34 = vld [vmem:[%s8288_s10 + $0x3a] sm:$0xff] }
 0x13c   : > { %v3597_v22 = vsel %vm382_vm1, %v8110_v34, 0.0 }
 0x13d   : > { %3070 = vadd.xlane.f32.xlu1 %v10147_v46  ;;  %3067 = vadd.xlane.f32.xlu0 %v10151_v58 }
 0x13e   : > { %v1887_v9 = vpop.xlane.xlu1 %1886  ;;  %v1884_v12 = vpop.xlane.xlu0 %1883 }
 0x13f   : > { %v10166_v11 = vadd.f32 %v1887_v9, %v9816_v3  ;;  %v10169_v28 = vadd.f32 %v1884_v12, %v9819_v0  ;;  %v4175_v9 = vsel %vm382_vm1, %v8111_v60, 0.0 }
 0x141   : > { %3592 = vadd.xlane.f32.xlu1 %v3591_v59  ;;  %3589 = vadd.xlane.f32.xlu0 %v3588_v21  ;;  %v8112_v59 = vld [vmem:[%s8288_s10 + $0x31] sm:$0xff]  ;;  %v8113_v21 = vld [vmem:[%s8288_s10 + $0x48] sm:$0xff] }
 0x142   : > { %v1893_v40 = vpop.xlane.xlu1 %1892  ;;  %v1890_v13 = vpop.xlane.xlu0 %1889  ;;  %v4754_v26 = vsel %vm382_vm1, %v8112_v59, 0.0 }
 0x143   : > { %v10176_v10 = vadd.f32 %v1893_v40, %v9842_v61  ;;  %v10179_v3 = vadd.f32 %v1890_v13, %v9845_v39  ;;  %v4178_v40 = vsel %vm382_vm1, %v8113_v21, 0.0 }
 0x145   : > { %4173 = vadd.xlane.f32.xlu1 %v4172_v48  ;;  %3595 = vadd.xlane.f32.xlu0 %v3594_v56  ;;  %v8114_v48 = vld [vmem:[%s8288_s10 + $0x4a] sm:$0xff]  ;;  %v8115_v56 = vld [vmem:[%s8288_s10 + $0x39] sm:$0xff] }
 0x146   : > { %v1899_v0 = vpop.xlane.xlu1 %1898  ;;  %v1896_v2 = vpop.xlane.xlu0 %1895  ;;  %v3600_v33 = vsel %vm382_vm1, %v8114_v48, 0.0 }
 0x147   : > { %v10186_v12 = vadd.f32 %v1899_v0, %v9868_v17  ;;  %v10189_v61 = vadd.f32 %v1896_v2, %v9871_v44  ;;  %v4757_v0 = vsel %vm382_vm1, %v8115_v56, 0.0 }
 0x149   : > { %3598 = vadd.xlane.f32.xlu1 %v3597_v22  ;;  %4176 = vadd.xlane.f32.xlu0 %v4175_v9  ;;  %v8116_v22 = vld [vmem:[%s8288_s10 + $0x49] sm:$0xff] }
 0x14a   : > { %v1905_v39 = vpop.xlane.xlu1 %1904  ;;  %v1902_v45 = vpop.xlane.xlu0 %1901  ;;  %v4760_v60 = vsel %vm382_vm1, %v8116_v22, 0.0  ;;  %v8117_v9 = vld [vmem:[%s8288_s10 + $0x50] sm:$0xff] }
 0x14b   : > { %v10196_v13 = vadd.f32 %v1905_v39, %v9894_v5  ;;  %v10199_v17 = vadd.f32 %v1902_v45, %v9897_v16  ;;  %v4181_v39 = vsel %vm382_vm1, %v8117_v9, 0.0 }
 0x14d   : > { %4755 = vadd.xlane.f32.xlu1 %v4754_v26  ;;  %4179 = vadd.xlane.f32.xlu0 %v4178_v40  ;;  %v12046_v26 = vld [vmem:[#allocation28_spill] sm:$0xff]  ;;  %v12047_v40 = vld [vmem:[#allocation18_spill] sm:$0xff] }
 0x14e   : > { %v1911_v44 = vpop.xlane.xlu1 %1910  ;;  %v1908_v54 = vpop.xlane.xlu0 %1907  ;;  %v5339_v21 = vsel %vm382_vm1, %v12046_v26, 0.0 }
 0x14f   : > { %v10206_v2 = vadd.f32 %v1911_v44, %v9920_v30  ;;  %v10209_v5 = vadd.f32 %v1908_v54, %v9923_v32  ;;  %v5336_v44 = vsel %vm382_vm1, %v12047_v40, 0.0 }
 0x151   : > { %3601 = vadd.xlane.f32.xlu1 %v3600_v33  ;;  %4758 = vadd.xlane.f32.xlu0 %v4757_v0  ;;  %v8118_v33 = vld [vmem:[%s8288_s10 + $0x60] sm:$0xff]  ;;  %v8119_v0 = vld [vmem:[%s8288_s10 + $0x52] sm:$0xff] }
 0x152   : > { %v1917_v16 = vpop.xlane.xlu1 %1916  ;;  %v1914_v34 = vpop.xlane.xlu0 %1913  ;;  %v4184_v56 = vsel %vm382_vm1, %v8118_v33, 0.0 }
 0x153   : > { %v10216_v45 = vadd.f32 %v1917_v16, %v9945_v49  ;;  %v10219_v30 = vadd.f32 %v1914_v34, %v9948_v62  ;;  %v3603_v16 = vsel %vm382_vm1, %v8119_v0, 0.0 }
 0x155   : > { %4761 = vadd.xlane.f32.xlu1 %v4760_v60  ;;  %4182 = vadd.xlane.f32.xlu0 %v4181_v39  ;;  %v12048_v60 = vld [vmem:[#allocation39_spill] sm:$0xff]  ;;  %v8120_v39 = vld [vmem:[%s8288_s10 + $0x51] sm:$0xff] }
 0x156   : > { %v1923_v32 = vpop.xlane.xlu1 %1922  ;;  %v1920_v59 = vpop.xlane.xlu0 %1919  ;;  %v5342_v9 = vsel %vm382_vm1, %v12048_v60, 0.0 }
 0x157   : > { %v10226_v54 = vadd.f32 %v1923_v32, %v9969_v8  ;;  %v10229_v49 = vadd.f32 %v1920_v59, %v9972_v38  ;;  %v4763_v32 = vsel %vm382_vm1, %v8120_v39, 0.0 }
 0x159   : > { %5340 = vadd.xlane.f32.xlu1 %v5339_v21  ;;  %5337 = vadd.xlane.f32.xlu0 %v5336_v44  ;;  %v8121_v21 = vld [vmem:[%s8288_s10 + $0x68] sm:$0xff] }
 0x15a   : > { %v1929_v62 = vpop.xlane.xlu1 %1928  ;;  %v1926_v48 = vpop.xlane.xlu0 %1925  ;;  %v4187_v40 = vsel %vm382_vm1, %v8121_v21, 0.0  ;;  %v8122_v44 = vld [vmem:[%s8288_s10 + $0x62] sm:$0xff] }
 0x15b   : > { %v10236_v34 = vadd.f32 %v1929_v62, %v9990_v25  ;;  %v10239_v8 = vadd.f32 %v1926_v48, %v9993_v1  ;;  %v3606_v62 = vsel %vm382_vm1, %v8122_v44, 0.0 }
 0x15d   : > { %4185 = vadd.xlane.f32.xlu1 %v4184_v56  ;;  %3604 = vadd.xlane.f32.xlu0 %v3603_v16  ;;  %v12049_v56 = vld [vmem:[#allocation26_spill] sm:$0xff] }
 0x15e   : > { %v1935_v38 = vpop.xlane.xlu1 %1934  ;;  %v1932_v22 = vpop.xlane.xlu0 %1931  ;;  %v5345_v0 = vsel %vm382_vm1, %v12049_v56, 0.0  ;;  %v8123_v16 = vld [vmem:[%s8288_s10 + $0x61] sm:$0xff] }
 0x15f   : > { %v10246_v59 = vadd.f32 %v1935_v38, %v10010_v41  ;;  %v10249_v25 = vadd.f32 %v1932_v22, %v10013_v4  ;;  %v4766_v38 = vsel %vm382_vm1, %v8123_v16, 0.0 }
 0x161   : > { %5343 = vadd.xlane.f32.xlu1 %v5342_v9  ;;  %4764 = vadd.xlane.f32.xlu0 %v4763_v32  ;;  %v8124_v9 = vld [vmem:[%s8288_s10 + $0x78] sm:$0xff]  ;;  %v8125_v32 = vld [vmem:[%s8288_s10 + $0x6a] sm:$0xff] }
 0x162   : > { %v2429_v1 = vpop.xlane.xlu1 %2428  ;;  %v2426_v26 = vpop.xlane.xlu0 %2425  ;;  %v4190_v39 = vsel %vm382_vm1, %v8124_v9, 0.0 }
 0x163   : > { %v10256_v48 = vadd.f32 %v2429_v1, %v10030_v7  ;;  %v10259_v41 = vadd.f32 %v2426_v26, %v10033_v29  ;;  %v3609_v1 = vsel %vm382_vm1, %v8125_v32, 0.0 }
 0x165   : > { %4188 = vadd.xlane.f32.xlu1 %v4187_v40  ;;  %3607 = vadd.xlane.f32.xlu0 %v3606_v62  ;;  %v12050_v40 = vld [vmem:[#allocation36_spill] sm:$0xff] }
 0x166   : > { %v2435_v4 = vpop.xlane.xlu1 %2434  ;;  %v2432_v33 = vpop.xlane.xlu0 %2431  ;;  %v5348_v44 = vsel %vm382_vm1, %v12050_v40, 0.0  ;;  %v8126_v62 = vld [vmem:[%s8288_s10 + $0x69] sm:$0xff] }
 0x167   : > { %v10266_v22 = vadd.f32 %v2435_v4, %v10052_v23  ;;  %v10269_v7 = vadd.f32 %v2432_v33, %v10054_v15  ;;  %v4769_v4 = vsel %vm382_vm1, %v8126_v62, 0.0 }
 0x169   : > { %5346 = vadd.xlane.f32.xlu1 %v5345_v0  ;;  %4767 = vadd.xlane.f32.xlu0 %v4766_v38  ;;  %v8127_v0 = vld [vmem:[%s8288_s10 + $0x80] sm:$0xff] }
 0x16a   : > { %v2441_v29 = vpop.xlane.xlu1 %2440  ;;  %v2438_v60 = vpop.xlane.xlu0 %2437  ;;  %v4193_v16 = vsel %vm382_vm1, %v8127_v0, 0.0  ;;  %v8128_v38 = vld [vmem:[%s8288_s10 + $0x7a] sm:$0xff] }
 0x16b   : > { %v10276_v26 = vadd.f32 %v2441_v29, %v10071_v43  ;;  %v10279_v23 = vadd.f32 %v2438_v60, %v10074_v31  ;;  %v3612_v29 = vsel %vm382_vm1, %v8128_v38, 0.0 }
 0x16d   : > { %4191 = vadd.xlane.f32.xlu1 %v4190_v39  ;;  %3610 = vadd.xlane.f32.xlu0 %v3609_v1  ;;  %v12051_v39 = vld [vmem:[#allocation34_spill] sm:$0xff] }
 0x16e   : > { %v2447_v15 = vpop.xlane.xlu1 %2446  ;;  %v2444_v21 = vpop.xlane.xlu0 %2443  ;;  %v5351_v32 = vsel %vm382_vm1, %v12051_v39, 0.0  ;;  %v8129_v1 = vld [vmem:[%s8288_s10 + $0x79] sm:$0xff] }
 0x16f   : > { %v10286_v33 = vadd.f32 %v2447_v15, %v10091_v18  ;;  %v10289_v43 = vadd.f32 %v2444_v21, %v10094_v52  ;;  %v4772_v15 = vsel %vm382_vm1, %v8129_v1, 0.0 }
 0x171   : > { %5349 = vadd.xlane.f32.xlu1 %v5348_v44  ;;  %4770 = vadd.xlane.f32.xlu0 %v4769_v4  ;;  %v8130_v44 = vld [vmem:[%s8288_s10 + $0x90] sm:$0xff]  ;;  %v8131_v4 = vld [vmem:[%s8288_s10 + $0x82] sm:$0xff] }
 0x172   : > { %v2453_v31 = vpop.xlane.xlu1 %2452  ;;  %v2450_v56 = vpop.xlane.xlu0 %2449  ;;  %v4196_v62 = vsel %vm382_vm1, %v8130_v44, 0.0 }
 0x173   : > { %v10296_v60 = vadd.f32 %v2453_v31, %v10113_v51  ;;  %v10299_v18 = vadd.f32 %v2450_v56, %v10116_v19  ;;  %v3615_v31 = vsel %vm382_vm1, %v8131_v4, 0.0 }
 0x175   : > { %4194 = vadd.xlane.f32.xlu1 %v4193_v16  ;;  %3613 = vadd.xlane.f32.xlu0 %v3612_v29  ;;  %v12052_v16 = vld [vmem:[#allocation43_spill] sm:$0xff] }
 0x176   : > { %v2459_v52 = vpop.xlane.xlu1 %2458  ;;  %v2456_v9 = vpop.xlane.xlu0 %2455  ;;  %v5354_v38 = vsel %vm382_vm1, %v12052_v16, 0.0  ;;  %v8132_v29 = vld [vmem:[%s8288_s10 + $0x81] sm:$0xff] }
 0x177   : > { %v10306_v21 = vadd.f32 %v2459_v52, %v10135_v57  ;;  %v10309_v51 = vadd.f32 %v2456_v9, %v10138_v6  ;;  %v4775_v52 = vsel %vm382_vm1, %v8132_v29, 0.0 }
 0x179   : > { %5352 = vadd.xlane.f32.xlu1 %v5351_v32  ;;  %4773 = vadd.xlane.f32.xlu0 %v4772_v15  ;;  %v8133_v32 = vld [vmem:[%s8288_s10 + $0x98] sm:$0xff] }
 0x17a   : > { %v2465_v19 = vpop.xlane.xlu1 %2464  ;;  %v2462_v40 = vpop.xlane.xlu0 %2461  ;;  %v4199_v1 = vsel %vm382_vm1, %v8133_v32, 0.0  ;;  %v8134_v15 = vld [vmem:[%s8288_s10 + $0x92] sm:$0xff] }
 0x17b   : > { %v10316_v56 = vadd.f32 %v2465_v19, %v10154_v27  ;;  %v10319_v57 = vadd.f32 %v2462_v40, %v10157_v37  ;;  %v3618_v19 = vsel %vm382_vm1, %v8134_v15, 0.0 }
 0x17d   : > { %4197 = vadd.xlane.f32.xlu1 %v4196_v62  ;;  %3616 = vadd.xlane.f32.xlu0 %v3615_v31  ;;  %v12053_v62 = vld [vmem:[#allocation41_spill] sm:$0xff] }
 0x17e   : > { %v2471_v6 = vpop.xlane.xlu1 %2470  ;;  %v2468_v0 = vpop.xlane.xlu0 %2467  ;;  %v5357_v4 = vsel %vm382_vm1, %v12053_v62, 0.0  ;;  %v8135_v31 = vld [vmem:[%s8288_s10 + $0x91] sm:$0xff] }
 0x17f   : > { %v10326_v9 = vadd.f32 %v2471_v6, %v10166_v11  ;;  %v10329_v27 = vadd.f32 %v2468_v0, %v10169_v28  ;;  %v4778_v6 = vsel %vm382_vm1, %v8135_v31, 0.0 }
 0x181   : > { %5355 = vadd.xlane.f32.xlu1 %v5354_v38  ;;  %4776 = vadd.xlane.f32.xlu0 %v4775_v52  ;;  %v8136_v38 = vld [vmem:[%s8288_s10 + $0xa8] sm:$0xff]  ;;  %v8137_v52 = vld [vmem:[%s8288_s10 + $0x9a] sm:$0xff] }
 0x182   : > { %v2477_v37 = vpop.xlane.xlu1 %2476  ;;  %v2474_v39 = vpop.xlane.xlu0 %2473  ;;  %v4202_v29 = vsel %vm382_vm1, %v8136_v38, 0.0 }
 0x183   : > { %v10336_v40 = vadd.f32 %v2477_v37, %v10176_v10  ;;  %v10339_v11 = vadd.f32 %v2474_v39, %v10179_v3  ;;  %v3621_v37 = vsel %vm382_vm1, %v8137_v52, 0.0 }
 0x185   : > { %4200 = vadd.xlane.f32.xlu1 %v4199_v1  ;;  %3619 = vadd.xlane.f32.xlu0 %v3618_v19  ;;  %v12054_v1 = vld [vmem:[#allocation4_spill] sm:$0xff]  ;;  %v8138_v19 = vld [vmem:[%s8288_s10 + $0x99] sm:$0xff] }
 0x186   : > { %v2483_v28 = vpop.xlane.xlu1 %2482  ;;  %v2480_v44 = vpop.xlane.xlu0 %2479  ;;  %v5360_v15 = vsel %vm382_vm1, %v12054_v1, 0.0 }
 0x187   : > { %v10346_v0 = vadd.f32 %v2483_v28, %v10186_v12  ;;  %v10349_v10 = vadd.f32 %v2480_v44, %v10189_v61  ;;  %v4781_v28 = vsel %vm382_vm1, %v8138_v19, 0.0 }
 0x189   : > { %5358 = vadd.xlane.f32.xlu1 %v5357_v4  ;;  %4779 = vadd.xlane.f32.xlu0 %v4778_v6  ;;  %v8139_v4 = vld [vmem:[%s8288_s10 + $0xb0] sm:$0xff] }
 0x18a   : > { %v2489_v3 = vpop.xlane.xlu1 %2488  ;;  %v2486_v16 = vpop.xlane.xlu0 %2485  ;;  %v4205_v31 = vsel %vm382_vm1, %v8139_v4, 0.0  ;;  %v8140_v6 = vld [vmem:[%s8288_s10 + $0xaa] sm:$0xff] }
 0x18b   : > { %v10356_v39 = vadd.f32 %v2489_v3, %v10196_v13  ;;  %v10359_v12 = vadd.f32 %v2486_v16, %v10199_v17  ;;  %v3624_v3 = vsel %vm382_vm1, %v8140_v6, 0.0 }
 0x18d   : > { %4203 = vadd.xlane.f32.xlu1 %v4202_v29  ;;  %3622 = vadd.xlane.f32.xlu0 %v3621_v37  ;;  %v12059_v29 = vld [vmem:[#allocation2_spill] sm:$0xff]  ;;  %v8141_v37 = vld [vmem:[%s8288_s10 + $0xa9] sm:$0xff] }
 0x18e   : > { %v2495_v61 = vpop.xlane.xlu1 %2494  ;;  %v2492_v32 = vpop.xlane.xlu0 %2491  ;;  %v5363_v52 = vsel %vm382_vm1, %v12059_v29, 0.0 }
 0x18f   : > { %v10366_v44 = vadd.f32 %v2495_v61, %v10206_v2  ;;  %v10369_v13 = vadd.f32 %v2492_v32, %v10209_v5  ;;  %v4784_v61 = vsel %vm382_vm1, %v8141_v37, 0.0 }
 0x191   : > { %12055 = vst [vmem:[#allocation3_spill] sm:$0xff] %v10366_v44  ;;  %12056 = vst [vmem:[#allocation15_spill] sm:$0xff] %v10369_v13  ;;  %5361 = vadd.xlane.f32.xlu1 %v5360_v15  ;;  %4782 = vadd.xlane.f32.xlu0 %v4781_v28  ;;  %v8142_v15 = vld [vmem:[%s8288_s10 + $0xc0] sm:$0xff]  ;;  %v8143_v28 = vld [vmem:[%s8288_s10 + $0xb2] sm:$0xff] }
 0x192   : > { %v2501_v17 = vpop.xlane.xlu1 %2500  ;;  %v2498_v62 = vpop.xlane.xlu0 %2497  ;;  %v4208_v19 = vsel %vm382_vm1, %v8142_v15, 0.0  ;;  %v8147_v15 = vld [vmem:[%s8288_s10 + $0xc1] sm:$0xff] }
 0x193   : > { %v10376_v16 = vadd.f32 %v2501_v17, %v10216_v45  ;;  %v10379_v2 = vadd.f32 %v2498_v62, %v10219_v30  ;;  %v3627_v17 = vsel %vm382_vm1, %v8143_v28, 0.0 }
 0x195   : > { %12057 = vst [vmem:[#allocation10_spill] sm:$0xff] %v10376_v16  ;;  %12058 = vst [vmem:[#allocation7_spill] sm:$0xff] %v10379_v2  ;;  %4206 = vadd.xlane.f32.xlu1 %v4205_v31  ;;  %3625 = vadd.xlane.f32.xlu0 %v3624_v3  ;;  %v12064_v31 = vld [vmem:[#allocation9_spill] sm:$0xff] }
 0x196   : > { %v2507_v5 = vpop.xlane.xlu1 %2506  ;;  %v2504_v38 = vpop.xlane.xlu0 %2503  ;;  %v5366_v6 = vsel %vm382_vm1, %v12064_v31, 0.0  ;;  %v8144_v3 = vld [vmem:[%s8288_s10 + $0xb1] sm:$0xff] }
 0x197   : > { %v10386_v32 = vadd.f32 %v2507_v5, %v10226_v54  ;;  %v10389_v45 = vadd.f32 %v2504_v38, %v10229_v49  ;;  %v4787_v5 = vsel %vm382_vm1, %v8144_v3, 0.0  ;;  %v8148_v31 = vld [vmem:[%s8288_s10 + $0xd8] sm:$0xff]  ;;  %v8149_v3 = vld [vmem:[%s8288_s10 + $0xca] sm:$0xff] }
 0x199   : > { %12060 = vst [vmem:[#allocation8_spill] sm:$0xff] %v10386_v32  ;;  %12061 = vst [vmem:[#allocation23_spill] sm:$0xff] %v10389_v45  ;;  %5364 = vadd.xlane.f32.xlu1 %v5363_v52  ;;  %4785 = vadd.xlane.f32.xlu0 %v4784_v61  ;;  %v8145_v52 = vld [vmem:[%s8288_s10 + $0xc8] sm:$0xff] }
 0x19a   : > { %v2513_v30 = vpop.xlane.xlu1 %2512  ;;  %v2510_v1 = vpop.xlane.xlu0 %2509  ;;  %v4211_v37 = vsel %vm382_vm1, %v8145_v52, 0.0  ;;  %v8146_v61 = vld [vmem:[%s8288_s10 + $0xc2] sm:$0xff] }
 0x19b   : > { %v10396_v62 = vadd.f32 %v2513_v30, %v10236_v34  ;;  %v10399_v54 = vadd.f32 %v2510_v1, %v10239_v8  ;;  %v3630_v30 = vsel %vm382_vm1, %v8146_v61, 0.0  ;;  %v8162_v45 = vld [vmem:[%s8288_s10 + $0x121] sm:$0xff] }
 0x19d   : > { %12062 = vst [vmem:[#allocation17_spill] sm:$0xff] %v10396_v62  ;;  %12063 = vst [vmem:[#allocation12_spill] sm:$0xff] %v10399_v54  ;;  %4209 = vadd.xlane.f32.xlu1 %v4208_v19  ;;  %3628 = vadd.xlane.f32.xlu0 %v3627_v17  ;;  %v4790_v19 = vsel %vm382_vm1, %v8147_v15, 0.0  ;;  %v8160_v54 = vld [vmem:[%s8288_s10 + $0x10a] sm:$0xff] }
 0x19e   : > { %v2519_v49 = vpop.xlane.xlu1 %2518  ;;  %v2516_v4 = vpop.xlane.xlu0 %2515  ;;  %v3648_v32 = vsel %vm382_vm1, %v8160_v54, 0.0 }
 0x19f   : > { %v10406_v38 = vadd.f32 %v2519_v49, %v10246_v59  ;;  %v10409_v34 = vadd.f32 %v2516_v4, %v10249_v25  ;;  %v5369_v25 = vsel %vm382_vm1, %v9884_v42, 0.0  ;;  %v3633_v42 = vsel %vm382_vm1, %v8149_v3, 0.0 }
 0x1a1   : > { %12065 = vst [vmem:[#allocation14_spill] sm:$0xff] %v10406_v38  ;;  %12066 = vst [vmem:[#allocation31_spill] sm:$0xff] %v10409_v34  ;;  %5367 = vadd.xlane.f32.xlu1 %v5366_v6  ;;  %4788 = vadd.xlane.f32.xlu0 %v4787_v5  ;;  %v4214_v6 = vsel %vm382_vm1, %v8148_v31, 0.0  ;;  %v8152_v31 = vld [vmem:[%s8288_s10 + $0xda] sm:$0xff] }
 0x1a2   : > { %v10411_v8 = vpop.xlane.xlu1 %3010  ;;  %v10413_v29 = vpop.xlane.xlu0 %3007  ;;  %v8158_v34 = vld [vmem:[%s8288_s10 + $0xfa] sm:$0xff] }
 0x1a5   : > { %4212 = vadd.xlane.f32.xlu1 %v4211_v37  ;;  %3631 = vadd.xlane.f32.xlu0 %v3630_v30  ;;  %v12067_v37 = vld [vmem:[#allocation5_spill] sm:$0xff]  ;;  %v8150_v30 = vld [vmem:[%s8288_s10 + $0xc9] sm:$0xff] }
 0x1a6   : > { %v3017_v59 = vpop.xlane.xlu1 %3016  ;;  %v3014_v1 = vpop.xlane.xlu0 %3013  ;;  %v5372_v61 = vsel %vm382_vm1, %v12067_v37, 0.0  ;;  %v5375_v37 = vsel %vm382_vm1, %v9910_v14, 0.0 }
 0x1a7   : > { %v10424_v28 = vadd.f32 %v3017_v59, %v10266_v22  ;;  %v10427_v17 = vadd.f32 %v3014_v1, %v10269_v7  ;;  %v4793_v59 = vsel %vm382_vm1, %v8150_v30, 0.0 }
 0x1a9   : > { %5370 = vadd.xlane.f32.xlu1 %v5369_v25  ;;  %4791 = vadd.xlane.f32.xlu0 %v4790_v19 }
 0x1aa   : > { %v3023_v49 = vpop.xlane.xlu1 %3022  ;;  %v3020_v4 = vpop.xlane.xlu0 %3019 }
 0x1ab   : > { %v10434_v5 = vadd.f32 %v3023_v49, %v10276_v26  ;;  %v10437_v22 = vadd.f32 %v3020_v4, %v10279_v23  ;;  %v8151_v49 = vld [vmem:[%s8288_s10 + $0xe0] sm:$0xff] }
 0x1ac   : > { %v4217_v4 = vsel %vm382_vm1, %v8151_v49, 0.0 }
 0x1ad   : > { %4215 = vadd.xlane.f32.xlu1 %v4214_v6  ;;  %3634 = vadd.xlane.f32.xlu0 %v3633_v42  ;;  %v3636_v6 = vsel %vm382_vm1, %v8152_v31, 0.0 }
 0x1ae   : > { %v3029_v7 = vpop.xlane.xlu1 %3028  ;;  %v3026_v52 = vpop.xlane.xlu0 %3025 }
 0x1af   : > { %v10444_v1 = vadd.f32 %v3029_v7, %v10286_v33  ;;  %v10447_v26 = vadd.f32 %v3026_v52, %v10289_v43  ;;  %v10449_v23 = vpop.f32.mrb[0].mxu1 }
 0x1b0   : > { %v10451_v25 = vpop.f32.mrb[1].mxu1 }
 0x1b1   : > { %5373 = vadd.xlane.f32.xlu1 %v5372_v61  ;;  %4794 = vadd.xlane.f32.xlu0 %v4793_v59 }
 0x1b2   : > { %v3035_v15 = vpop.xlane.xlu1 %3034  ;;  %v3032_v19 = vpop.xlane.xlu0 %3031 }
 0x1b3   : > { %v10458_v33 = vadd.f32 %v3035_v15, %v10296_v60  ;;  %v10461_v43 = vadd.f32 %v3032_v19, %v10299_v18  ;;  %v10463_v3 = vpop.f32.mrb[2].mxu1  ;;  %v8153_v19 = vld [vmem:[%s8288_s10 + $0xf0] sm:$0xff] }
 0x1b4   : > { %v10465_v42 = vpop.f32.mrb[3].mxu1  ;;  %v4220_v49 = vsel %vm382_vm1, %v8153_v19, 0.0 }
 0x1b5   : > { %4218 = vadd.xlane.f32.xlu1 %v4217_v4  ;;  %3637 = vadd.xlane.f32.xlu0 %v3636_v6  ;;  %v8154_v4 = vld [vmem:[%s8288_s10 + $0xe2] sm:$0xff] }
 0x1b6   : > { %v3041_v7 = vpop.xlane.xlu1 %3040  ;;  %v3038_v52 = vpop.xlane.xlu0 %3037  ;;  %v3639_v14 = vsel %vm382_vm1, %v8154_v4, 0.0 }
 0x1b7   : > { %v10470_v61 = vadd.f32 %v3041_v7, %v10306_v21  ;;  %v10473_v60 = vadd.f32 %v3038_v52, %v10309_v51  ;;  %v10475_v18 = vpop.f32.mrb[4].mxu1  ;;  %v5378_v52 = vsel %vm382_vm1, %v9915_v24, 0.0 }
 0x1b8   : > { %v10477_v30 = vpop.f32.mrb[5].mxu1 }
 0x1b9   : > { %5376 = vadd.xlane.f32.xlu1 %v5375_v37  ;;  %4797 = vadd.xlane.f32.xlu0 %v10110_v36 }
 0x1ba   : > { %v3047_v59 = vpop.xlane.xlu1 %3046  ;;  %v3044_v15 = vpop.xlane.xlu0 %3043 }
 0x1bb   : > { %v10485_v21 = vadd.f32 %v3047_v59, %v10316_v56  ;;  %v10488_v51 = vadd.f32 %v3044_v15, %v10319_v57  ;;  %v10490_v31 = vpop.f32.mrb[6].mxu1 }
 0x1bc   : > { %v10492_v6 = vpop.f32.mrb[7].mxu1 }
 0x1bd   : > { %4221 = vadd.xlane.f32.xlu1 %v4220_v49  ;;  %3640 = vadd.xlane.f32.xlu0 %v3639_v14  ;;  %v8155_v49 = vld [vmem:[%s8288_s10 + $0xf8] sm:$0xff] }
 0x1be   : > { %v3053_v36 = vpop.xlane.xlu1 %3052  ;;  %v3050_v7 = vpop.xlane.xlu0 %3049  ;;  %v4223_v4 = vsel %vm382_vm1, %v8155_v49, 0.0  ;;  %v8156_v14 = vld [vmem:[%s8288_s10 + $0xf2] sm:$0xff]  ;;  %v5381_v49 = vsel %vm382_vm1, %v9934_v55, 0.0  ;;  %v3645_v55 = vsel %vm382_vm1, %v8158_v34, 0.0 }
 0x1bf   : > { %v10497_v37 = vadd.f32 %v3053_v36, %v10326_v9  ;;  %v10500_v56 = vadd.f32 %v3050_v7, %v10329_v27  ;;  %v10502_v57 = vpop.f32.mrb[8].mxu1  ;;  %v3642_v24 = vsel %vm382_vm1, %v8156_v14, 0.0 }
 0x1c0   : > { %v10504_v59 = vpop.f32.mrb[9].mxu1 }
 0x1c1   : > { %5379 = vadd.xlane.f32.xlu1 %v5378_v52  ;;  %4800 = vadd.xlane.f32.xlu0 %v10106_v47 }
 0x1c2   : > { %v3059_v15 = vpop.xlane.xlu1 %3058  ;;  %v3056_v19 = vpop.xlane.xlu0 %3055 }
 0x1c3   : > { %v10512_v9 = vadd.f32 %v3059_v15, %v10336_v40  ;;  %v10515_v27 = vadd.f32 %v3056_v19, %v10339_v11  ;;  %v10517_v36 = vpop.f32.mrb[10].mxu1 }
 0x1c4   : > { %v10519_v7 = vpop.f32.mrb[11].mxu1 }
 0x1c5   : > { %4224 = vadd.xlane.f32.xlu1 %v4223_v4  ;;  %3643 = vadd.xlane.f32.xlu0 %v3642_v24  ;;  %v8157_v24 = vld [vmem:[%s8288_s10 + $0x108] sm:$0xff] }
 0x1c6   : > { %v3065_v47 = vpop.xlane.xlu1 %3064  ;;  %v3062_v52 = vpop.xlane.xlu0 %3061  ;;  %v4226_v38 = vsel %vm382_vm1, %v8157_v24, 0.0  ;;  %v5384_v24 = vsel %vm382_vm1, %v9938_v35, 0.0 }
 0x1c7   : > { %v10524_v14 = vadd.f32 %v3065_v47, %v10346_v0  ;;  %v10527_v40 = vadd.f32 %v3062_v52, %v10349_v10  ;;  %v10529_v11 = vpop.f32.mrb[12].mxu1 }
 0x1c8   : > { %v10531_v15 = vpop.f32.mrb[13].mxu1 }
 0x1c9   : > { %5382 = vadd.xlane.f32.xlu1 %v5381_v49  ;;  %4803 = vadd.xlane.f32.xlu0 %v10132_v20 }
 0x1ca   : > { %v3071_v19 = vpop.xlane.xlu1 %3070  ;;  %v3068_v4 = vpop.xlane.xlu0 %3067 }
 0x1cb   : > { %v10539_v0 = vadd.f32 %v3071_v19, %v10356_v39  ;;  %v10542_v10 = vadd.f32 %v3068_v4, %v10359_v12  ;;  %v10544_v47 = vpop.f32.mrb[14].mxu1 }
 0x1cc   : > { %v10546_v52 = vpop.f32.mrb[15].mxu1 }
 0x1cd   : > { %4227 = vadd.xlane.f32.xlu1 %v4226_v38  ;;  %3646 = vadd.xlane.f32.xlu0 %v3645_v55  ;;  %v8159_v38 = vld [vmem:[%s8288_s10 + $0x110] sm:$0xff] }
 0x1ce   : > { %v7704_v20 = vpop.f32.mrb[0].mxu0  ;;  %v3593_v49 = vpop.xlane.xlu1 %3592  ;;  %v4229_v55 = vsel %vm382_vm1, %v8159_v38, 0.0 }
 0x1cf   : > { %v10551_v34 = vadd.f32 %v7704_v20, %v10449_v23  ;;  %v3590_v39 = vpop.xlane.xlu0 %3589  ;;  %v5145_v19 = vpop.f32.mrb[1].mxu0 }
 0x1d0   : > { %v10554_v12 = vadd.f32 %v5145_v19, %v10451_v25  ;;  %v5387_v19 = vsel %vm382_vm1, %v9958_v50, 0.0  ;;  %v10584_v50 = vsel %vm382_vm1, %v8162_v45, 0.0 }
 0x1d1   : > { %5385 = vadd.xlane.f32.xlu1 %v5384_v24  ;;  %4806 = vadd.xlane.f32.xlu0 %v10128_v53 }
 0x1d2   : > { %v7707_v4 = vpop.f32.mrb[2].mxu0  ;;  %v4174_v62 = vpop.xlane.xlu1 %4173 }
 0x1d3   : > { %v10562_v35 = vadd.f32 %v7707_v4, %v10463_v3  ;;  %v10564_v23 = vpop.xlane.xlu0 %3595  ;;  %v5155_v20 = vpop.f32.mrb[3].mxu0 }
 0x1d4   : > { %v10567_v25 = vadd.f32 %v5155_v20, %v10465_v42 }
 0x1d5   : > { %4230 = vadd.xlane.f32.xlu1 %v4229_v55  ;;  %3649 = vadd.xlane.f32.xlu0 %v3648_v32  ;;  %v8161_v55 = vld [vmem:[%s8288_s10 + $0x112] sm:$0xff] }
 0x1d6   : > { %v7710_v53 = vpop.f32.mrb[4].mxu0  ;;  %v10569_v24 = vpop.xlane.xlu1 %3598  ;;  %v3651_v20 = vsel %vm382_vm1, %v8161_v55, 0.0  ;;  %v8163_v55 = vld [vmem:[%s8288_s10 + $0x120] sm:$0xff] }
 0x1d7   : > { %v10574_v54 = vadd.f32 %v7710_v53, %v10475_v18  ;;  %v4177_v3 = vpop.xlane.xlu0 %4176  ;;  %v5165_v4 = vpop.f32.mrb[5].mxu0  ;;  %v4232_v45 = vsel %vm382_vm1, %v8163_v55, 0.0 }
 0x1d8   : > { %v10577_v38 = vadd.f32 %v5165_v4, %v10477_v30 }
 0x1d9   : > { %5388 = vadd.xlane.f32.xlu1 %v5387_v19  ;;  %4809 = vadd.xlane.f32.xlu0 %v10151_v58 }
 0x1da   : > { %v7713_v42 = vpop.f32.mrb[6].mxu0  ;;  %v4756_v32 = vpop.xlane.xlu1 %4755 }
 0x1db   : > { %v10587_v18 = vadd.f32 %v7713_v42, %v10490_v31  ;;  %v10589_v53 = vpop.xlane.xlu0 %4179  ;;  %v5175_v30 = vpop.f32.mrb[7].mxu0  ;;  %v3103_v31 = vadd.f32 %v10411_v8, %v10256_v48  ;;  %v8164_v48 = vld [vmem:[%s8288_s10 + $0x129] sm:$0xff] }
 0x1dc   : > { %v10592_v19 = vadd.f32 %v5175_v30, %v10492_v6  ;;  %v3102_v6 = vadd.f32 %v10413_v29, %v10259_v41  ;;  %v10612_v8 = vsel %vm382_vm1, %v8164_v48, 0.0  ;;  %v3686_v48 = vadd.f32 %v10564_v23, %v10427_v17 }
 0x1dd   : > { %3652 = vadd.xlane.f32.xlu1 %v3651_v20  ;;  %3073 = vadd.xlane.f32.xlu0 %v10584_v50  ;;  %v3685_v30 = vadd.f32 %v3593_v49, %v3103_v31 }
 0x1de   : > { %v7716_v58 = vpop.f32.mrb[8].mxu0  ;;  %v10595_v4 = vpop.xlane.xlu1 %3601  ;;  %v3684_v55 = vadd.f32 %v3590_v39, %v3102_v6 }
 0x1df   : > { %v10602_v42 = vadd.f32 %v7716_v58, %v10502_v57  ;;  %v4759_v16 = vpop.xlane.xlu0 %4758  ;;  %v5185_v2 = vpop.f32.mrb[9].mxu0  ;;  %v5390_v57 = vsel %vm382_vm1, %v9962_v63, 0.0  ;;  %v4269_v41 = vadd.f32 %v4177_v3, %v3685_v30 }
 0x1e0   : > { %v10607_v20 = vadd.f32 %v5185_v2, %v10504_v59  ;;  %v4268_v59 = vadd.f32 %v4174_v62, %v3684_v55 }
 0x1e1   : > { %4812 = vadd.xlane.f32.xlu1 %v10147_v46  ;;  %4233 = vadd.xlane.f32.xlu0 %v4232_v45  ;;  %v4851_v39 = vadd.f32 %v4759_v16, %v4269_v41  ;;  %v8165_v45 = vld [vmem:[%s8288_s10 + $0x128] sm:$0xff]  ;;  %v11904_v41 = vmov 1.0  }
 0x1e2   : > { %v7719_v44 = vpop.f32.mrb[10].mxu0  ;;  %v4762_v13 = vpop.xlane.xlu1 %4761  ;;  %v4850_v58 = vadd.f32 %v4756_v32, %v4268_v59 }
 0x1e3   : > { %v10617_v2 = vadd.f32 %v7719_v44, %v10517_v36  ;;  %v10619_v29 = vpop.xlane.xlu0 %4182  ;;  %v5195_v46 = vpop.f32.mrb[11].mxu0  ;;  %v4235_v44 = vsel %vm382_vm1, %v8165_v45, 0.0  ;;  %v8166_v36 = vld [vmem:[%s8288_s10 + $0x122] sm:$0xff] }
 0x1e4   : > { %v10622_v49 = vadd.f32 %v5195_v46, %v10519_v7  ;;  %v3654_v31 = vsel %vm382_vm1, %v8166_v36, 0.0 }
 0x1e5   : > { %3076 = vadd.xlane.f32.xlu1 %v10612_v8  ;;  %5391 = vadd.xlane.f32.xlu0 %v5390_v57 }
 0x1e6   : > { %v7722_v63 = vpop.f32.mrb[12].mxu0  ;;  %v5341_v3 = vpop.xlane.xlu1 %5340 }
 0x1e7   : > { %v10631_v62 = vadd.f32 %v7722_v63, %v10529_v11  ;;  %v10633_v7 = vadd.f32 %v5341_v3, %v4851_v39  ;;  %v5338_v16 = vpop.xlane.xlu0 %5337  ;;  %v5205_v6 = vpop.f32.mrb[13].mxu0  ;;  %v8167_v11 = vld [vmem:[%s8288_s10 + $0x112] sm:$0xff]  ;;  %v4270_v3 = vadd.f32 %v10589_v53, %v3686_v48 }
 0x1e8   : > { %v10642_v32 = vadd.f32 %v5338_v16, %v4850_v58  ;;  %v10645_v30 = vadd.f32 %v5205_v6, %v10531_v15  ;;  %v5393_v55 = vsel %vm382_vm1, %v8167_v11, 0.0  ;;  %v8168_v16 = vld [vmem:[%s8288_s10 + $0x12a] sm:$0xff]  ;;  %v8169_v6 = vld [vmem:[%s8288_s10 + $0x139] sm:$0xff] }
 0x1e9   : > { %vm5465_vm2 = vcmp.eq.f32.partialorder %v10633_v7, 0.0  ;;  %4236 = vadd.xlane.f32.xlu1 %v4235_v44  ;;  %3655 = vadd.xlane.f32.xlu0 %v3654_v31  ;;  %v4852_v44 = vadd.f32 %v4762_v13, %v4270_v3  ;;  %v10685_v11 = vsel %vm382_vm1, %v8169_v6, 0.0  ;;  %v3687_v13 = vadd.f32 %v10569_v24, %v10424_v28 }
 0x1ea   : > { %v5497_v57 = vsel %vm5465_vm2, 1.0, %v10633_v7  ;;  %v5689_v15 = vsel %vm5465_vm2, 0.0, %v11904_v41  ;;  %vm5464_vm3 = vcmp.eq.f32.partialorder %v10642_v32, 0.0  ;;  %v7725_v46 = vpop.f32.mrb[14].mxu0  ;;  %v10659_v59 = vpop.xlane.xlu1 %4185 }
 0x1eb   : > { %8018 = vrcp.f32 %v5497_v57  ;;  %6166 = vst.msk [vmem:[%s10640_s7 + $0x8] sm:$0xff] %vm382_vm1, %v5689_v15  ;;  %v5496_v17 = vsel %vm5464_vm3, 1.0, %v10642_v32  ;;  %v5688_v23 = vsel %vm5464_vm3, 0.0, %v11904_v41  ;;  %v10670_v39 = vadd.f32 %v7725_v46, %v10544_v47  ;;  %v10672_v58 = vpop.xlane.xlu0 %3604  ;;  %v5215_v63 = vpop.f32.mrb[15].mxu0 }
 0x1ec   : > { %8020 = vrcp.f32 %v5496_v17  ;;  %6165 = vst.msk [vmem:[%s10640_s7] sm:$0xff] %vm382_vm1, %v5688_v23  ;;  %v10678_v45 = vadd.f32 %v5215_v63, %v10546_v52  ;;  %v3657_v47 = vsel %vm382_vm1, %v8168_v16, 0.0  ;;  %v8170_v23 = vld [vmem:[%s8288_s10 + $0x138] sm:$0xff]  ;;  %v4271_v24 = vadd.f32 %v10619_v29, %v3687_v13  ;;  %v8172_v13 = vld [vmem:[%s8288_s10 + $0x122] sm:$0xff] }
 0x1ed   : > { %5394 = vadd.xlane.f32.xlu1 %v5393_v55  ;;  %4815 = vadd.xlane.f32.xlu0 %v10584_v50  ;;  %v4238_v63 = vsel %vm382_vm1, %v8170_v23, 0.0 }
 0x1ee   : > { %v7528_v36 = vpop.f32.mrb[16].mxu1  ;;  %v7728_v31 = vpop.f32.mrb[16].mxu0 }
 0x1ef   : > { %v10687_v53 = vadd.f32 %v7728_v31, %v7528_v36  ;;  %v5344_v48 = vpop.xlane.xlu1 %5343  ;;  %v4765_v57 = vpop.xlane.xlu0 %4764 }
 0x1f0   : > { %v10689_v52 = vadd.f32 %v5344_v48, %v4852_v44  ;;  %v2895_v55 = vpop.f32.mrb[17].mxu1  ;;  %v5225_v15 = vpop.f32.mrb[17].mxu0 }
 0x1f1   : > { %v10691_v50 = vadd.f32 %v5225_v15, %v2895_v55  ;;  %3658 = vadd.xlane.f32.xlu1 %v3657_v47  ;;  %3079 = vadd.xlane.f32.xlu0 %v10685_v11 }
 0x1f2   : > { %vm5466_vm4 = vcmp.eq.f32.partialorder %v10689_v52, 0.0  ;;  %v7531_v46 = vpop.f32.mrb[18].mxu1  ;;  %v7731_v17 = vpop.f32.mrb[18].mxu0 }
 0x1f3   : > { %v5498_v3 = vsel %vm5466_vm4, 1.0, %v10689_v52  ;;  %v5690_v44 = vsel %vm5466_vm4, 0.0, %v11904_v41  ;;  %v10705_v36 = vadd.f32 %v7731_v17, %v7531_v46  ;;  %v10707_v31 = vpop.xlane.xlu1 %4188  ;;  %v10709_v28 = vpop.xlane.xlu0 %3607  ;;  %v4853_v46 = vadd.f32 %v4765_v57, %v4271_v24  ;;  %v8171_v41 = vld [vmem:[%s8288_s10 + $0x141] sm:$0xff] }
 0x1f4   : > { %8022 = vrcp.f32 %v5498_v3  ;;  %6167 = vst.msk [vmem:[%s10640_s7 + $0x10] sm:$0xff] %vm382_vm1, %v5690_v44  ;;  %v2905_v16 = vpop.f32.mrb[19].mxu1  ;;  %v5235_v47 = vpop.f32.mrb[19].mxu0  ;;  %v10720_v29 = vsel %vm382_vm1, %v8171_v41, 0.0  ;;  %v5396_v3 = vsel %vm382_vm1, %v8172_v13, 0.0  ;;  %v12071_v13 = vmov 1.0  }
 0x1f5   : > { %v8019_v6 = vpop.eup %8018  ;;  %v10714_v48 = vadd.f32 %v5235_v47, %v2905_v16  ;;  %4818 = vadd.xlane.f32.xlu1 %v10612_v8  ;;  %4239 = vadd.xlane.f32.xlu0 %v4238_v63 }
 0x1f6   : > { %v8021_v55 = vpop.eup %8020  ;;  %v5531_v15 = vmul.f32 %v8019_v6, %v10551_v34  ;;  %v7534_v17 = vpop.f32.mrb[20].mxu1 }
 0x1f7   : > { %v7734_v23 = vpop.f32.mrb[20].mxu0  ;;  %v5529_v44 = vmul.f32 %v8021_v55, %v10554_v12  ;;  %v5347_v8 = vpop.xlane.xlu1 %5346  ;;  %v3688_v12 = vadd.f32 %v10595_v4, %v10437_v22 }
 0x1f8   : > { %v10725_v16 = vadd.f32 %v7734_v23, %v7534_v17  ;;  %v4768_v63 = vpop.xlane.xlu0 %4767  ;;  %v10729_v34 = vsel %vm5465_vm2, 0.0, %v5531_v15  ;;  %v10731_v57 = vadd.f32 %v5347_v8, %v4853_v46  ;;  %v2915_v24 = vpop.f32.mrb[21].mxu1  ;;  %v8173_v15 = vld [vmem:[%s8288_s10 + $0x140] sm:$0xff] }
 0x1f9   : > { %12069 = vst [vmem:[#allocation19_spill] sm:$0xff] %v10729_v34  ;;  %v5245_v41 = vpop.f32.mrb[21].mxu0  ;;  %v10735_v47 = vsel %vm5464_vm3, 0.0, %v5529_v44  ;;  %3082 = vadd.xlane.f32.xlu1 %v10720_v29  ;;  %5397 = vadd.xlane.f32.xlu0 %v5396_v3  ;;  %v4241_v46 = vsel %vm382_vm1, %v8173_v15, 0.0  ;;  %v8174_v17 = vld [vmem:[%s8288_s10 + $0x13a] sm:$0xff]  ;;  %v4272_v8 = vadd.f32 %v10659_v59, %v3688_v12 }
 0x1fa   : > { %12068 = vst [vmem:[#allocation25_spill] sm:$0xff] %v10725_v16  ;;  %12070 = vst [vmem:[#allocation22_spill] sm:$0xff] %v10735_v47  ;;  %v10737_v6 = vadd.f32 %v5245_v41, %v2915_v24  ;;  %vm5467_vm5 = vcmp.eq.f32.partialorder %v10731_v57, 0.0  ;;  %v7537_v7 = vpop.f32.mrb[22].mxu1  ;;  %v7737_v55 = vpop.f32.mrb[22].mxu0  ;;  %v3660_v32 = vsel %vm382_vm1, %v8174_v17, 0.0 }
 0x1fb   : > { %v5499_v23 = vsel %vm5467_vm5, 1.0, %v10731_v57  ;;  %v5691_v3 = vsel %vm5467_vm5, 0.0, %v12071_v13  ;;  %v10753_v22 = vadd.f32 %v7737_v55, %v7537_v7  ;;  %v10755_v4 = vpop.xlane.xlu1 %4191  ;;  %v2925_v24 = vpop.f32.mrb[23].mxu1  ;;  %v4854_v47 = vadd.f32 %v4768_v63, %v4272_v8  ;;  %v8175_v55 = vld [vmem:[%s8288_s10 + $0x12a] sm:$0xff]  ;;  %v8176_v8 = vld [vmem:[%s8288_s10 + $0x142] sm:$0xff]  ;;  %v8180_v57 = vld [vmem:[%s8288_s10 + $0x13a] sm:$0xff] }
 0x1fc   : > { %v10757_v44 = vpop.xlane.xlu0 %3610  ;;  %8024 = vrcp.f32 %v5499_v23  ;;  %6168 = vst.msk [vmem:[%s10640_s7 + $0x18] sm:$0xff] %vm382_vm1, %v5691_v3  ;;  %v5255_v41 = vpop.f32.mrb[23].mxu0 }
 0x1fd   : > { %12072 = vst [vmem:[#allocation38_spill] sm:$0xff] %v10753_v22  ;;  %v10762_v15 = vadd.f32 %v5255_v41, %v2925_v24  ;;  %4242 = vadd.xlane.f32.xlu1 %v4241_v46  ;;  %3661 = vadd.xlane.f32.xlu0 %v3660_v32  ;;  %v5399_v22 = vsel %vm382_vm1, %v8175_v55, 0.0  ;;  %v3663_v41 = vsel %vm382_vm1, %v8176_v8, 0.0 }
 0x1fe   : > { %v8023_v17 = vpop.eup %8022  ;;  %v7540_v34 = vpop.f32.mrb[24].mxu1 }
 0x1ff   : > { %v7740_v7 = vpop.f32.mrb[24].mxu0  ;;  %v5533_v16 = vmul.f32 %v8023_v17, %v10567_v25  ;;  %v5350_v12 = vpop.xlane.xlu1 %5349  ;;  %v3689_v25 = vadd.f32 %v10672_v58, %v10434_v5  ;;  %v8177_v17 = vld [vmem:[%s8288_s10 + $0x151] sm:$0xff] }
 0x200   : > { %v10767_v59 = vadd.f32 %v7740_v7, %v7540_v34  ;;  %v4771_v23 = vpop.xlane.xlu0 %4770  ;;  %v10769_v3 = vadd.f32 %v5350_v12, %v4854_v47  ;;  %v2935_v24 = vpop.f32.mrb[25].mxu1  ;;  %v10785_v52 = vsel %vm382_vm1, %v8177_v17, 0.0  ;;  %v8178_v17 = vld [vmem:[%s8288_s10 + $0x150] sm:$0xff] }
 0x201   : > { %v5265_v46 = vpop.f32.mrb[25].mxu0  ;;  %v10773_v63 = vsel %vm5466_vm4, 0.0, %v5533_v16  ;;  %5400 = vadd.xlane.f32.xlu1 %v5399_v22  ;;  %4821 = vadd.xlane.f32.xlu0 %v10685_v11  ;;  %v4273_v7 = vadd.f32 %v10707_v31, %v3689_v25 }
 0x202   : > { %v10775_v32 = vadd.f32 %v5265_v46, %v2935_v24  ;;  %vm5468_vm6 = vcmp.eq.f32.partialorder %v10769_v3, 0.0  ;;  %v7543_v34 = vpop.f32.mrb[26].mxu1  ;;  %v7743_v47 = vpop.f32.mrb[26].mxu0 }
 0x203   : > { %v5500_v16 = vsel %vm5468_vm6, 1.0, %v10769_v3  ;;  %v5692_v11 = vsel %vm5468_vm6, 0.0, %v12071_v13  ;;  %v10793_v5 = vadd.f32 %v7743_v47, %v7543_v34  ;;  %v10795_v58 = vpop.xlane.xlu1 %4194  ;;  %v2945_v55 = vpop.f32.mrb[27].mxu1  ;;  %v4855_v8 = vadd.f32 %v4771_v23, %v4273_v7 }
 0x204   : > { %v10797_v22 = vpop.xlane.xlu0 %3613  ;;  %8026 = vrcp.f32 %v5500_v16  ;;  %6169 = vst.msk [vmem:[%s10640_s7 + $0x20] sm:$0xff] %vm382_vm1, %v5692_v11  ;;  %v5275_v12 = vpop.f32.mrb[27].mxu0 }
 0x205   : > { %12073 = vst [vmem:[#allocation33_spill] sm:$0xff] %v10793_v5  ;;  %v10802_v24 = vadd.f32 %v5275_v12, %v2945_v55  ;;  %3664 = vadd.xlane.f32.xlu1 %v3663_v41  ;;  %3085 = vadd.xlane.f32.xlu0 %v10785_v52  ;;  %v4244_v5 = vsel %vm382_vm1, %v8178_v17, 0.0  ;;  %v5402_v17 = vsel %vm382_vm1, %v8180_v57, 0.0 }
 0x206   : > { %v8025_v46 = vpop.eup %8024  ;;  %v7546_v34 = vpop.f32.mrb[28].mxu1 }
 0x207   : > { %v7746_v47 = vpop.f32.mrb[28].mxu0  ;;  %v5535_v31 = vmul.f32 %v8025_v46, %v10562_v35  ;;  %v5353_v16 = vpop.xlane.xlu1 %5352  ;;  %v3690_v35 = vadd.f32 %v10709_v28, %v10447_v26 }
 0x208   : > { %v10808_v25 = vadd.f32 %v7746_v47, %v7546_v34  ;;  %v4774_v11 = vpop.xlane.xlu0 %4773  ;;  %v10810_v55 = vadd.f32 %v5353_v16, %v4855_v8  ;;  %v2955_v41 = vpop.f32.mrb[29].mxu1  ;;  %v8179_v34 = vld [vmem:[%s8288_s10 + $0x159] sm:$0xff] }
 0x209   : > { %v5285_v12 = vpop.f32.mrb[29].mxu0  ;;  %v10814_v23 = vsel %vm5467_vm5, 0.0, %v5535_v31  ;;  %4824 = vadd.xlane.f32.xlu1 %v10720_v29  ;;  %4245 = vadd.xlane.f32.xlu0 %v4244_v5  ;;  %v10824_v47 = vsel %vm382_vm1, %v8179_v34, 0.0  ;;  %v4274_v16 = vadd.f32 %v10755_v4, %v3690_v35 }
 0x20a   : > { %12074 = vst [vmem:[#allocation27_spill] sm:$0xff] %v10808_v25  ;;  %v10816_v7 = vadd.f32 %v5285_v12, %v2955_v41  ;;  %vm5469_vm7 = vcmp.eq.f32.partialorder %v10810_v55, 0.0  ;;  %v7549_v46 = vpop.f32.mrb[30].mxu1  ;;  %v7749_v8 = vpop.f32.mrb[30].mxu0 }
 0x20b   : > { %v5501_v29 = vsel %vm5469_vm7, 1.0, %v10810_v55  ;;  %v5693_v26 = vsel %vm5469_vm7, 0.0, %v12071_v13  ;;  %v10834_v28 = vadd.f32 %v7749_v8, %v7549_v46  ;;  %v4198_v5 = vpop.xlane.xlu1 %4197  ;;  %v2965_v41 = vpop.f32.mrb[31].mxu1  ;;  %v4856_v25 = vadd.f32 %v4774_v11, %v4274_v16  ;;  %v8181_v46 = vld [vmem:[%s8288_s10 + $0x158] sm:$0xff] }
 0x20c   : > { %12075 = vst [vmem:[#allocation30_spill] sm:$0xff] %v10816_v7  ;;  %v10836_v31 = vpop.xlane.xlu0 %3616  ;;  %8028 = vrcp.f32 %v5501_v29  ;;  %6170 = vst.msk [vmem:[%s10640_s7 + $0x28] sm:$0xff] %vm382_vm1, %v5693_v26  ;;  %v5295_v12 = vpop.f32.mrb[31].mxu0  ;;  %v4247_v8 = vsel %vm382_vm1, %v8181_v46, 0.0  ;;  %v3691_v11 = vadd.f32 %v10757_v44, %v10444_v1  ;;  %v8185_v46 = vld [vmem:[%s8288_s10 + $0x169] sm:$0xff] }
 0x20d   : > { %12076 = vst [vmem:[#allocation40_spill] sm:$0xff] %v10834_v28  ;;  %v10841_v34 = vadd.f32 %v5295_v12, %v2965_v41  ;;  %3088 = vadd.xlane.f32.xlu1 %v10824_v47  ;;  %5403 = vadd.xlane.f32.xlu0 %v5402_v17  ;;  %v8182_v28 = vld [vmem:[%s8288_s10 + $0x152] sm:$0xff]  ;;  %v8183_v17 = vld [vmem:[%s8288_s10 + $0x142] sm:$0xff] }
 0x20e   : > { %v8027_v57 = vpop.eup %8026  ;;  %v3666_v7 = vsel %vm382_vm1, %v8182_v28, 0.0  ;;  %v5405_v28 = vsel %vm382_vm1, %v8183_v17, 0.0  ;;  %v4275_v12 = vadd.f32 %v10795_v58, %v3691_v11 }
 0x20f   : > { %v5537_v4 = vmul.f32 %v8027_v57, %v10577_v38  ;;  %v5356_v35 = vpop.xlane.xlu1 %5355 }
 0x210   : > { %v4777_v29 = vpop.xlane.xlu0 %4776  ;;  %v5438_v26 = vadd.f32 %v5356_v35, %v4856_v25 }
 0x211   : > { %v10851_v41 = vsel %vm5468_vm6, 0.0, %v5537_v4  ;;  %4248 = vadd.xlane.f32.xlu1 %v4247_v8  ;;  %3667 = vadd.xlane.f32.xlu0 %v3666_v7  ;;  %v4857_v44 = vadd.f32 %v4777_v29, %v4275_v12  ;;  %v8184_v7 = vld [vmem:[%s8288_s10 + $0x15a] sm:$0xff]  ;;  %v3090_v8 = vsel %vm382_vm1, %v8185_v46, 0.0  ;;  %v8186_v29 = vld [vmem:[%s8288_s10 + $0x168] sm:$0xff] }
 0x212   : > { %vm5470_vm8 = vcmp.eq.f32.partialorder %v5438_v26, 0.0  ;;  %v3669_v57 = vsel %vm382_vm1, %v8184_v7, 0.0  ;;  %v8188_v7 = vld [vmem:[%s8288_s10 + $0x152] sm:$0xff] }
 0x213   : > { %v5502_v38 = vsel %vm5470_vm8, 1.0, %v5438_v26  ;;  %v5694_v25 = vsel %vm5470_vm8, 0.0, %v12071_v13  ;;  %v4201_v16 = vpop.xlane.xlu1 %4200 }
 0x214   : > { %v10860_v3 = vpop.xlane.xlu0 %3619  ;;  %8030 = vrcp.f32 %v5502_v38  ;;  %6171 = vst.msk [vmem:[%s10640_s7 + $0x30] sm:$0xff] %vm382_vm1, %v5694_v25 }
 0x215   : > { %5406 = vadd.xlane.f32.xlu1 %v5405_v28  ;;  %4827 = vadd.xlane.f32.xlu0 %v10785_v52  ;;  %v3692_v52 = vadd.f32 %v10797_v22, %v10461_v43  ;;  %v4250_v28 = vsel %vm382_vm1, %v8186_v29, 0.0 }
 0x216   : > { %v8029_v1 = vpop.eup %8028 }
 0x217   : > { %v5539_v4 = vmul.f32 %v8029_v1, %v10574_v54  ;;  %v5359_v35 = vpop.xlane.xlu1 %5358  ;;  %v4276_v12 = vadd.f32 %v4198_v5, %v3692_v52  ;;  %v8187_v1 = vld [vmem:[%s8288_s10 + $0x171] sm:$0xff] }
 0x218   : > { %v4780_v58 = vpop.xlane.xlu0 %4779  ;;  %v5439_v11 = vadd.f32 %v5359_v35, %v4857_v44  ;;  %v3093_v44 = vsel %vm382_vm1, %v8187_v1, 0.0 }
 0x219   : > { %v10873_v17 = vsel %vm5469_vm7, 0.0, %v5539_v4  ;;  %3670 = vadd.xlane.f32.xlu1 %v3669_v57  ;;  %3091 = vadd.xlane.f32.xlu0 %v3090_v8  ;;  %v4858_v22 = vadd.f32 %v4780_v58, %v4276_v12  ;;  %v5408_v57 = vsel %vm382_vm1, %v8188_v7, 0.0  ;;  %v8189_v58 = vld [vmem:[%s8288_s10 + $0x170] sm:$0xff] }
 0x21a   : > { %vm5471_vm9 = vcmp.eq.f32.partialorder %v5439_v11, 0.0  ;;  %v4253_v29 = vsel %vm382_vm1, %v8189_v58, 0.0 }
 0x21b   : > { %v5503_v54 = vsel %vm5471_vm9, 1.0, %v5439_v11  ;;  %v5695_v38 = vsel %vm5471_vm9, 0.0, %v12071_v13  ;;  %v4204_v25 = vpop.xlane.xlu1 %4203 }
 0x21c   : > { %v10882_v55 = vpop.xlane.xlu0 %3622  ;;  %8032 = vrcp.f32 %v5503_v54  ;;  %6172 = vst.msk [vmem:[%s10640_s7 + $0x38] sm:$0xff] %vm382_vm1, %v5695_v38 }
 0x21d   : > { %4830 = vadd.xlane.f32.xlu1 %v10824_v47  ;;  %4251 = vadd.xlane.f32.xlu0 %v4250_v28  ;;  %v3693_v47 = vadd.f32 %v10836_v31, %v10458_v33  ;;  %v8190_v28 = vld [vmem:[%s8288_s10 + $0x16a] sm:$0xff] }
 0x21e   : > { %v8031_v43 = vpop.eup %8030 }
 0x21f   : > { %v5541_v46 = vmul.f32 %v8031_v43, %v10592_v19  ;;  %v5362_v4 = vpop.xlane.xlu1 %5361  ;;  %v3672_v19 = vsel %vm382_vm1, %v8190_v28, 0.0  ;;  %v4277_v43 = vadd.f32 %v4201_v16, %v3693_v47  ;;  %v3694_v47 = vadd.f32 %v10860_v3, %v10473_v60 }
 0x220   : > { %v4783_v5 = vpop.xlane.xlu0 %4782  ;;  %v5440_v35 = vadd.f32 %v5362_v4, %v4858_v22  ;;  %v8191_v22 = vld [vmem:[%s8288_s10 + $0x15a] sm:$0xff] }
 0x221   : > { %v10893_v52 = vsel %vm5470_vm8, 0.0, %v5541_v46  ;;  %3094 = vadd.xlane.f32.xlu1 %v3093_v44  ;;  %5409 = vadd.xlane.f32.xlu0 %v5408_v57  ;;  %v4859_v31 = vadd.f32 %v4783_v5, %v4277_v43  ;;  %v5411_v1 = vsel %vm382_vm1, %v8191_v22, 0.0  ;;  %v8192_v5 = vld [vmem:[%s8288_s10 + $0x172] sm:$0xff] }
 0x222   : > { %vm5472_vm10 = vcmp.eq.f32.partialorder %v5440_v35, 0.0  ;;  %v3675_v58 = vsel %vm382_vm1, %v8192_v5, 0.0 }
 0x223   : > { %v5504_v54 = vsel %vm5472_vm10, 1.0, %v5440_v35  ;;  %v5696_v26 = vsel %vm5472_vm10, 0.0, %v12071_v13  ;;  %v4207_v38 = vpop.xlane.xlu1 %4206 }
 0x224   : > { %v10904_v12 = vpop.xlane.xlu0 %3625  ;;  %8034 = vrcp.f32 %v5504_v54  ;;  %6173 = vst.msk [vmem:[%s10640_s7 + $0x40] sm:$0xff] %vm382_vm1, %v5696_v26  ;;  %v8194_v26 = vld [vmem:[%s8288_s10 + $0x180] sm:$0xff] }
 0x225   : > { %4254 = vadd.xlane.f32.xlu1 %v4253_v29  ;;  %3673 = vadd.xlane.f32.xlu0 %v3672_v19  ;;  %v8193_v29 = vld [vmem:[%s8288_s10 + $0x181] sm:$0xff]  ;;  %v4256_v43 = vsel %vm382_vm1, %v8194_v26, 0.0 }
 0x226   : > { %v8033_v33 = vpop.eup %8032 }
 0x227   : > { %v5543_v7 = vmul.f32 %v8033_v33, %v10587_v18  ;;  %v5365_v57 = vpop.xlane.xlu1 %5364  ;;  %v3096_v18 = vsel %vm382_vm1, %v8193_v29, 0.0 }
 0x228   : > { %v4786_v46 = vpop.xlane.xlu0 %4785  ;;  %v5441_v4 = vadd.f32 %v5365_v57, %v4859_v31  ;;  %v8195_v57 = vld [vmem:[%s8288_s10 + $0x189] sm:$0xff] }
 0x229   : > { %v10912_v16 = vsel %vm5471_vm9, 0.0, %v5543_v7  ;;  %5412 = vadd.xlane.f32.xlu1 %v5411_v1  ;;  %4833 = vadd.xlane.f32.xlu0 %v3090_v8  ;;  %v4278_v8 = vadd.f32 %v4204_v25, %v3694_v47  ;;  %v3695_v7 = vadd.f32 %v10882_v55, %v10470_v61  ;;  %v8196_v47 = vld [vmem:[%s8288_s10 + $0x16a] sm:$0xff] }
 0x22a   : > { %vm5473_vm11 = vcmp.eq.f32.partialorder %v5441_v4, 0.0 }
 0x22b   : > { %v5505_v28 = vsel %vm5473_vm11, 1.0, %v5441_v4  ;;  %v5697_v11 = vsel %vm5473_vm11, 0.0, %v12071_v13  ;;  %v4210_v19 = vpop.xlane.xlu1 %4209  ;;  %v4860_v3 = vadd.f32 %v4786_v46, %v4278_v8  ;;  %v3099_v46 = vsel %vm382_vm1, %v8195_v57, 0.0  ;;  %v8198_v8 = vld [vmem:[%s8288_s10 + $0x182] sm:$0xff] }
 0x22c   : > { %v10923_v54 = vpop.xlane.xlu0 %3628  ;;  %8036 = vrcp.f32 %v5505_v28  ;;  %6174 = vst.msk [vmem:[%s10640_s7 + $0x48] sm:$0xff] %vm382_vm1, %v5697_v11  ;;  %v4279_v29 = vadd.f32 %v4207_v38, %v3695_v7  ;;  %v8197_v28 = vld [vmem:[%s8288_s10 + $0x188] sm:$0xff] }
 0x22d   : > { %3676 = vadd.xlane.f32.xlu1 %v3675_v58  ;;  %3097 = vadd.xlane.f32.xlu0 %v3096_v18  ;;  %v4259_v11 = vsel %vm382_vm1, %v8197_v28, 0.0 }
 0x22e   : > { %v8035_v60 = vpop.eup %8034 }
 0x22f   : > { %v5545_v33 = vmul.f32 %v8035_v60, %v10607_v20  ;;  %v5368_v31 = vpop.xlane.xlu1 %5367  ;;  %v5414_v20 = vsel %vm382_vm1, %v8196_v47, 0.0  ;;  %v3678_v60 = vsel %vm382_vm1, %v8198_v8, 0.0 }
 0x230   : > { %v4789_v22 = vpop.xlane.xlu0 %4788  ;;  %v5442_v1 = vadd.f32 %v5368_v31, %v4860_v3  ;;  %v3696_v31 = vadd.f32 %v10904_v12, %v10488_v51 }
 0x231   : > { %v10931_v25 = vsel %vm5472_vm10, 0.0, %v5545_v33  ;;  %4836 = vadd.xlane.f32.xlu1 %v3093_v44  ;;  %4257 = vadd.xlane.f32.xlu0 %v4256_v43  ;;  %v4861_v55 = vadd.f32 %v4789_v22, %v4279_v29  ;;  %v8199_v22 = vld [vmem:[%s8288_s10 + $0x172] sm:$0xff]  ;;  %v8201_v29 = vld [vmem:[%s8288_s10 + $0x18a] sm:$0xff] }
 0x232   : > { %vm5474_vm12 = vcmp.eq.f32.partialorder %v5442_v1, 0.0  ;;  %v5417_v7 = vsel %vm382_vm1, %v8199_v22, 0.0  ;;  %v8203_v22 = vld [vmem:[%s8288_s10 + $0x199] sm:$0xff] }
 0x233   : > { %v5506_v5 = vsel %vm5474_vm12, 1.0, %v5442_v1  ;;  %v5698_v35 = vsel %vm5474_vm12, 0.0, %v12071_v13  ;;  %v4213_v58 = vpop.xlane.xlu1 %4212 }
 0x234   : > { %v10942_v44 = vpop.xlane.xlu0 %3631  ;;  %8038 = vrcp.f32 %v5506_v5  ;;  %6175 = vst.msk [vmem:[%s10640_s7 + $0x50] sm:$0xff] %vm382_vm1, %v5698_v35  ;;  %v8200_v5 = vld [vmem:[%s8288_s10 + $0x198] sm:$0xff] }
 0x235   : > { %3100 = vadd.xlane.f32.xlu1 %v3099_v46  ;;  %5415 = vadd.xlane.f32.xlu0 %v5414_v20  ;;  %v4280_v20 = vadd.f32 %v4210_v19, %v3696_v31  ;;  %v4262_v35 = vsel %vm382_vm1, %v8200_v5, 0.0 }
 0x236   : > { %v8037_v61 = vpop.eup %8036 }
 0x237   : > { %v5547_v3 = vmul.f32 %v8037_v61, %v10602_v42  ;;  %v5371_v26 = vpop.xlane.xlu1 %5370  ;;  %v3681_v61 = vsel %vm382_vm1, %v8201_v29, 0.0 }
 0x238   : > { %v4792_v43 = vpop.xlane.xlu0 %4791  ;;  %v5443_v38 = vadd.f32 %v5371_v26, %v4861_v55 }
 0x239   : > { %v10952_v33 = vsel %vm5473_vm11, 0.0, %v5547_v3  ;;  %4260 = vadd.xlane.f32.xlu1 %v4259_v11  ;;  %3679 = vadd.xlane.f32.xlu0 %v3678_v60  ;;  %v4862_v12 = vadd.f32 %v4792_v43, %v4280_v20  ;;  %v8202_v60 = vld [vmem:[%s8288_s10 + $0x182] sm:$0xff] }
 0x23a   : > { %vm5475_vm13 = vcmp.eq.f32.partialorder %v5443_v38, 0.0  ;;  %v5420_v3 = vsel %vm382_vm1, %v8202_v60, 0.0  ;;  %v8207_v60 = vld [vmem:[%s8288_s10 + $0x1a2] sm:$0xff] }
 0x23b   : > { %v5507_v42 = vsel %vm5475_vm13, 1.0, %v5443_v38  ;;  %v5699_v57 = vsel %vm5475_vm13, 0.0, %v12071_v13  ;;  %v4216_v47 = vpop.xlane.xlu1 %4215 }
 0x23c   : > { %v10961_v4 = vpop.xlane.xlu0 %3634  ;;  %8040 = vrcp.f32 %v5507_v42  ;;  %6176 = vst.msk [vmem:[%s10640_s7 + $0x58] sm:$0xff] %vm382_vm1, %v5699_v57  ;;  %v8204_v42 = vld [vmem:[%s8288_s10 + $0x1a0] sm:$0xff] }
 0x23d   : > { %5418 = vadd.xlane.f32.xlu1 %v5417_v7  ;;  %4839 = vadd.xlane.f32.xlu0 %v3096_v18  ;;  %v3697_v18 = vadd.f32 %v10923_v54, %v10485_v21  ;;  %v4844_v7 = vsel %vm382_vm1, %v8203_v22, 0.0  ;;  %v4265_v57 = vsel %vm382_vm1, %v8204_v42, 0.0 }
 0x23e   : > { %v8039_v51 = vpop.eup %8038 }
 0x23f   : > { %v5549_v55 = vmul.f32 %v8039_v51, %v10622_v49  ;;  %v5374_v28 = vpop.xlane.xlu1 %5373  ;;  %v4281_v31 = vadd.f32 %v4213_v58, %v3697_v18 }
 0x240   : > { %v4795_v11 = vpop.xlane.xlu0 %4794  ;;  %v5444_v19 = vadd.f32 %v5374_v28, %v4862_v12 }
 0x241   : > { %v10971_v8 = vsel %vm5474_vm12, 0.0, %v5549_v55  ;;  %4263 = vadd.xlane.f32.xlu1 %v4262_v35  ;;  %3682 = vadd.xlane.f32.xlu0 %v3681_v61  ;;  %v4863_v54 = vadd.f32 %v4795_v11, %v4281_v31  ;;  %v8205_v35 = vld [vmem:[%s8288_s10 + $0x1a1] sm:$0xff]  ;;  %v8206_v61 = vld [vmem:[%s8288_s10 + $0x18a] sm:$0xff] }
 0x242   : > { %vm5476_vm14 = vcmp.eq.f32.partialorder %v5444_v19, 0.0  ;;  %v4847_v29 = vsel %vm382_vm1, %v8205_v35, 0.0 }
 0x243   : > { %v5508_v49 = vsel %vm5476_vm14, 1.0, %v5444_v19  ;;  %v5700_v26 = vsel %vm5476_vm14, 0.0, %v12071_v13  ;;  %v4219_v43 = vpop.xlane.xlu1 %4218 }
 0x244   : > { %v10980_v1 = vpop.xlane.xlu0 %3637  ;;  %8042 = vrcp.f32 %v5508_v49  ;;  %6177 = vst.msk [vmem:[%s10640_s7 + $0x60] sm:$0xff] %vm382_vm1, %v5700_v26  ;;  %v8208_v49 = vld [vmem:[%s8288_s10 + $0x19a] sm:$0xff] }
 0x245   : > { %5421 = vadd.xlane.f32.xlu1 %v5420_v3  ;;  %4842 = vadd.xlane.f32.xlu0 %v3099_v46  ;;  %v3698_v46 = vadd.f32 %v10942_v44, %v10500_v56  ;;  %v5429_v3 = vsel %vm382_vm1, %v8207_v60, 0.0  ;;  %v5426_v26 = vsel %vm382_vm1, %v8208_v49, 0.0 }
 0x246   : > { %v8041_v21 = vpop.eup %8040 }
 0x247   : > { %v5551_v20 = vmul.f32 %v8041_v21, %v10617_v2  ;;  %v5377_v51 = vpop.xlane.xlu1 %5376  ;;  %v5423_v2 = vsel %vm382_vm1, %v8206_v61, 0.0  ;;  %v4282_v18 = vadd.f32 %v4216_v47, %v3698_v46  ;;  %v3700_v61 = vadd.f32 %v10980_v1, %v10515_v27 }
 0x248   : > { %v4798_v12 = vpop.xlane.xlu0 %4797  ;;  %v5445_v58 = vadd.f32 %v5377_v51, %v4863_v54 }
 0x249   : > { %v10990_v5 = vsel %vm5475_vm13, 0.0, %v5551_v20  ;;  %4845 = vadd.xlane.f32.xlu1 %v4844_v7  ;;  %4266 = vadd.xlane.f32.xlu0 %v4265_v57  ;;  %v4864_v44 = vadd.f32 %v4798_v12, %v4282_v18  ;;  %v3699_v7 = vadd.f32 %v10961_v4, %v10497_v37 }
 0x24a   : > { %vm5477_vm15 = vcmp.eq.f32.partialorder %v5445_v58, 0.0 }
 0x24b   : > { %v5509_v55 = vsel %vm5477_vm15, 1.0, %v5445_v58  ;;  %v5701_v38 = vsel %vm5477_vm15, 0.0, %v12071_v13  ;;  %v4222_v28 = vpop.xlane.xlu1 %4221 }
 0x24c   : > { %v3641_v11 = vpop.xlane.xlu0 %3640  ;;  %8044 = vrcp.f32 %v5509_v55  ;;  %6178 = vst.msk [vmem:[%s10640_s7 + $0x68] sm:$0xff] %vm382_vm1, %v5701_v38  ;;  %v4284_v18 = vadd.f32 %v4222_v28, %v3700_v61 }
 0x24d   : > { %4848 = vadd.xlane.f32.xlu1 %v4847_v29  ;;  %5424 = vadd.xlane.f32.xlu0 %v5423_v2 }
 0x24e   : > { %v8043_v56 = vpop.eup %8042 }
 0x24f   : > { %v5553_v31 = vmul.f32 %v8043_v56, %v10645_v30  ;;  %v5380_v21 = vpop.xlane.xlu1 %5379  ;;  %v4283_v30 = vadd.f32 %v4219_v43, %v3699_v7 }
 0x250   : > { %v4801_v54 = vpop.xlane.xlu0 %4800  ;;  %v5446_v22 = vadd.f32 %v5380_v21, %v4864_v44 }
 0x251   : > { %v11009_v47 = vsel %vm5476_vm14, 0.0, %v5553_v31  ;;  %5430 = vadd.xlane.f32.xlu1 %v5429_v3  ;;  %5427 = vadd.xlane.f32.xlu0 %v5426_v26  ;;  %v4865_v12 = vadd.f32 %v4801_v54, %v4283_v30  ;;  %v3701_v3 = vadd.f32 %v3641_v11, %v10512_v9 }
 0x252   : > { %vm5478_vm0 = vcmp.eq.f32.partialorder %v5446_v22, 0.0 }
 0x253   : > { %v5510_v42 = vsel %vm5478_vm0, 1.0, %v5446_v22  ;;  %v5702_v57 = vsel %vm5478_vm0, 0.0, %v12071_v13  ;;  %v4225_v20 = vpop.xlane.xlu1 %4224 }
 0x254   : > { %v3644_v51 = vpop.xlane.xlu0 %3643  ;;  %8046 = vrcp.f32 %v5510_v42  ;;  %6179 = vst.msk [vmem:[%s10640_s7 + $0x70] sm:$0xff] %vm382_vm1, %v5702_v57  ;;  %v4285_v21 = vadd.f32 %v4225_v20, %v3701_v3 }
 0x256   : > { %v8045_v19 = vpop.eup %8044 }
 0x257   : > { %v5555_v46 = vmul.f32 %v8045_v19, %v10631_v62  ;;  %v5383_v35 = vpop.xlane.xlu1 %5382 }
 0x258   : > { %v4804_v29 = vpop.xlane.xlu0 %4803  ;;  %v5447_v37 = vadd.f32 %v5383_v35, %v4865_v12 }
 0x259   : > { %v11020_v4 = vsel %vm5477_vm15, 0.0, %v5555_v46  ;;  %v4866_v58 = vadd.f32 %v4804_v29, %v4284_v18 }
 0x25a   : > { %vm5479_vm2 = vcmp.eq.f32.partialorder %v5447_v37, 0.0 }
 0x25b   : > { %v5511_v43 = vsel %vm5479_vm2, 1.0, %v5447_v37  ;;  %v5703_v2 = vsel %vm5479_vm2, 0.0, %v12071_v13  ;;  %v4228_v55 = vpop.xlane.xlu1 %4227 }
 0x25c   : > { %v3647_v38 = vpop.xlane.xlu0 %3646  ;;  %8048 = vrcp.f32 %v5511_v43  ;;  %6180 = vst.msk [vmem:[%s10640_s7 + $0x78] sm:$0xff] %vm382_vm1, %v5703_v2 }
 0x25e   : > { %v8047_v62 = vpop.eup %8046 }
 0x25f   : > { %v5557_v56 = vmul.f32 %v8047_v62, %v10678_v45  ;;  %v5386_v44 = vpop.xlane.xlu1 %5385 }
 0x260   : > { %v4807_v60 = vpop.xlane.xlu0 %4806  ;;  %v5448_v27 = vadd.f32 %v5386_v44, %v4866_v58 }
 0x261   : > { %v11031_v1 = vsel %vm5478_vm0, 0.0, %v5557_v56  ;;  %v4867_v54 = vadd.f32 %v4807_v60, %v4285_v21  ;;  %v3703_v56 = vadd.f32 %v3647_v38, %v10524_v14 }
 0x262   : > { %vm5480_vm3 = vcmp.eq.f32.partialorder %v5448_v27, 0.0 }
 0x263   : > { %v5512_v49 = vsel %vm5480_vm3, 1.0, %v5448_v27  ;;  %v5704_v28 = vsel %vm5480_vm3, 0.0, %v12071_v13  ;;  %v4231_v26 = vpop.xlane.xlu1 %4230 }
 0x264   : > { %v3650_v31 = vpop.xlane.xlu0 %3649  ;;  %8050 = vrcp.f32 %v5512_v49  ;;  %6181 = vst.msk [vmem:[%s10640_s7 + $0x80] sm:$0xff] %vm382_vm1, %v5704_v28  ;;  %v4287_v60 = vadd.f32 %v4231_v26, %v3703_v56 }
 0x266   : > { %v8049_v45 = vpop.eup %8048 }
 0x267   : > { %v5559_v22 = vmul.f32 %v8049_v45, %v10670_v39  ;;  %v5389_v7 = vpop.xlane.xlu1 %5388  ;;  %v3702_v39 = vadd.f32 %v3644_v51, %v10527_v40 }
 0x268   : > { %v4810_v42 = vpop.xlane.xlu0 %4809  ;;  %v5449_v9 = vadd.f32 %v5389_v7, %v4867_v54  ;;  %v3704_v54 = vadd.f32 %v3650_v31, %v10542_v10 }
 0x269   : > { %v11041_v11 = vsel %vm5479_vm2, 0.0, %v5559_v22  ;;  %v4286_v37 = vadd.f32 %v4228_v55, %v3702_v39 }
 0x26a   : > { %vm5481_vm4 = vcmp.eq.f32.partialorder %v5449_v9, 0.0 }
 0x26b   : > { %v5513_v57 = vsel %vm5481_vm4, 1.0, %v5449_v9  ;;  %v5705_v20 = vsel %vm5481_vm4, 0.0, %v12071_v13  ;;  %v3653_v30 = vpop.xlane.xlu1 %3652  ;;  %v4868_v43 = vadd.f32 %v4810_v42, %v4286_v37 }
 0x26c   : > { %v11046_v19 = vpop.xlane.xlu0 %3073  ;;  %8052 = vrcp.f32 %v5513_v57  ;;  %6182 = vst.msk [vmem:[%s10640_s7 + $0x88] sm:$0xff] %vm382_vm1, %v5705_v20  ;;  %v3705_v37 = vadd.f32 %v3653_v30, %v10539_v0 }
 0x26e   : > { %v8051_v12 = vpop.eup %8050 }
 0x26f   : > { %v5561_v46 = vmul.f32 %v8051_v12, %v10691_v50  ;;  %v4813_v35 = vpop.xlane.xlu1 %4812 }
 0x270   : > { %v4234_v29 = vpop.xlane.xlu0 %4233  ;;  %v4869_v3 = vadd.f32 %v4813_v35, %v4287_v60 }
 0x271   : > { %v11053_v61 = vsel %vm5480_vm3, 0.0, %v5561_v46  ;;  %v4288_v9 = vadd.f32 %v4234_v29, %v3704_v54 }
 0x273   : > { %v11055_v2 = vpop.xlane.xlu1 %3076 }
 0x274   : > { %v5392_v18 = vpop.xlane.xlu0 %5391 }
 0x275   : > { %v5450_v62 = vadd.f32 %v5392_v18, %v4868_v43 }
 0x276   : > { %v8053_v58 = vpop.eup %8052 }
 0x277   : > { %vm5482_vm5 = vcmp.eq.f32.partialorder %v5450_v62, 0.0  ;;  %v5563_v40 = vmul.f32 %v8053_v58, %v10687_v53  ;;  %v4237_v55 = vpop.xlane.xlu1 %4236 }
 0x278   : > { %v5514_v50 = vsel %vm5482_vm5, 1.0, %v5450_v62  ;;  %v5706_v51 = vsel %vm5482_vm5, 0.0, %v12071_v13  ;;  %v3656_v44 = vpop.xlane.xlu0 %3655  ;;  %v4289_v18 = vadd.f32 %v4237_v55, %v3705_v37  ;;  %v12077_v55 = vld [vmem:[#allocation15_spill] sm:$0xff] }
 0x279   : > { %8054 = vrcp.f32 %v5514_v50  ;;  %6183 = vst.msk [vmem:[%s10640_s7 + $0x90] sm:$0xff] %vm382_vm1, %v5706_v51  ;;  %v11065_v27 = vsel %vm5481_vm4, 0.0, %v5563_v40  ;;  %v3124_v60 = vadd.f32 %v11046_v19, %v12077_v55 }
 0x27b   : > { %v5395_v14 = vpop.xlane.xlu1 %5394 }
 0x27c   : > { %v4816_v38 = vpop.xlane.xlu0 %4815  ;;  %v5451_v49 = vadd.f32 %v5395_v14, %v4869_v3  ;;  %v3706_v14 = vadd.f32 %v3656_v44, %v3124_v60  ;;  %v12079_v44 = vld [vmem:[#allocation25_spill] sm:$0xff] }
 0x27d   : > { %v4870_v20 = vadd.f32 %v4816_v38, %v4288_v9  ;;  %v12078_v9 = vld [vmem:[#allocation3_spill] sm:$0xff] }
 0x27e   : > { %vm5483_vm6 = vcmp.eq.f32.partialorder %v5451_v49, 0.0  ;;  %v3125_v19 = vadd.f32 %v11055_v2, %v12078_v9 }
 0x27f   : > { %v5515_v53 = vsel %vm5483_vm6, 1.0, %v5451_v49  ;;  %v5707_v28 = vsel %vm5483_vm6, 0.0, %v12071_v13  ;;  %v3659_v21 = vpop.xlane.xlu1 %3658 }
 0x280   : > { %v11070_v45 = vpop.xlane.xlu0 %3079  ;;  %8056 = vrcp.f32 %v5515_v53  ;;  %6184 = vst.msk [vmem:[%s10640_s7 + $0x98] sm:$0xff] %vm382_vm1, %v5707_v28 }
 0x283   : > { %v8055_v26 = vpop.eup %8054  ;;  %v4819_v7 = vpop.xlane.xlu1 %4818 }
 0x284   : > { %v5565_v22 = vmul.f32 %v8055_v26, %v10714_v48  ;;  %v4240_v42 = vpop.xlane.xlu0 %4239  ;;  %v4871_v58 = vadd.f32 %v4819_v7, %v4289_v18 }
 0x285   : > { %v4290_v28 = vadd.f32 %v4240_v42, %v3706_v14 }
 0x286   : > { %v11077_v57 = vsel %vm5482_vm5, 0.0, %v5565_v22 }
 0x287   : > { %v11079_v12 = vpop.xlane.xlu1 %3082 }
 0x288   : > { %v5398_v39 = vpop.xlane.xlu0 %5397 }
 0x289   : > { %v5452_v46 = vadd.f32 %v5398_v39, %v4870_v20 }
 0x28a   : > { %v8057_v35 = vpop.eup %8056 }
 0x28b   : > { %vm5484_vm7 = vcmp.eq.f32.partialorder %v5452_v46, 0.0  ;;  %v5567_v10 = vmul.f32 %v8057_v35, %v10705_v36  ;;  %v4243_v29 = vpop.xlane.xlu1 %4242  ;;  %v3707_v35 = vadd.f32 %v3659_v21, %v3125_v19 }
 0x28c   : > { %v5516_v48 = vsel %vm5484_vm7, 1.0, %v5452_v46  ;;  %v5708_v31 = vsel %vm5484_vm7, 0.0, %v12071_v13  ;;  %v3662_v43 = vpop.xlane.xlu0 %3661 }
 0x28d   : > { %8058 = vrcp.f32 %v5516_v48  ;;  %6185 = vst.msk [vmem:[%s10640_s7 + $0xa0] sm:$0xff] %vm382_vm1, %v5708_v31  ;;  %v11089_v62 = vsel %vm5483_vm6, 0.0, %v5567_v10  ;;  %v4291_v48 = vadd.f32 %v4243_v29, %v3707_v35 }
 0x28f   : > { %v5401_v0 = vpop.xlane.xlu1 %5400 }
 0x290   : > { %v4822_v30 = vpop.xlane.xlu0 %4821  ;;  %v5453_v56 = vadd.f32 %v5401_v0, %v4871_v58 }
 0x291   : > { %v4872_v54 = vadd.f32 %v4822_v30, %v4290_v28 }
 0x292   : > { %vm5485_vm8 = vcmp.eq.f32.partialorder %v5453_v56, 0.0 }
 0x293   : > { %v5517_v36 = vsel %vm5485_vm8, 1.0, %v5453_v56  ;;  %v5709_v40 = vsel %vm5485_vm8, 0.0, %v12071_v13  ;;  %v11094_v50 = vpop.xlane.xlu1 %3664  ;;  %v12081_v56 = vld [vmem:[#allocation22_spill] sm:$0xff] }
 0x294   : > { %v11096_v51 = vpop.xlane.xlu0 %3085  ;;  %8060 = vrcp.f32 %v5517_v36  ;;  %6186 = vst.msk [vmem:[%s10640_s7 + $0xa8] sm:$0xff] %vm382_vm1, %v5709_v40  ;;  %v12080_v40 = vld [vmem:[#allocation19_spill] sm:$0xff]  ;;  %v5720_v60 = vsel %vm382_vm1, %v12081_v56, 0.0 }
 0x295   : > { %v5721_v55 = vsel %vm382_vm1, %v12080_v40, 0.0 }
 0x297   : > { %v8059_v3 = vpop.eup %8058  ;;  %v4825_v49 = vpop.xlane.xlu1 %4824 }
 0x298   : > { %v5569_v38 = vmul.f32 %v8059_v3, %v10737_v6  ;;  %v4246_v53 = vpop.xlane.xlu0 %4245  ;;  %v4873_v21 = vadd.f32 %v4825_v49, %v4291_v48  ;;  %v12082_v3 = vld [vmem:[#allocation7_spill] sm:$0xff]  ;;  %v5723_v49 = vsel %vm382_vm1, %v10773_v63, 0.0 }
 0x299   : > { %v3126_v14 = vadd.f32 %v11070_v45, %v12082_v3 }
 0x29a   : > { %v11104_v26 = vsel %vm5484_vm7, 0.0, %v5569_v38 }
 0x29b   : > { %v11106_v22 = vpop.xlane.xlu1 %3088  ;;  %v3708_v28 = vadd.f32 %v3662_v43, %v3126_v14 }
 0x29c   : > { %v5404_v7 = vpop.xlane.xlu0 %5403 }
 0x29d   : > { %v5454_v20 = vadd.f32 %v5404_v7, %v4872_v54  ;;  %v5722_v54 = vadd.f32 %v5721_v55, %v5720_v60  ;;  %v4292_v35 = vadd.f32 %v4246_v53, %v3708_v28  ;;  %v12084_v60 = vld [vmem:[#allocation38_spill] sm:$0xff]  ;;  %v5733_v28 = vsel %vm382_vm1, %v10912_v16, 0.0 }
 0x29e   : > { %v8061_v39 = vpop.eup %8060 }
 0x29f   : > { %vm5486_vm9 = vcmp.eq.f32.partialorder %v5454_v20, 0.0  ;;  %v5571_v6 = vmul.f32 %v8061_v39, %v12079_v44  ;;  %v4249_v46 = vpop.xlane.xlu1 %4248  ;;  %v5725_v39 = vsel %vm382_vm1, %v10814_v23, 0.0  ;;  %v5724_v44 = vadd.f32 %v5723_v49, %v5722_v54 }
 0x2a0   : > { %v5518_v37 = vsel %vm5486_vm9, 1.0, %v5454_v20  ;;  %v5710_v42 = vsel %vm5486_vm9, 0.0, %v12071_v13  ;;  %v11114_v10 = vpop.xlane.xlu0 %3667 }
 0x2a1   : > { %8062 = vrcp.f32 %v5518_v37  ;;  %6187 = vst.msk [vmem:[%s10640_s7 + $0xb0] sm:$0xff] %vm382_vm1, %v5710_v42  ;;  %v11119_v2 = vsel %vm5485_vm8, 0.0, %v5571_v6  ;;  %v5727_v6 = vsel %vm382_vm1, %v10851_v41, 0.0  ;;  %v5726_v42 = vadd.f32 %v5725_v39, %v5724_v44 }
 0x2a2   : > { %v5735_v39 = vsel %vm382_vm1, %v10931_v25, 0.0 }
 0x2a3   : > { %v5407_v31 = vpop.xlane.xlu1 %5406 }
 0x2a4   : > { %v4828_v18 = vpop.xlane.xlu0 %4827  ;;  %v5455_v58 = vadd.f32 %v5407_v31, %v4873_v21  ;;  %v12083_v21 = vld [vmem:[#allocation10_spill] sm:$0xff] }
 0x2a5   : > { %v4874_v37 = vadd.f32 %v4828_v18, %v4292_v35  ;;  %v3127_v31 = vadd.f32 %v11079_v12, %v12083_v21 }
 0x2a6   : > { %vm5487_vm10 = vcmp.eq.f32.partialorder %v5455_v58, 0.0 }
 0x2a7   : > { %v5519_v0 = vsel %vm5487_vm10, 1.0, %v5455_v58  ;;  %v5711_v30 = vsel %vm5487_vm10, 0.0, %v12071_v13  ;;  %v11124_v36 = vpop.xlane.xlu1 %3670  ;;  %v3709_v55 = vadd.f32 %v11094_v50, %v3127_v31 }
 0x2a8   : > { %v11126_v29 = vpop.xlane.xlu0 %3091  ;;  %8064 = vrcp.f32 %v5519_v0  ;;  %6188 = vst.msk [vmem:[%s10640_s7 + $0xb8] sm:$0xff] %vm382_vm1, %v5711_v30  ;;  %v5728_v0 = vadd.f32 %v5727_v6, %v5726_v42  ;;  %v5731_v30 = vsel %vm382_vm1, %v10893_v52, 0.0  ;;  %v5737_v42 = vsel %vm382_vm1, %v10952_v33, 0.0 }
 0x2a9   : > { %v4293_v54 = vadd.f32 %v4249_v46, %v3709_v55 }
 0x2ab   : > { %v8063_v38 = vpop.eup %8062  ;;  %v4831_v9 = vpop.xlane.xlu1 %4830 }
 0x2ac   : > { %v5573_v7 = vmul.f32 %v8063_v38, %v10762_v15  ;;  %v4252_v19 = vpop.xlane.xlu0 %4251  ;;  %v5729_v15 = vsel %vm382_vm1, %v10873_v17, 0.0  ;;  %v4875_v35 = vadd.f32 %v4831_v9, %v4293_v54 }
 0x2ad   : > { %v5730_v18 = vadd.f32 %v5729_v15, %v5728_v0  ;;  %v5739_v15 = vsel %vm382_vm1, %v10971_v8, 0.0 }
 0x2ae   : > { %v11142_v45 = vsel %vm5486_vm9, 0.0, %v5573_v7 }
 0x2af   : > { %v11146_v48 = vpop.xlane.xlu1 %3094  ;;  %v5732_v50 = vadd.f32 %v5731_v30, %v5730_v18  ;;  %v12085_v30 = vld [vmem:[#allocation23_spill] sm:$0xff] }
 0x2b0   : > { %v5410_v43 = vpop.xlane.xlu0 %5409  ;;  %v3128_v55 = vadd.f32 %v11096_v51, %v12085_v30 }
 0x2b1   : > { %v5456_v53 = vadd.f32 %v5410_v43, %v4874_v37  ;;  %v5734_v44 = vadd.f32 %v5733_v28, %v5732_v50 }
 0x2b2   : > { %v8065_v20 = vpop.eup %8064 }
 0x2b3   : > { %vm5488_vm11 = vcmp.eq.f32.partialorder %v5456_v53, 0.0  ;;  %v5575_v3 = vmul.f32 %v8065_v20, %v12084_v60  ;;  %v4255_v49 = vpop.xlane.xlu1 %4254  ;;  %v5736_v46 = vadd.f32 %v5735_v39, %v5734_v44  ;;  %v5741_v20 = vsel %vm382_vm1, %v10990_v5, 0.0 }
 0x2b4   : > { %v5520_v14 = vsel %vm5488_vm11, 1.0, %v5456_v53  ;;  %v5712_v38 = vsel %vm5488_vm11, 0.0, %v12071_v13  ;;  %v11159_v12 = vpop.xlane.xlu0 %3673  ;;  %v5745_v39 = vsel %vm382_vm1, %v11020_v4, 0.0 }
 0x2b5   : > { %8066 = vrcp.f32 %v5520_v14  ;;  %6189 = vst.msk [vmem:[%s10640_s7 + $0xc0] sm:$0xff] %vm382_vm1, %v5712_v38  ;;  %v11166_v7 = vsel %vm5487_vm10, 0.0, %v5575_v3  ;;  %v5738_v58 = vadd.f32 %v5737_v42, %v5736_v46  ;;  %v5743_v3 = vsel %vm382_vm1, %v11009_v47, 0.0 }
 0x2b6   : > { %v3710_v14 = vadd.f32 %v11114_v10, %v3128_v55 }
 0x2b7   : > { %v5413_v6 = vpop.xlane.xlu1 %5412  ;;  %v5740_v18 = vadd.f32 %v5739_v15, %v5738_v58  ;;  %v12086_v58 = vld [vmem:[#allocation8_spill] sm:$0xff] }
 0x2b8   : > { %v4834_v37 = vpop.xlane.xlu0 %4833  ;;  %v5457_v43 = vadd.f32 %v5413_v6, %v4875_v35  ;;  %v4294_v35 = vadd.f32 %v4252_v19, %v3710_v14  ;;  %v5747_v6 = vsel %vm382_vm1, %v11031_v1, 0.0  ;;  %v5753_v14 = vsel %vm382_vm1, %v11065_v27, 0.0 }
 0x2b9   : > { %v5742_v38 = vadd.f32 %v5741_v20, %v5740_v18  ;;  %v5751_v20 = vsel %vm382_vm1, %v11053_v61, 0.0 }
 0x2ba   : > { %vm5489_vm12 = vcmp.eq.f32.partialorder %v5457_v43, 0.0  ;;  %v4876_v42 = vadd.f32 %v4834_v37, %v4294_v35 }
 0x2bb   : > { %v5521_v21 = vsel %vm5489_vm12, 1.0, %v5457_v43  ;;  %v5713_v31 = vsel %vm5489_vm12, 0.0, %v12071_v13  ;;  %v11177_v9 = vpop.xlane.xlu1 %3676  ;;  %v5744_v51 = vadd.f32 %v5743_v3, %v5742_v38  ;;  %v5759_v43 = vsel %vm382_vm1, %v11104_v26, 0.0 }
 0x2bc   : > { %v11179_v0 = vpop.xlane.xlu0 %3097  ;;  %8068 = vrcp.f32 %v5521_v21  ;;  %6190 = vst.msk [vmem:[%s10640_s7 + $0xc8] sm:$0xff] %vm382_vm1, %v5713_v31  ;;  %v3129_v21 = vadd.f32 %v11106_v22, %v12086_v58 }
 0x2bd   : > { %v5746_v46 = vadd.f32 %v5745_v39, %v5744_v51 }
 0x2be   : > { %v3711_v30 = vadd.f32 %v11124_v36, %v3129_v21 }
 0x2bf   : > { %v8067_v60 = vpop.eup %8066  ;;  %v4837_v54 = vpop.xlane.xlu1 %4836  ;;  %v5748_v31 = vadd.f32 %v5747_v6, %v5746_v46  ;;  %v12087_v46 = vld [vmem:[#allocation12_spill] sm:$0xff] }
 0x2c0   : > { %v5577_v28 = vmul.f32 %v8067_v60, %v10775_v32  ;;  %v4258_v50 = vpop.xlane.xlu0 %4257  ;;  %v5749_v32 = vsel %vm382_vm1, %v11041_v11, 0.0  ;;  %v4295_v38 = vadd.f32 %v4255_v49, %v3711_v30  ;;  %v3130_v49 = vadd.f32 %v11126_v29, %v12087_v46 }
 0x2c1   : > { %v5750_v37 = vadd.f32 %v5749_v32, %v5748_v31  ;;  %v5761_v30 = vsel %vm382_vm1, %v11119_v2, 0.0 }
 0x2c2   : > { %v11194_v44 = vsel %vm5488_vm11, 0.0, %v5577_v28  ;;  %v4877_v39 = vadd.f32 %v4837_v54, %v4295_v38  ;;  %v3712_v58 = vadd.f32 %v11159_v12, %v3130_v49  ;;  %v5763_v12 = vsel %vm382_vm1, %v11142_v45, 0.0  ;;  %v12089_v49 = vld [vmem:[#allocation31_spill] sm:$0xff] }
 0x2c3   : > { %v11198_v15 = vpop.xlane.xlu1 %3100  ;;  %v5752_v28 = vadd.f32 %v5751_v20, %v5750_v37 }
 0x2c4   : > { %v5416_v10 = vpop.xlane.xlu0 %5415  ;;  %v4296_v29 = vadd.f32 %v4258_v50, %v3712_v58 }
 0x2c5   : > { %v5458_v19 = vadd.f32 %v5416_v10, %v4876_v42  ;;  %v5754_v35 = vadd.f32 %v5753_v14, %v5752_v28  ;;  %v5757_v42 = vsel %vm382_vm1, %v11089_v62, 0.0 }
 0x2c6   : > { %v8069_v53 = vpop.eup %8068 }
 0x2c7   : > { %vm5490_vm13 = vcmp.eq.f32.partialorder %v5458_v19, 0.0  ;;  %v5579_v55 = vmul.f32 %v8069_v53, %v10767_v59  ;;  %v4261_v3 = vpop.xlane.xlu1 %4260  ;;  %v5755_v59 = vsel %vm382_vm1, %v11077_v57, 0.0 }
 0x2c8   : > { %v5522_v18 = vsel %vm5490_vm13, 1.0, %v5458_v19  ;;  %v5714_v60 = vsel %vm5490_vm13, 0.0, %v12071_v13  ;;  %v3680_v22 = vpop.xlane.xlu0 %3679  ;;  %v5756_v32 = vadd.f32 %v5755_v59, %v5754_v35  ;;  %v5765_v59 = vsel %vm382_vm1, %v11166_v7, 0.0 }
 0x2c9   : > { %8070 = vrcp.f32 %v5522_v18  ;;  %6191 = vst.msk [vmem:[%s10640_s7 + $0xd0] sm:$0xff] %vm382_vm1, %v5714_v60  ;;  %v11216_v36 = vsel %vm5489_vm12, 0.0, %v5579_v55 }
 0x2ca   : > { %v5758_v21 = vadd.f32 %v5757_v42, %v5756_v32  ;;  %v3132_v32 = vadd.f32 %v11179_v0, %v12089_v49  ;;  %v5769_v19 = vsel %vm382_vm1, %v11216_v36, 0.0 }
 0x2cb   : > { %v5419_v51 = vpop.xlane.xlu1 %5418 }
 0x2cc   : > { %v4840_v6 = vpop.xlane.xlu0 %4839  ;;  %v5459_v10 = vadd.f32 %v5419_v51, %v4877_v39  ;;  %v5760_v37 = vadd.f32 %v5759_v43, %v5758_v21  ;;  %v12088_v39 = vld [vmem:[#allocation17_spill] sm:$0xff] }
 0x2cd   : > { %v4878_v18 = vadd.f32 %v4840_v6, %v4296_v29  ;;  %v3131_v50 = vadd.f32 %v11146_v48, %v12088_v39  ;;  %v5767_v6 = vsel %vm382_vm1, %v11194_v44, 0.0 }
 0x2ce   : > { %vm5491_vm14 = vcmp.eq.f32.partialorder %v5459_v10, 0.0  ;;  %v5762_v60 = vadd.f32 %v5761_v30, %v5760_v37  ;;  %v3714_v37 = vadd.f32 %v3680_v22, %v3132_v32 }
 0x2cf   : > { %v5523_v54 = vsel %vm5491_vm14, 1.0, %v5459_v10  ;;  %v5715_v31 = vsel %vm5491_vm14, 0.0, %v12071_v13  ;;  %v4264_v53 = vpop.xlane.xlu1 %4263  ;;  %v3713_v46 = vadd.f32 %v11177_v9, %v3131_v50 }
 0x2d0   : > { %v3683_v20 = vpop.xlane.xlu0 %3682  ;;  %8072 = vrcp.f32 %v5523_v54  ;;  %6192 = vst.msk [vmem:[%s10640_s7 + $0xd8] sm:$0xff] %vm382_vm1, %v5715_v31  ;;  %v5764_v51 = vadd.f32 %v5763_v12, %v5762_v60  ;;  %v12090_v54 = vld [vmem:[#allocation14_spill] sm:$0xff]  ;;  %v12091_v60 = vld [vmem:[#allocation33_spill] sm:$0xff]  ;;  %v4298_v39 = vadd.f32 %v4264_v53, %v3714_v37  ;;  %v12093_v37 = vld [vmem:[#allocation27_spill] sm:$0xff] }
 0x2d1   : > { %v3133_v31 = vadd.f32 %v11198_v15, %v12090_v54  ;;  %v4297_v30 = vadd.f32 %v4261_v3, %v3713_v46 }
 0x2d3   : > { %v8071_v55 = vpop.eup %8070  ;;  %v5422_v38 = vpop.xlane.xlu1 %5421 }
 0x2d4   : > { %v5581_v14 = vmul.f32 %v8071_v55, %v10802_v24  ;;  %v4843_v28 = vpop.xlane.xlu0 %4842  ;;  %v5460_v35 = vadd.f32 %v5422_v38, %v4878_v18  ;;  %v5766_v24 = vadd.f32 %v5765_v59, %v5764_v51  ;;  %v3715_v55 = vadd.f32 %v3683_v20, %v3133_v31 }
 0x2d5   : > { %v4879_v12 = vadd.f32 %v4843_v28, %v4297_v30 }
 0x2d6   : > { %v11242_v42 = vsel %vm5490_vm13, 0.0, %v5581_v14  ;;  %vm5492_vm15 = vcmp.eq.f32.partialorder %v5460_v35, 0.0  ;;  %v5768_v9 = vadd.f32 %v5767_v6, %v5766_v24 }
 0x2d7   : > { %v5524_v43 = vsel %vm5492_vm15, 1.0, %v5460_v35  ;;  %v5716_v48 = vsel %vm5492_vm15, 0.0, %v12071_v13  ;;  %v4846_v58 = vpop.xlane.xlu1 %4845  ;;  %v5771_v0 = vsel %vm382_vm1, %v11242_v42, 0.0 }
 0x2d8   : > { %v4267_v21 = vpop.xlane.xlu0 %4266  ;;  %8074 = vrcp.f32 %v5524_v43  ;;  %6193 = vst.msk [vmem:[%s10640_s7 + $0xe0] sm:$0xff] %vm382_vm1, %v5716_v48  ;;  %v5770_v18 = vadd.f32 %v5769_v19, %v5768_v9  ;;  %v4880_v46 = vadd.f32 %v4846_v58, %v4298_v39  ;;  %v12092_v48 = vld [vmem:[#allocation30_spill] sm:$0xff] }
 0x2d9   : > { %v4299_v15 = vadd.f32 %v4267_v21, %v3715_v55 }
 0x2da   : > { %v8073_v29 = vpop.eup %8072  ;;  %v5772_v50 = vadd.f32 %v5771_v0, %v5770_v18 }
 0x2db   : > { %v5583_v14 = vmul.f32 %v8073_v29, %v12091_v60  ;;  %v4849_v38 = vpop.xlane.xlu1 %4848 }
 0x2dc   : > { %v5425_v59 = vpop.xlane.xlu0 %5424  ;;  %v4881_v24 = vadd.f32 %v4849_v38, %v4299_v15 }
 0x2dd   : > { %v5461_v3 = vadd.f32 %v5425_v59, %v4879_v12  ;;  %v5683_v51 = vsel %vm5491_vm14, 0.0, %v5583_v14  ;;  %v12094_v59 = vld [vmem:[#allocation40_spill] sm:$0xff] }
 0x2de   : > { %v5773_v6 = vsel %vm382_vm1, %v5683_v51, 0.0 }
 0x2df   : > { %vm5493_vm0 = vcmp.eq.f32.partialorder %v5461_v3, 0.0  ;;  %v5774_v22 = vadd.f32 %v5773_v6, %v5772_v50  ;;  %v5431_v49 = vpop.xlane.xlu1 %5430 }
 0x2e0   : > { %v5525_v20 = vsel %vm5493_vm0, 1.0, %v5461_v3  ;;  %v5717_v28 = vsel %vm5493_vm0, 0.0, %v12071_v13  ;;  %v5428_v32 = vpop.xlane.xlu0 %5427  ;;  %v5463_v10 = vadd.f32 %v5431_v49, %v4881_v24 }
 0x2e1   : > { %8076 = vrcp.f32 %v5525_v20  ;;  %6194 = vst.msk [vmem:[%s10640_s7 + $0xe8] sm:$0xff] %vm382_vm1, %v5717_v28  ;;  %v5462_v53 = vadd.f32 %v5428_v32, %v4880_v46 }
 0x2e2   : > { %v8075_v43 = vpop.eup %8074  ;;  %vm5495_vm2 = vcmp.eq.f32.partialorder %v5463_v10, 0.0 }
 0x2e3   : > { %vm5494_vm3 = vcmp.eq.f32.partialorder %v5462_v53, 0.0  ;;  %v5585_v58 = vmul.f32 %v8075_v43, %v12092_v48  ;;  %v5527_v21 = vsel %vm5495_vm2, 1.0, %v5463_v10  ;;  %v5719_v19 = vsel %vm5495_vm2, 0.0, %v12071_v13 }
 0x2e4   : > { %v5526_v54 = vsel %vm5494_vm3, 1.0, %v5462_v53  ;;  %8078 = vrcp.f32 %v5527_v21  ;;  %6196 = vst.msk [vmem:[%s10640_s7 + $0xf8] sm:$0xff] %vm382_vm1, %v5719_v19  ;;  %v5718_v31 = vsel %vm5494_vm3, 0.0, %v12071_v13 }
 0x2e5   : > { %v5684_v30 = vsel %vm5492_vm15, 0.0, %v5585_v58  ;;  %8080 = vrcp.f32 %v5526_v54  ;;  %6195 = vst.msk [vmem:[%s10640_s7 + $0xf0] sm:$0xff] %vm382_vm1, %v5718_v31 }
 0x2e6   : > { %v5775_v9 = vsel %vm382_vm1, %v5684_v30, 0.0 }
 0x2e7   : > { %v5776_v29 = vadd.f32 %v5775_v9, %v5774_v22 }
 0x2eb   : > { %v8077_v0 = vpop.eup %8076 }
 0x2ec   : > { %v5587_v55 = vmul.f32 %v8077_v0, %v12093_v37 }
 0x2ee   : > { %v5685_v12 = vsel %vm5493_vm0, 0.0, %v5587_v55  ;;  %v8079_v18 = vpop.eup %8078 }
 0x2ef   : > { %v5777_v60 = vsel %vm382_vm1, %v5685_v12, 0.0  ;;  %v8081_v14 = vpop.eup %8080  ;;  %v5591_v13 = vmul.f32 %v8079_v18, %v12094_v59 }
 0x2f0   : > { %v5778_v38 = vadd.f32 %v5777_v60, %v5776_v29  ;;  %v5589_v35 = vmul.f32 %v8081_v14, %v10841_v34 }
 0x2f1   : > { %v5687_v39 = vsel %vm5495_vm2, 0.0, %v5591_v13 }
 0x2f2   : > { %v5686_v15 = vsel %vm5494_vm3, 0.0, %v5589_v35  ;;  %v5781_v46 = vsel %vm382_vm1, %v5687_v39, 0.0 }
 0x2f3   : > { %v5779_v50 = vsel %vm382_vm1, %v5686_v15, 0.0 }
 0x2f4   : > { %v5780_v6 = vadd.f32 %v5779_v50, %v5778_v38 }
 0x2f6   : > { %v5782_v3 = vadd.f32 %v5781_v46, %v5780_v6 }
 0x2f8   : > { %v5783_v24 = vrot.slane %v5782_v3, 4 }
 0x2fa   : > { %v5784_v22 = vadd.f32 %v5783_v24, %v5782_v3 }
 0x2fc   : > { %v5785_v20 = vrot.slane %v5784_v22, 2 }
 0x2fe   : > { %v5786_v28 = vadd.f32 %v5785_v20, %v5784_v22 }
 0x300   : > { %v5787_v49 = vrot.slane %v5786_v28, 1 }
 0x302   : > { %v5788_v32 = vadd.f32 %v5787_v49, %v5786_v28 }
 0x304   : > { %v11290_v43 = vmul.f32 0.00390625, %v5788_v32 }
 0x306   : > { %v11294_v34 = vsub.f32 %v11242_v42, %v11290_v43  ;;  %v11297_v10 = vsub.f32 %v5683_v51, %v11290_v43  ;;  %v11300_v53 = vsub.f32 %v5684_v30, %v11290_v43  ;;  %v11303_v48 = vsub.f32 %v5685_v12, %v11290_v43 }
 0x307   : > { %v11306_v58 = vsub.f32 %v5686_v15, %v11290_v43  ;;  %v11309_v21 = vsub.f32 %v5687_v39, %v11290_v43  ;;  %v11313_v19 = vsub.f32 %v12081_v56, %v11290_v43  ;;  %v11317_v42 = vsub.f32 %v12080_v40, %v11290_v43 }
 0x308   : > { %v11321_v51 = vsub.f32 %v10773_v63, %v11290_v43  ;;  %v11325_v54 = vsub.f32 %v10814_v23, %v11290_v43  ;;  %v11333_v56 = vsub.f32 %v10851_v41, %v11290_v43  ;;  %v11339_v63 = vsub.f32 %v10873_v17, %v11290_v43 }
 0x309   : > { %v5823_v31 = vmul.f32 %v11313_v19, %v11313_v19  ;;  %v5824_v30 = vmul.f32 %v11317_v42, %v11317_v42  ;;  %v11347_v37 = vsub.f32 %v10893_v52, %v11290_v43  ;;  %v11354_v17 = vsub.f32 %v10912_v16, %v11290_v43 }
 0x30a   : > { %v5825_v40 = vmul.f32 %v11321_v51, %v11321_v51  ;;  %v5826_v23 = vmul.f32 %v11325_v54, %v11325_v54  ;;  %v5827_v41 = vmul.f32 %v11333_v56, %v11333_v56  ;;  %v5828_v18 = vmul.f32 %v11339_v63, %v11339_v63 }
 0x30b   : > { %v5855_v9 = vsel %vm382_vm1, %v5823_v31, 0.0  ;;  %v5856_v29 = vsel %vm382_vm1, %v5824_v30, 0.0  ;;  %v11361_v52 = vsub.f32 %v10931_v25, %v11290_v43  ;;  %v5829_v38 = vmul.f32 %v11347_v37, %v11347_v37 }
 0x30c   : > { %v5857_v0 = vadd.f32 %v5856_v29, %v5855_v9  ;;  %v5858_v55 = vsel %vm382_vm1, %v5825_v40, 0.0  ;;  %v5860_v60 = vsel %vm382_vm1, %v5826_v23, 0.0  ;;  %v5862_v59 = vsel %vm382_vm1, %v5827_v41, 0.0 }
 0x30d   : > { %v11368_v16 = vsub.f32 %v10952_v33, %v11290_v43  ;;  %v5830_v35 = vmul.f32 %v11354_v17, %v11354_v17  ;;  %v5864_v39 = vsel %vm382_vm1, %v5828_v18, 0.0  ;;  %v11375_v25 = vsub.f32 %v10971_v8, %v11290_v43 }
 0x30e   : > { %v5859_v12 = vadd.f32 %v5858_v55, %v5857_v0  ;;  %v5831_v50 = vmul.f32 %v11361_v52, %v11361_v52  ;;  %v5866_v6 = vsel %vm382_vm1, %v5829_v38, 0.0  ;;  %v11382_v33 = vsub.f32 %v10990_v5, %v11290_v43 }
 0x30f   : > { %v5832_v3 = vmul.f32 %v11368_v16, %v11368_v16  ;;  %v5868_v24 = vsel %vm382_vm1, %v5830_v35, 0.0  ;;  %v11389_v8 = vsub.f32 %v11009_v47, %v11290_v43  ;;  %v5833_v20 = vmul.f32 %v11375_v25, %v11375_v25 }
 0x310   : > { %v5861_v14 = vadd.f32 %v5860_v60, %v5859_v12  ;;  %v5870_v28 = vsel %vm382_vm1, %v5831_v50, 0.0  ;;  %v11396_v5 = vsub.f32 %v11020_v4, %v11290_v43  ;;  %v5834_v32 = vmul.f32 %v11382_v33, %v11382_v33 }
 0x311   : > { %v5872_v31 = vsel %vm382_vm1, %v5832_v3, 0.0  ;;  %v11403_v47 = vsub.f32 %v11031_v1, %v11290_v43  ;;  %v5835_v40 = vmul.f32 %v11389_v8, %v11389_v8  ;;  %v5874_v23 = vsel %vm382_vm1, %v5833_v20, 0.0 }
 0x312   : > { %v5863_v13 = vadd.f32 %v5862_v59, %v5861_v14  ;;  %v11410_v4 = vsub.f32 %v11041_v11, %v11290_v43  ;;  %v5836_v29 = vmul.f32 %v11396_v5, %v11396_v5  ;;  %v5876_v0 = vsel %vm382_vm1, %v5834_v32, 0.0 }
 0x313   : > { %v11417_v1 = vsub.f32 %v11053_v61, %v11290_v43  ;;  %v5837_v55 = vmul.f32 %v11403_v47, %v11403_v47  ;;  %v5878_v12 = vsel %vm382_vm1, %v5835_v40, 0.0  ;;  %v11424_v11 = vsub.f32 %v11065_v27, %v11290_v43 }
 0x314   : > { %v5865_v15 = vadd.f32 %v5864_v39, %v5863_v13  ;;  %v5838_v60 = vmul.f32 %v11410_v4, %v11410_v4  ;;  %v5880_v14 = vsel %vm382_vm1, %v5836_v29, 0.0  ;;  %v11431_v61 = vsub.f32 %v11077_v57, %v11290_v43 }
 0x315   : > { %v5839_v59 = vmul.f32 %v11417_v1, %v11417_v1  ;;  %v5882_v13 = vsel %vm382_vm1, %v5837_v55, 0.0  ;;  %v11438_v27 = vsub.f32 %v11089_v62, %v11290_v43  ;;  %v5840_v39 = vmul.f32 %v11424_v11, %v11424_v11 }
 0x316   : > { %v5867_v46 = vadd.f32 %v5866_v6, %v5865_v15  ;;  %v5884_v15 = vsel %vm382_vm1, %v5838_v60, 0.0  ;;  %v11445_v57 = vsub.f32 %v11104_v26, %v11290_v43  ;;  %v5841_v6 = vmul.f32 %v11431_v61, %v11431_v61 }
 0x317   : > { %v5812_v62 = vsub.f32 %v11119_v2, %v11290_v43 }
 0x318   : > { %v5869_v22 = vadd.f32 %v5868_v24, %v5867_v46  ;;  %v5886_v46 = vsel %vm382_vm1, %v5839_v59, 0.0  ;;  %v5842_v24 = vmul.f32 %v11438_v27, %v11438_v27  ;;  %v5843_v26 = vmul.f32 %v11445_v57, %v11445_v57 }
 0x31a   : > { %v5871_v49 = vadd.f32 %v5870_v28, %v5869_v22  ;;  %v5888_v22 = vsel %vm382_vm1, %v5840_v39, 0.0  ;;  %v5813_v28 = vsub.f32 %v11142_v45, %v11290_v43  ;;  %v5892_v2 = vsel %vm382_vm1, %v5842_v24, 0.0 }
 0x31b   : > { %v5894_v29 = vsel %vm382_vm1, %v5843_v26, 0.0 }
 0x31c   : > { %v5873_v30 = vadd.f32 %v5872_v31, %v5871_v49  ;;  %v5890_v49 = vsel %vm382_vm1, %v5841_v6, 0.0  ;;  %v5814_v31 = vsub.f32 %v11166_v7, %v11290_v43 }
 0x31e   : > { %v5875_v9 = vadd.f32 %v5874_v23, %v5873_v30  ;;  %v5844_v30 = vmul.f32 %v5812_v62, %v5812_v62  ;;  %v5815_v23 = vsub.f32 %v11194_v44, %v11290_v43  ;;  %v5849_v44 = vmul.f32 %v11294_v34, %v11294_v34 }
 0x320   : > { %v5877_v41 = vadd.f32 %v5876_v0, %v5875_v9  ;;  %v5845_v9 = vmul.f32 %v5813_v28, %v5813_v28  ;;  %v5816_v0 = vsub.f32 %v11216_v36, %v11290_v43  ;;  %v5896_v55 = vsel %vm382_vm1, %v5844_v30, 0.0 }
 0x321   : > { %v5850_v36 = vmul.f32 %v11297_v10, %v11297_v10 }
 0x322   : > { %v5879_v18 = vadd.f32 %v5878_v12, %v5877_v41  ;;  %v5846_v41 = vmul.f32 %v5814_v31, %v5814_v31  ;;  %v5898_v7 = vsel %vm382_vm1, %v5845_v9, 0.0 }
 0x324   : > { %v5881_v38 = vadd.f32 %v5880_v14, %v5879_v18  ;;  %v5847_v18 = vmul.f32 %v5815_v23, %v5815_v23  ;;  %v5848_v14 = vmul.f32 %v5816_v0, %v5816_v0 }
 0x326   : > { %v5883_v35 = vadd.f32 %v5882_v13, %v5881_v38  ;;  %v5900_v38 = vsel %vm382_vm1, %v5846_v41, 0.0  ;;  %v5902_v13 = vsel %vm382_vm1, %v5847_v18, 0.0  ;;  %v5904_v43 = vsel %vm382_vm1, %v5848_v14, 0.0 }
 0x328   : > { %v5885_v50 = vadd.f32 %v5884_v15, %v5883_v35  ;;  %v5851_v15 = vmul.f32 %v11300_v53, %v11300_v53 }
 0x32a   : > { %v5887_v3 = vadd.f32 %v5886_v46, %v5885_v50  ;;  %v5906_v50 = vsel %vm382_vm1, %v5849_v44, 0.0  ;;  %v5852_v46 = vmul.f32 %v11303_v48, %v11303_v48 }
 0x32c   : > { %v5889_v20 = vadd.f32 %v5888_v22, %v5887_v3  ;;  %v5908_v3 = vsel %vm382_vm1, %v5850_v36, 0.0  ;;  %v5853_v22 = vmul.f32 %v11306_v58, %v11306_v58 }
 0x32e   : > { %v5891_v32 = vadd.f32 %v5890_v49, %v5889_v20  ;;  %v5910_v20 = vsel %vm382_vm1, %v5851_v15, 0.0  ;;  %v5854_v49 = vmul.f32 %v11309_v21, %v11309_v21 }
 0x330   : > { %v5893_v40 = vadd.f32 %v5892_v2, %v5891_v32  ;;  %v5912_v32 = vsel %vm382_vm1, %v5852_v46, 0.0  ;;  %v5914_v2 = vsel %vm382_vm1, %v5853_v22, 0.0  ;;  %v5916_v9 = vsel %vm382_vm1, %v5854_v49, 0.0 }
 0x332   : > { %v5895_v45 = vadd.f32 %v5894_v29, %v5893_v40 }
 0x334   : > { %v5897_v12 = vadd.f32 %v5896_v55, %v5895_v45 }
 0x336   : > { %v5899_v60 = vadd.f32 %v5898_v7, %v5897_v12 }
 0x338   : > { %v5901_v59 = vadd.f32 %v5900_v38, %v5899_v60 }
 0x33a   : > { %v5903_v35 = vadd.f32 %v5902_v13, %v5901_v59 }
 0x33c   : > { %v5905_v39 = vadd.f32 %v5904_v43, %v5903_v35 }
 0x33e   : > { %v5907_v6 = vadd.f32 %v5906_v50, %v5905_v39 }
 0x340   : > { %v5909_v24 = vadd.f32 %v5908_v3, %v5907_v6 }
 0x342   : > { %v5911_v26 = vadd.f32 %v5910_v20, %v5909_v24 }
 0x344   : > { %v5913_v30 = vadd.f32 %v5912_v32, %v5911_v26 }
 0x346   : > { %v5915_v40 = vadd.f32 %v5914_v2, %v5913_v30 }
 0x348   : > { %v5917_v29 = vadd.f32 %v5916_v9, %v5915_v40  ;;  %v6998_v9 = vld [vmem:[%s11826_s4] ss:$0 sm:$0xff] }
 0x34a   : > { %v5918_v45 = vrot.slane %v5917_v29, 4 }
 0x34c   : > { %v5919_v41 = vadd.f32 %v5918_v45, %v5917_v29 }
 0x34e   : > { %v5920_v55 = vrot.slane %v5919_v41, 2 }
 0x350   : > { %v5921_v12 = vadd.f32 %v5920_v55, %v5919_v41 }
 0x352   : > { %v5922_v18 = vrot.slane %v5921_v12, 1 }
 0x354   : > { %v5923_v7 = vadd.f32 %v5922_v18, %v5921_v12 }
 0x356   : > { %v5924_v60 = vmul.f32 0.00390625, %v5923_v7 }
 0x358   : > { %v5925_v14 = vadd.f32 1e-05, %v5924_v60 }
 0x35a   : > { %8082 = vrsqrt.f32 %v5925_v14 }
 0x364   : > { %v8083_v38 = vpop.eup %8082 }
 0x365   : > { %v5950_v59 = vmul.f32 %v8083_v38, %v5812_v62  ;;  %v5951_v44 = vmul.f32 %v8083_v38, %v5813_v28  ;;  %v5952_v13 = vmul.f32 %v8083_v38, %v5814_v31  ;;  %v5953_v35 = vmul.f32 %v8083_v38, %v5815_v23 }
 0x366   : > { %v5954_v36 = vmul.f32 %v8083_v38, %v5816_v0  ;;  %v5955_v43 = vmul.f32 %v8083_v38, %v11294_v34  ;;  %v5956_v39 = vmul.f32 %v8083_v38, %v11297_v10  ;;  %v5957_v15 = vmul.f32 %v8083_v38, %v11300_v53 }
 0x367   : > { %v5958_v50 = vmul.f32 %v8083_v38, %v11303_v48  ;;  %v5959_v6 = vmul.f32 %v8083_v38, %v11306_v58  ;;  %v5960_v46 = vmul.f32 %v8083_v38, %v11309_v21  ;;  %v5929_v3 = vmul.f32 %v8083_v38, %v11313_v19  ;;  %v6997_v21 = vld [vmem:[%s11825_s3] ss:$0 sm:$0xff] }
 0x368   : > { %v5930_v62 = vmul.f32 %v8083_v38, %v11317_v42  ;;  %v5931_v28 = vmul.f32 %v8083_v38, %v11321_v51  ;;  %v5932_v31 = vmul.f32 %v8083_v38, %v11325_v54  ;;  %v5933_v34 = vmul.f32 %v8083_v38, %v11333_v56 }
 0x369   : > { %v5934_v10 = vmul.f32 %v8083_v38, %v11339_v63  ;;  %v5935_v53 = vmul.f32 %v8083_v38, %v11347_v37  ;;  %v5936_v48 = vmul.f32 %v8083_v38, %v11354_v17  ;;  %v5937_v58 = vmul.f32 %v8083_v38, %v11361_v52 }
 0x36a   : > { %v5938_v19 = vmul.f32 %v8083_v38, %v11368_v16  ;;  %v5939_v42 = vmul.f32 %v8083_v38, %v11375_v25  ;;  %v5940_v51 = vmul.f32 %v8083_v38, %v11382_v33  ;;  %v5941_v54 = vmul.f32 %v8083_v38, %v11389_v8 }
 0x36b   : > { %v5942_v56 = vmul.f32 %v8083_v38, %v11396_v5  ;;  %v5943_v63 = vmul.f32 %v8083_v38, %v11403_v47  ;;  %v5944_v37 = vmul.f32 %v8083_v38, %v11410_v4  ;;  %v5945_v17 = vmul.f32 %v8083_v38, %v11417_v1 }
 0x36c   : > { %v5946_v52 = vmul.f32 %v8083_v38, %v11424_v11  ;;  %v5947_v23 = vmul.f32 %v8083_v38, %v11431_v61  ;;  %v5948_v16 = vmul.f32 %v8083_v38, %v11438_v27  ;;  %v5949_v25 = vmul.f32 %v8083_v38, %v11445_v57 }
 0x36d   : > { %v5967_v0 = vmul.f32 %v6997_v21, %v5929_v3  ;;  %v5968_v33 = vmul.f32 %v6997_v21, %v5930_v62  ;;  %v5969_v24 = vmul.f32 %v6997_v21, %v5931_v28  ;;  %v5970_v8 = vmul.f32 %v6997_v21, %v5932_v31 }
 0x36e   : > { %v5971_v22 = vmul.f32 %v6997_v21, %v5933_v34  ;;  %v5972_v5 = vmul.f32 %v6997_v21, %v5934_v10  ;;  %v5973_v20 = vmul.f32 %v6997_v21, %v5935_v53  ;;  %v5974_v47 = vmul.f32 %v6997_v21, %v5936_v48 }
 0x36f   : > { %v5975_v26 = vmul.f32 %v6997_v21, %v5937_v58  ;;  %v5976_v4 = vmul.f32 %v6997_v21, %v5938_v19  ;;  %v5977_v49 = vmul.f32 %v6997_v21, %v5939_v42  ;;  %v5978_v1 = vmul.f32 %v6997_v21, %v5940_v51 }
 0x370   : > { %v5979_v32 = vmul.f32 %v6997_v21, %v5941_v54  ;;  %v5980_v11 = vmul.f32 %v6997_v21, %v5942_v56  ;;  %v5981_v30 = vmul.f32 %v6997_v21, %v5943_v63  ;;  %v5982_v61 = vmul.f32 %v6997_v21, %v5944_v37 }
 0x371   : > { %v5983_v2 = vmul.f32 %v6997_v21, %v5945_v17  ;;  %v5984_v27 = vmul.f32 %v6997_v21, %v5946_v52  ;;  %v5985_v40 = vmul.f32 %v6997_v21, %v5947_v23  ;;  %v5986_v57 = vmul.f32 %v6997_v21, %v5948_v16 }
 0x372   : > { %v5987_v29 = vmul.f32 %v6997_v21, %v5949_v25  ;;  %v5988_v45 = vmul.f32 %v6997_v21, %v5950_v59  ;;  %v5989_v41 = vmul.f32 %v6997_v21, %v5951_v44  ;;  %v5990_v55 = vmul.f32 %v6997_v21, %v5952_v13 }
 0x373   : > { %v5991_v12 = vmul.f32 %v6997_v21, %v5953_v35  ;;  %v5992_v18 = vmul.f32 %v6997_v21, %v5954_v36  ;;  %v5993_v7 = vmul.f32 %v6997_v21, %v5955_v43  ;;  %v5994_v60 = vmul.f32 %v6997_v21, %v5956_v39 }
 0x374   : > { %v5995_v14 = vmul.f32 %v6997_v21, %v5957_v15  ;;  %v5996_v38 = vmul.f32 %v6997_v21, %v5958_v50  ;;  %v5997_v3 = vmul.f32 %v6997_v21, %v5959_v6  ;;  %v5998_v62 = vmul.f32 %v6997_v21, %v5960_v46 }
 0x375   : > { %v11524_v28 = vadd.f32 %v6998_v9, %v5967_v0  ;;  %v11526_v31 = vadd.f32 %v6998_v9, %v5968_v33  ;;  %v11528_v34 = vadd.f32 %v6998_v9, %v5969_v24  ;;  %v11530_v10 = vadd.f32 %v6998_v9, %v5970_v8 }
 0x376   : > { %v11532_v53 = vadd.f32 %v6998_v9, %v5971_v22  ;;  %v11534_v59 = vadd.f32 %v6998_v9, %v5972_v5  ;;  %v11536_v44 = vadd.f32 %v6998_v9, %v5973_v20  ;;  %v11538_v13 = vadd.f32 %v6998_v9, %v5974_v47 }
 0x377   : > { %v11540_v35 = vadd.f32 %v6998_v9, %v5975_v26  ;;  %v11542_v36 = vadd.f32 %v6998_v9, %v5976_v4  ;;  %v11544_v43 = vadd.f32 %v6998_v9, %v5977_v49  ;;  %v11546_v39 = vadd.f32 %v6998_v9, %v5978_v1 }
 0x378   : > { %v11548_v15 = vadd.f32 %v6998_v9, %v5979_v32  ;;  %v11550_v50 = vadd.f32 %v6998_v9, %v5980_v11  ;;  %v11552_v6 = vadd.f32 %v6998_v9, %v5981_v30  ;;  %v11554_v46 = vadd.f32 %v6998_v9, %v5982_v61 }
 0x379   : > { %v11556_v48 = vadd.f32 %v6998_v9, %v5983_v2  ;;  %v11558_v58 = vadd.f32 %v6998_v9, %v5984_v27  ;;  %v11560_v21 = vadd.f32 %v6998_v9, %v5985_v40  ;;  %v11562_v19 = vadd.f32 %v6998_v9, %v5986_v57 }
 0x37a   : > { %v11564_v42 = vadd.f32 %v6998_v9, %v5987_v29  ;;  %v11566_v51 = vadd.f32 %v6998_v9, %v5988_v45  ;;  %v11568_v54 = vadd.f32 %v6998_v9, %v5989_v41  ;;  %v11570_v56 = vadd.f32 %v6998_v9, %v5990_v55 }
 0x37b   : > { %v11572_v63 = vadd.f32 %v6998_v9, %v5991_v12  ;;  %v11574_v37 = vadd.f32 %v6998_v9, %v5992_v18  ;;  %v11576_v17 = vadd.f32 %v6998_v9, %v5993_v7  ;;  %v11578_v52 = vadd.f32 %v6998_v9, %v5994_v60 }
 0x37c   : > { %v11580_v23 = vadd.f32 %v6998_v9, %v5995_v14  ;;  %v11582_v16 = vadd.f32 %v6998_v9, %v5996_v38  ;;  %vm6037_vm4 = vcmp.gt.f32.partialorder %v11524_v28, 0.0  ;;  %vm6038_vm5 = vcmp.gt.f32.partialorder %v11526_v31, 0.0 }
 0x37d   : > { %vm6039_vm6 = vcmp.gt.f32.partialorder %v11528_v34, 0.0  ;;  %vm6040_vm7 = vcmp.gt.f32.partialorder %v11530_v10, 0.0  ;;  %vm6041_vm8 = vcmp.gt.f32.partialorder %v11532_v53, 0.0  ;;  %vm6042_vm9 = vcmp.gt.f32.partialorder %v11534_v59, 0.0 }
 0x37e   : > { %vm6043_vm10 = vcmp.gt.f32.partialorder %v11536_v44, 0.0  ;;  %vm6044_vm11 = vcmp.gt.f32.partialorder %v11538_v13, 0.0  ;;  %v11601_v25 = vadd.f32 %v6998_v9, %v5997_v3  ;;  %v6069_v0 = vmul.f32 0.2, %v11524_v28 }
 0x37f   : > { %v6070_v33 = vmul.f32 0.2, %v11526_v31  ;;  %v6071_v24 = vmul.f32 0.2, %v11528_v34  ;;  %v11610_v8 = vadd.f32 %v6998_v9, %v5998_v62  ;;  %vm6052_vm13 = vcmp.gt.f32.partialorder %v11554_v46, 0.0 }
 0x380   : > { %vm6053_vm14 = vcmp.gt.f32.partialorder %v11556_v48, 0.0  ;;  %v6072_v22 = vmul.f32 0.2, %v11530_v10  ;;  %v6073_v5 = vmul.f32 0.2, %v11532_v53  ;;  %vm6058_vm3 = vcmp.gt.f32.partialorder %v11566_v51, 0.0 }
 0x381   : > { %v6074_v20 = vmul.f32 0.2, %v11534_v59  ;;  %v6075_v47 = vmul.f32 0.2, %v11536_v44  ;;  %v6076_v26 = vmul.f32 0.2, %v11538_v13  ;;  %v6101_v49 = vsel %vm6037_vm4, %v11524_v28, %v6069_v0 }
 0x382   : > { %v6077_v4 = vmul.f32 0.2, %v11540_v35  ;;  %vm6059_vm15 = vcmp.gt.f32.partialorder %v11568_v54, 0.0  ;;  %v6078_v1 = vmul.f32 0.2, %v11542_v36  ;;  %v6102_v30 = vsel %vm6038_vm5, %v11526_v31, %v6070_v33  ;;  %6133 = vst.msk [vmem:[%s11599_s14] sm:$0xff] %vm382_vm1, %v6101_v49 }
 0x383   : > { %v6079_v32 = vmul.f32 0.2, %v11544_v43  ;;  %v6080_v11 = vmul.f32 0.2, %v11546_v39  ;;  %vm6063_vm4 = vcmp.gt.f32.partialorder %v11576_v17, 0.0  ;;  %vm6064_vm2 = vcmp.gt.f32.partialorder %v11578_v52, 0.0 }
 0x384   : > { %vm6066_vm12 = vcmp.gt.f32.partialorder %v11582_v16, 0.0  ;;  %v6081_v61 = vmul.f32 0.2, %v11548_v15  ;;  %v6082_v2 = vmul.f32 0.2, %v11550_v50  ;;  %v6103_v40 = vsel %vm6039_vm6, %v11528_v34, %v6071_v24  ;;  %6134 = vst.msk [vmem:[%s11599_s14 + $0x8] sm:$0xff] %vm382_vm1, %v6102_v30 }
 0x385   : > { %v6083_v27 = vmul.f32 0.2, %v11552_v6  ;;  %vm6067_vm5 = vcmp.gt.f32.partialorder %v11601_v25, 0.0  ;;  %vm6068_vm0 = vcmp.gt.f32.partialorder %v11610_v8, 0.0  ;;  %v6084_v57 = vmul.f32 0.2, %v11554_v46 }
 0x386   : > { %v6085_v9 = vmul.f32 0.2, %v11556_v48  ;;  %v6086_v29 = vmul.f32 0.2, %v11558_v58  ;;  %v6104_v45 = vsel %vm6040_vm7, %v11530_v10, %v6072_v22  ;;  %6135 = vst.msk [vmem:[%s11599_s14 + $0x10] sm:$0xff] %vm382_vm1, %v6103_v40  ;;  %v6105_v18 = vsel %vm6041_vm8, %v11532_v53, %v6073_v5 }
 0x387   : > { %v6087_v41 = vmul.f32 0.2, %v11560_v21  ;;  %v6088_v55 = vmul.f32 0.2, %v11562_v19  ;;  %v6089_v12 = vmul.f32 0.2, %v11564_v42  ;;  %v6106_v38 = vsel %vm6042_vm9, %v11534_v59, %v6074_v20 }
 0x388   : > { %6136 = vst.msk [vmem:[%s11599_s14 + $0x18] sm:$0xff] %vm382_vm1, %v6104_v45  ;;  %v6090_v7 = vmul.f32 0.2, %v11566_v51  ;;  %v6091_v60 = vmul.f32 0.2, %v11568_v54  ;;  %6137 = vst.msk [vmem:[%s11599_s14 + $0x20] sm:$0xff] %vm382_vm1, %v6105_v18  ;;  %v6107_v31 = vsel %vm6043_vm10, %v11536_v44, %v6075_v47  ;;  %v6108_v59 = vsel %vm6044_vm11, %v11538_v13, %v6076_v26 }
 0x389   : > { %v6092_v14 = vmul.f32 0.2, %v11570_v56  ;;  %v6093_v3 = vmul.f32 0.2, %v11572_v63  ;;  %v6094_v62 = vmul.f32 0.2, %v11574_v37 }
 0x38a   : > { %v6095_v28 = vmul.f32 0.2, %v11576_v17  ;;  %6138 = vst.msk [vmem:[%s11599_s14 + $0x28] sm:$0xff] %vm382_vm1, %v6106_v38  ;;  %v6096_v34 = vmul.f32 0.2, %v11578_v52  ;;  %6139 = vst.msk [vmem:[%s11599_s14 + $0x30] sm:$0xff] %vm382_vm1, %v6107_v31 }
 0x38b   : > { %v6097_v10 = vmul.f32 0.2, %v11580_v23  ;;  %v6098_v53 = vmul.f32 0.2, %v11582_v16  ;;  %v6099_v0 = vmul.f32 0.2, %v11601_v25 }
 0x38c   : > { %v6100_v44 = vmul.f32 0.2, %v11610_v8  ;;  %vm12095_vm6 = vcmp.gt.f32.partialorder %v11540_v35, 0.0  ;;  %vm12096_vm7 = vcmp.gt.f32.partialorder %v11542_v36, 0.0  ;;  %6140 = vst.msk [vmem:[%s11599_s14 + $0x38] sm:$0xff] %vm382_vm1, %v6108_v59  ;;  %vm12097_vm8 = vcmp.gt.f32.partialorder %v11544_v43, 0.0 }
 0x38d   : > { %v6109_v33 = vsel %vm12095_vm6, %v11540_v35, %v6077_v4  ;;  %v6110_v24 = vsel %vm12096_vm7, %v11542_v36, %v6078_v1  ;;  %v6111_v13 = vsel %vm12097_vm8, %v11544_v43, %v6079_v32  ;;  %vm12098_vm9 = vcmp.gt.f32.partialorder %v11546_v39, 0.0 }
 0x38e   : > { %v6112_v22 = vsel %vm12098_vm9, %v11546_v39, %v6080_v11  ;;  %vm12099_vm10 = vcmp.gt.f32.partialorder %v11548_v15, 0.0  ;;  %vm12100_vm11 = vcmp.gt.f32.partialorder %v11550_v50, 0.0  ;;  %6141 = vst.msk [vmem:[%s11599_s14 + $0x40] sm:$0xff] %vm382_vm1, %v6109_v33  ;;  %6142 = vst.msk [vmem:[%s11599_s14 + $0x48] sm:$0xff] %vm382_vm1, %v6110_v24  ;;  %vm12101_vm6 = vcmp.gt.f32.partialorder %v11552_v6, 0.0 }
 0x38f   : > { %v6113_v5 = vsel %vm12099_vm10, %v11548_v15, %v6081_v61  ;;  %v6114_v35 = vsel %vm12100_vm11, %v11550_v50, %v6082_v2  ;;  %v6115_v36 = vsel %vm12101_vm6, %v11552_v6, %v6083_v27  ;;  %v6116_v43 = vsel %vm6052_vm13, %v11554_v46, %v6084_v57  ;;  %6143 = vst.msk [vmem:[%s11599_s14 + $0x50] sm:$0xff] %vm382_vm1, %v6111_v13 }
 0x390   : > { %v6117_v39 = vsel %vm6053_vm14, %v11556_v48, %v6085_v9  ;;  %vm12102_vm7 = vcmp.gt.f32.partialorder %v11558_v58, 0.0  ;;  %6144 = vst.msk [vmem:[%s11599_s14 + $0x58] sm:$0xff] %vm382_vm1, %v6112_v22  ;;  %6145 = vst.msk [vmem:[%s11599_s14 + $0x60] sm:$0xff] %vm382_vm1, %v6113_v5  ;;  %vm12103_vm13 = vcmp.gt.f32.partialorder %v11560_v21, 0.0  ;;  %vm12104_vm14 = vcmp.gt.f32.partialorder %v11562_v19, 0.0 }
 0x391   : > { %v6118_v15 = vsel %vm12102_vm7, %v11558_v58, %v6086_v29  ;;  %6146 = vst.msk [vmem:[%s11599_s14 + $0x68] sm:$0xff] %vm382_vm1, %v6114_v35  ;;  %v6119_v50 = vsel %vm12103_vm13, %v11560_v21, %v6087_v41  ;;  %v6120_v6 = vsel %vm12104_vm14, %v11562_v19, %v6088_v55  ;;  %vm12105_vm8 = vcmp.gt.f32.partialorder %v11564_v42, 0.0  ;;  %6147 = vst.msk [vmem:[%s11599_s14 + $0x70] sm:$0xff] %vm382_vm1, %v6115_v36 }
 0x392   : > { %v6121_v46 = vsel %vm12105_vm8, %v11564_v42, %v6089_v12  ;;  %v6122_v48 = vsel %vm6058_vm3, %v11566_v51, %v6090_v7  ;;  %6148 = vst.msk [vmem:[%s11599_s14 + $0x78] sm:$0xff] %vm382_vm1, %v6116_v43  ;;  %6149 = vst.msk [vmem:[%s11599_s14 + $0x80] sm:$0xff] %vm382_vm1, %v6117_v39  ;;  %v6123_v58 = vsel %vm6059_vm15, %v11568_v54, %v6091_v60  ;;  %vm12106_vm9 = vcmp.gt.f32.partialorder %v11570_v56, 0.0 }
 0x393   : > { %6150 = vst.msk [vmem:[%s11599_s14 + $0x88] sm:$0xff] %vm382_vm1, %v6118_v15  ;;  %v6124_v21 = vsel %vm12106_vm9, %v11570_v56, %v6092_v14  ;;  %vm12107_vm3 = vcmp.gt.f32.partialorder %v11572_v63, 0.0  ;;  %vm12108_vm10 = vcmp.gt.f32.partialorder %v11574_v37, 0.0  ;;  %6151 = vst.msk [vmem:[%s11599_s14 + $0x90] sm:$0xff] %vm382_vm1, %v6119_v50  ;;  %v6127_v51 = vsel %vm6063_vm4, %v11576_v17, %v6095_v28 }
 0x394   : > { %v6125_v19 = vsel %vm12107_vm3, %v11572_v63, %v6093_v3  ;;  %v6126_v42 = vsel %vm12108_vm10, %v11574_v37, %v6094_v62  ;;  %6152 = vst.msk [vmem:[%s11599_s14 + $0x98] sm:$0xff] %vm382_vm1, %v6120_v6  ;;  %6153 = vst.msk [vmem:[%s11599_s14 + $0xa0] sm:$0xff] %vm382_vm1, %v6121_v46  ;;  %v6128_v54 = vsel %vm6064_vm2, %v11578_v52, %v6096_v34  ;;  %vm12109_vm15 = vcmp.gt.f32.partialorder %v11580_v23, 0.0 }
 0x395   : > { %6154 = vst.msk [vmem:[%s11599_s14 + $0xa8] sm:$0xff] %vm382_vm1, %v6122_v48  ;;  %v6129_v56 = vsel %vm12109_vm15, %v11580_v23, %v6097_v10  ;;  %v6130_v63 = vsel %vm6066_vm12, %v11582_v16, %v6098_v53  ;;  %6155 = vst.msk [vmem:[%s11599_s14 + $0xb0] sm:$0xff] %vm382_vm1, %v6123_v58  ;;  %v6131_v37 = vsel %vm6067_vm5, %v11601_v25, %v6099_v0 }
 0x396   : > { %6156 = vst.msk [vmem:[%s11599_s14 + $0xb8] sm:$0xff] %vm382_vm1, %v6124_v21  ;;  %6157 = vst.msk [vmem:[%s11599_s14 + $0xc0] sm:$0xff] %vm382_vm1, %v6125_v19  ;;  %v6132_v17 = vsel %vm6068_vm0, %v11610_v8, %v6100_v44 }
 0x397   : > { %6158 = vst.msk [vmem:[%s11599_s14 + $0xc8] sm:$0xff] %vm382_vm1, %v6126_v42  ;;  %6159 = vst.msk [vmem:[%s11599_s14 + $0xd0] sm:$0xff] %vm382_vm1, %v6127_v51 }
 0x398   : > { %6160 = vst.msk [vmem:[%s11599_s14 + $0xd8] sm:$0xff] %vm382_vm1, %v6128_v54  ;;  %6161 = vst.msk [vmem:[%s11599_s14 + $0xe0] sm:$0xff] %vm382_vm1, %v6129_v56 }
 0x399   : > { %6162 = vst.msk [vmem:[%s11599_s14 + $0xe8] sm:$0xff] %vm382_vm1, %v6130_v63  ;;  %6163 = vst.msk [vmem:[%s11599_s14 + $0xf0] sm:$0xff] %vm382_vm1, %v6131_v37 }
 0x39a   : > { %6164 = vst.msk [vmem:[%s11599_s14 + $0xf8] sm:$0xff] %vm382_vm1, %v6132_v17 }
 0x39b PF: > { %s17_s21 = sadd.s32 1, %s8215_s21  }
 0x39c   : > { %p14_p4 = scmp.ge.s32.totalorder %s17_s21, 4  }
 0x39e   :  { %16 = sbr.rel (!%p14_p4) target bundleno = 1 (0x1), region = 97 }

</bundles_post_ra>
